<compile_context>
chip_gen: v5e
topology: v5e:2x2
jax: 0.10.0
libtpu: 0.0.40
codegen_flags: <defaults>
</compile_context>

<pallas_src>
import functools

import numpy as np

import jax
import jax.numpy as jnp
from jax.experimental import pallas as pl
from jax.experimental.pallas import tpu as pltpu


# ----------------------------------------------------------------------------
# Fused backbone kernel (single invocation, everything resident in VMEM):
# Conv3x3(same) -> BN2d(per view) -> ReLU -> MaxPool2 -> Flatten -> Linear.
# ----------------------------------------------------------------------------
def _fused_backbone_kernel(x_ref, mask_ref, wf_ref, cb_ref, gamma_ref,
                           beta_ref, gfc_ref, fcb_ref, o_ref, *,
                           v, n, c_out, h, w, eps):
    hw = h * w
    seg = n * hw                  # elements per view (per channel)
    total = v * seg

    x = x_ref[...]                # [c_in, total], lane-dense

    # ---- Conv2d(k=3, s=1, p=1): XLU lane rolls + precomputed {0,1} masks
    #      build a [9*c_in, total] patch slab; ONE MXU matmul with K=9*c_in. --
    masks = mask_ref[...]         # [8, total]
    pieces = []
    m = 0
    for dh in (-1, 0, 1):
        for dw in (-1, 0, 1):
            if dh == 0 and dw == 0:
                pieces.append(x)
            else:
                shift = (-(dh * w + dw)) % total          # non-negative, static
                shifted = pltpu.roll(x, shift, axis=1)    # XLU lane rotate
                pieces.append(shifted * masks[m:m + 1, :])
                m += 1
    patches = jnp.concatenate(pieces, axis=0)             # [9*c_in, total]
    conv = jnp.dot(wf_ref[...], patches,
                   preferred_element_type=jnp.float32) + cb_ref[...]

    # ---- BatchNorm2d (training-mode biased stats, PER VIEW) + ReLU.
    #      Single pass: sum & sum-of-squares over each 512-lane view segment. -
    conv3 = conv.reshape(c_out, v, seg)                    # seg % 128 == 0
    inv_cnt = 1.0 / float(seg)
    mean = jnp.sum(conv3, axis=2, keepdims=True) * inv_cnt
    ex2 = jnp.sum(conv3 * conv3, axis=2, keepdims=True) * inv_cnt
    var = ex2 - mean * mean
    scale = jax.lax.rsqrt(var + eps) * gamma_ref[...]      # gamma: [c_out,1,1]
    y3 = (conv3 - mean) * scale + beta_ref[...]
    r = jnp.maximum(y3, 0.0).reshape(c_out, total)

    # ---- MaxPool2d(2): 2x2 window max via lane rolls.  Only even (h, w)
    #      positions are consumed downstream (baked into gfc), so roll wraps
    #      across row / sample boundaries are never read. ----
    cand = jnp.maximum(
        jnp.maximum(r, pltpu.roll(r, total - 1, axis=1)),
        jnp.maximum(pltpu.roll(r, total - w, axis=1),
                    pltpu.roll(r, total - (w + 1), axis=1)))

    # ---- Flatten + Linear: pooled-position selection pre-baked into the
    #      scattered, lane-padded FC weight gfc [c_out, hw, fc_pad].  One
    #      batched MXU contraction (batch=c_out, K=hw) + sum over channels. ---
    cand3 = cand.reshape(c_out, v * n, hw)                 # hw % 128 == 0
    per_c = jax.lax.dot_general(
        cand3, gfc_ref[...],
        dimension_numbers=(((2,), (1,)), ((0,), (0,))),
        preferred_element_type=jnp.float32)                # [c_out, v*n, fc_pad]
    o_ref[...] = (jnp.sum(per_c, axis=0) + fcb_ref[...]).astype(o_ref.dtype)


def _make_fused_call(vn, fc_pad, *, v, n, c_out, h, w, eps=1e-5):
    kernel = functools.partial(_fused_backbone_kernel,
                               v=v, n=n, c_out=c_out, h=h, w=w, eps=eps)
    # Grid-less call: every operand is a whole-array VMEM block (total VMEM
    # footprint ~1.5 MiB at these shapes — far under every generation's limit).
    return pl.pallas_call(
        kernel,
        out_shape=jax.ShapeDtypeStruct((vn, fc_pad), jnp.float32),
    )


# ----------------------------------------------------------------------------
# One-time host-side parameter repacking (no per-forward weight transposes).
# ----------------------------------------------------------------------------
def prepare_params(params, *, h, w):
    conv_w = np.asarray(params["conv_w"], np.float32)      # [O, C, 3, 3]
    o_ch, c_in, kh, kw = conv_w.shape
    assert (kh, kw) == (3, 3)
    # Flatten to [O, (kh*kw)*C], tap-major then c_in — matches the in-kernel
    # patch stacking order (dh outer, dw inner, channels contiguous).
    w_flat = np.transpose(conv_w, (0, 2, 3, 1)).reshape(o_ch, kh * kw * c_in)

    fc_w = np.asarray(params["fc_w"], np.float32)          # [fc_out, O*h2*w2]
    fc_out = fc_w.shape[0]
    fc_pad = ((fc_out + 127) // 128) * 128                 # lane-dense RHS/out
    h2, w2 = h // 2, w // 2
    w_chw = fc_w.reshape(fc_out, o_ch, h2, w2)
    # Scatter FC weights onto the (even-h, even-w) pre-pool lane positions so
    # pooled-selection + Flatten + Linear become one batched matmul.
    gfc = np.zeros((o_ch, h * w, fc_pad), np.float32)
    ii, jj = np.meshgrid(np.arange(h2), np.arange(w2), indexing="ij")
    q = (2 * ii * w + 2 * jj).ravel()
    gfc[:, q, :fc_out] = np.transpose(w_chw, (1, 2, 3, 0)).reshape(
        o_ch, h2 * w2, fc_out)

    fc_b = np.zeros((1, fc_pad), np.float32)
    fc_b[0, :fc_out] = np.asarray(params["fc_b"], np.float32)

    prepared = {
        "w_flat": jnp.asarray(w_flat),
        "conv_b": jnp.asarray(
            np.asarray(params["conv_b"], np.float32).reshape(o_ch, 1)),
        "bn_gamma": jnp.asarray(
            np.asarray(params["bn_gamma"], np.float32).reshape(o_ch, 1, 1)),
        "bn_beta": jnp.asarray(
            np.asarray(params["bn_beta"], np.float32).reshape(o_ch, 1, 1)),
        "gfc": jnp.asarray(gfc),
        "fc_b": jnp.asarray(fc_b),
    }
    return prepared, fc_out


def _make_conv_masks(v, n, h, w):
    """Precompute the 8 non-center 3x3-tap boundary masks, tiled per image."""
    hw = h * w
    pos = np.arange(hw)
    hh, ww = pos // w, pos % w
    rows = []
    for dh in (-1, 0, 1):
        for dw in (-1, 0, 1):
            if dh == 0 and dw == 0:
                continue
            valid = ((hh + dh >= 0) & (hh + dh < h) &
                     (ww + dw >= 0) & (ww + dw < w))
            rows.append(valid.astype(np.float32))
    return np.tile(np.stack(rows, axis=0), (1, v * n))      # [8, v*n*h*w]


# ----------------------------------------------------------------------------
# Graph_Backbones.forward equivalent: shared-weight backbone over all views.
# ----------------------------------------------------------------------------
@functools.partial(jax.jit, static_argnames=("fc_out",))
def _forward_stacked(xs_vnchw, masks, prepared, *, fc_out):
    v, n, c_in, h, w = xs_vnchw.shape
    # Single layout op: one lane-dense [C, V*N*H*W] slab for all views.
    x_cm = jnp.transpose(xs_vnchw, (2, 0, 1, 3, 4)).reshape(c_in, v * n * h * w)
    c_out = prepared["conv_b"].shape[0]
    fc_pad = prepared["fc_b"].shape[-1]
    call = _make_fused_call(v * n, fc_pad, v=v, n=n, c_out=c_out, h=h, w=w)
    out = call(x_cm, masks, prepared["w_flat"], prepared["conv_b"],
               prepared["bn_gamma"], prepared["bn_beta"],
               prepared["gfc"], prepared["fc_b"])
    return out[:, :fc_out].reshape(v, n, fc_out)


def graph_backbones_forward(views, graph, prepared, fc_out):
    """Mirrors Graph_Backbones.forward: shared-weight backbone applied to
    every view; returns the list X of per-view embeddings."""
    # TODO(synk): GraphConv (graph-attention message passing) has no source in
    # the spec, so `graph` is unused and the per-layer attention list C is not
    # produced; the per-view backbone is a representative LAYER_MAPPINGS chain.
    del graph
    xs = jnp.stack(views, axis=0)                          # [V, N, C, H, W]
    v, n, _, h, w = xs.shape
    assert h % 2 == 0 and w % 2 == 0, "H, W must be even for MaxPool2d(2)"
    assert (h * w) % 128 == 0, "H*W must be a multiple of 128 (lane tiling)"
    masks = jnp.asarray(_make_conv_masks(v, n, h, w))
    out = _forward_stacked(xs, masks, prepared, fc_out=fc_out)
    return [out[i] for i in range(v)]


# ----------------------------------------------------------------------------
# Pure-JAX reference (mirrors PyTorch semantics) for a correctness check.
# ----------------------------------------------------------------------------
def backbone_forward_ref(x, params):
    y = jax.lax.conv_general_dilated(
        x, params["conv_w"], window_strides=(1, 1), padding=((1, 1), (1, 1)),
        dimension_numbers=("NCHW", "OIHW", "NCHW"),
    ) + params["conv_b"].reshape(1, -1, 1, 1)
    mean = jnp.mean(y, axis=(0, 2, 3), keepdims=True)
    var = jnp.mean((y - mean) ** 2, axis=(0, 2, 3), keepdims=True)
    y = (y - mean) * jax.lax.rsqrt(var + 1e-5)
    y = y * params["bn_gamma"].reshape(1, -1, 1, 1) + \
        params["bn_beta"].reshape(1, -1, 1, 1)
    y = jnp.maximum(y, 0.0)
    N, C, H, W = y.shape
    y = y.reshape(N, C, H // 2, 2, W // 2, 2).max(axis=(3, 5))
    y = y.reshape(N, -1)
    return y @ params["fc_w"].T + params["fc_b"]


# ----------------------------------------------------------------------------
if __name__ == "__main__":
    key = jax.random.PRNGKey(0)
    k_x1, k_x2, k_cw, k_cb, k_fw, k_fb = jax.random.split(key, 6)

    N, C_IN, H, W = 2, 4, 16, 16
    C_OUT, FC_OUT = 8, 32
    FC_IN = C_OUT * (H // 2) * (W // 2)                    # 512

    # Two views through the shared-weight backbone (a single backbone config
    # in Graph_Backbones => shared_weights=True).
    views = [jax.random.normal(k_x1, (N, C_IN, H, W), dtype=jnp.float32),
             jax.random.normal(k_x2, (N, C_IN, H, W), dtype=jnp.float32)]
    graph = jnp.eye(N, dtype=jnp.float32)                  # placeholder adjacency

    params = {
        "conv_w": 0.1 * jax.random.normal(k_cw, (C_OUT, C_IN, 3, 3), jnp.float32),
        "conv_b": 0.1 * jax.random.normal(k_cb, (C_OUT,), jnp.float32),
        "bn_gamma": jnp.ones((C_OUT,), jnp.float32),
        "bn_beta": jnp.zeros((C_OUT,), jnp.float32),
        "fc_w": 0.05 * jax.random.normal(k_fw, (FC_OUT, FC_IN), jnp.float32),
        "fc_b": 0.05 * jax.random.normal(k_fb, (FC_OUT,), jnp.float32),
    }
    prepared, fc_out = prepare_params(params, h=H, w=W)

    X = graph_backbones_forward(views, graph, prepared, fc_out)
    X = [jax.block_until_ready(x) for x in X]

    for v_in, x_out in zip(views, X):
        ref = jax.block_until_ready(backbone_forward_ref(v_in, params))
        assert x_out.shape == (N, FC_OUT), x_out.shape
        err = float(jnp.max(jnp.abs(x_out - ref)))
        assert jnp.allclose(x_out, ref, atol=5e-4, rtol=5e-4), err

    print("KERNEL_OK")
</pallas_src>

<mosaic_0001>
module attributes {stable_mosaic.version = 11 : i64} {
  func.func @_fused_backbone_kernel(%arg0: memref<4x1024xf32, #tpu.memory_space<vmem>>, %arg1: memref<8x1024xf32, #tpu.memory_space<vmem>>, %arg2: memref<8x36xf32, #tpu.memory_space<vmem>>, %arg3: memref<8x1xf32, #tpu.memory_space<vmem>>, %arg4: memref<8x1x1xf32, #tpu.memory_space<vmem>>, %arg5: memref<8x1x1xf32, #tpu.memory_space<vmem>>, %arg6: memref<8x256x128xf32, #tpu.memory_space<vmem>>, %arg7: memref<1x128xf32, #tpu.memory_space<vmem>>, %arg8: memref<4x128xf32, #tpu.memory_space<vmem>>) attributes {dimension_semantics = [], scalar_prefetch = 0 : i64, scratch_operands = 0 : i64, tpu.core_type = #tpu.core_type<tc>} {
    %c0 = arith.constant 0 : index
    %c0_0 = arith.constant 0 : index
    %0 = vector.load %arg0[%c0, %c0_0] : memref<4x1024xf32, #tpu.memory_space<vmem>>, vector<4x1024xf32>
    %c0_1 = arith.constant 0 : index
    %c0_2 = arith.constant 0 : index
    %1 = vector.load %arg1[%c0_1, %c0_2] : memref<8x1024xf32, #tpu.memory_space<vmem>>, vector<8x1024xf32>
    %c17_i32 = arith.constant 17 : i32
    %2 = tpu.dynamic_rotate %0 by %c17_i32 dim 1 : vector<4x1024xf32>, i32 -> vector<4x1024xf32>
    %3 = vector.extract_strided_slice %1 {offsets = [0, 0], sizes = [1, 1024], strides = [1, 1]} : vector<8x1024xf32> to vector<1x1024xf32>
    %4 = vector.broadcast %3 : vector<1x1024xf32> to vector<4x1024xf32>
    %5 = arith.mulf %2, %4 : vector<4x1024xf32>
    %c16_i32 = arith.constant 16 : i32
    %6 = tpu.dynamic_rotate %0 by %c16_i32 dim 1 : vector<4x1024xf32>, i32 -> vector<4x1024xf32>
    %7 = vector.extract_strided_slice %1 {offsets = [1, 0], sizes = [1, 1024], strides = [1, 1]} : vector<8x1024xf32> to vector<1x1024xf32>
    %8 = vector.broadcast %7 : vector<1x1024xf32> to vector<4x1024xf32>
    %9 = arith.mulf %6, %8 : vector<4x1024xf32>
    %c15_i32 = arith.constant 15 : i32
    %10 = tpu.dynamic_rotate %0 by %c15_i32 dim 1 : vector<4x1024xf32>, i32 -> vector<4x1024xf32>
    %11 = vector.extract_strided_slice %1 {offsets = [2, 0], sizes = [1, 1024], strides = [1, 1]} : vector<8x1024xf32> to vector<1x1024xf32>
    %12 = vector.broadcast %11 : vector<1x1024xf32> to vector<4x1024xf32>
    %13 = arith.mulf %10, %12 : vector<4x1024xf32>
    %c1_i32 = arith.constant 1 : i32
    %14 = tpu.dynamic_rotate %0 by %c1_i32 dim 1 : vector<4x1024xf32>, i32 -> vector<4x1024xf32>
    %15 = vector.extract_strided_slice %1 {offsets = [3, 0], sizes = [1, 1024], strides = [1, 1]} : vector<8x1024xf32> to vector<1x1024xf32>
    %16 = vector.broadcast %15 : vector<1x1024xf32> to vector<4x1024xf32>
    %17 = arith.mulf %14, %16 : vector<4x1024xf32>
    %c1023_i32 = arith.constant 1023 : i32
    %18 = tpu.dynamic_rotate %0 by %c1023_i32 dim 1 : vector<4x1024xf32>, i32 -> vector<4x1024xf32>
    %19 = vector.extract_strided_slice %1 {offsets = [4, 0], sizes = [1, 1024], strides = [1, 1]} : vector<8x1024xf32> to vector<1x1024xf32>
    %20 = vector.broadcast %19 : vector<1x1024xf32> to vector<4x1024xf32>
    %21 = arith.mulf %18, %20 : vector<4x1024xf32>
    %c1009_i32 = arith.constant 1009 : i32
    %22 = tpu.dynamic_rotate %0 by %c1009_i32 dim 1 : vector<4x1024xf32>, i32 -> vector<4x1024xf32>
    %23 = vector.extract_strided_slice %1 {offsets = [5, 0], sizes = [1, 1024], strides = [1, 1]} : vector<8x1024xf32> to vector<1x1024xf32>
    %24 = vector.broadcast %23 : vector<1x1024xf32> to vector<4x1024xf32>
    %25 = arith.mulf %22, %24 : vector<4x1024xf32>
    %c1008_i32 = arith.constant 1008 : i32
    %26 = tpu.dynamic_rotate %0 by %c1008_i32 dim 1 : vector<4x1024xf32>, i32 -> vector<4x1024xf32>
    %27 = vector.extract_strided_slice %1 {offsets = [6, 0], sizes = [1, 1024], strides = [1, 1]} : vector<8x1024xf32> to vector<1x1024xf32>
    %28 = vector.broadcast %27 : vector<1x1024xf32> to vector<4x1024xf32>
    %29 = arith.mulf %26, %28 : vector<4x1024xf32>
    %c1007_i32 = arith.constant 1007 : i32
    %30 = tpu.dynamic_rotate %0 by %c1007_i32 dim 1 : vector<4x1024xf32>, i32 -> vector<4x1024xf32>
    %31 = vector.extract_strided_slice %1 {offsets = [7, 0], sizes = [1, 1024], strides = [1, 1]} : vector<8x1024xf32> to vector<1x1024xf32>
    %32 = vector.broadcast %31 : vector<1x1024xf32> to vector<4x1024xf32>
    %33 = arith.mulf %30, %32 : vector<4x1024xf32>
    %34 = tpu.concatenate %5, %9, %13, %17, %0, %21, %25, %29, %33 in 0 : vector<4x1024xf32>, vector<4x1024xf32>, vector<4x1024xf32>, vector<4x1024xf32>, vector<4x1024xf32>, vector<4x1024xf32>, vector<4x1024xf32>, vector<4x1024xf32>, vector<4x1024xf32> -> vector<36x1024xf32>
    %c0_3 = arith.constant 0 : index
    %c0_4 = arith.constant 0 : index
    %35 = vector.load %arg2[%c0_3, %c0_4] : memref<8x36xf32, #tpu.memory_space<vmem>>, vector<8x36xf32>
    %cst = arith.constant dense<0.000000e+00> : vector<8x1024xf32>
    %36 = tpu.matmul %35, %34, %cst {dimension_numbers = #tpu.dot_dimension_numbers<[1], [0], [0], [1], [0, 0, 1, 1], [], []>} : vector<8x36xf32>, vector<36x1024xf32>, vector<8x1024xf32> -> vector<8x1024xf32>
    %c0_5 = arith.constant 0 : index
    %c0_6 = arith.constant 0 : index
    %37 = vector.load %arg3[%c0_5, %c0_6] : memref<8x1xf32, #tpu.memory_space<vmem>>, vector<8x1xf32>
    %38 = vector.broadcast %37 : vector<8x1xf32> to vector<8x1024xf32>
    %39 = arith.addf %36, %38 : vector<8x1024xf32>
    %40 = vector.shape_cast %39 : vector<8x1024xf32> to vector<8x2x512xf32>
    %cst_7 = arith.constant dense<0.000000e+00> : vector<8x2xf32>
    %41 = vector.multi_reduction <add>, %40, %cst_7 [2] : vector<8x2x512xf32> to vector<8x2xf32>
    %42 = vector.shape_cast %41 : vector<8x2xf32> to vector<8x2x1xf32>
    %cst_8 = arith.constant 0.001953125 : f32
    %43 = vector.broadcast %cst_8 : f32 to vector<8x2x1xf32>
    %44 = arith.mulf %42, %43 : vector<8x2x1xf32>
    %45 = arith.mulf %40, %40 : vector<8x2x512xf32>
    %cst_9 = arith.constant dense<0.000000e+00> : vector<8x2xf32>
    %46 = vector.multi_reduction <add>, %45, %cst_9 [2] : vector<8x2x512xf32> to vector<8x2xf32>
    %47 = vector.shape_cast %46 : vector<8x2xf32> to vector<8x2x1xf32>
    %cst_10 = arith.constant 0.001953125 : f32
    %48 = vector.broadcast %cst_10 : f32 to vector<8x2x1xf32>
    %49 = arith.mulf %47, %48 : vector<8x2x1xf32>
    %50 = arith.mulf %44, %44 : vector<8x2x1xf32>
    %51 = arith.subf %49, %50 : vector<8x2x1xf32>
    %cst_11 = arith.constant 9.99999974E-6 : f32
    %52 = vector.broadcast %cst_11 : f32 to vector<8x2x1xf32>
    %53 = arith.addf %51, %52 : vector<8x2x1xf32>
    %54 = math.rsqrt %53 : vector<8x2x1xf32>
    %c0_12 = arith.constant 0 : index
    %c0_13 = arith.constant 0 : index
    %c0_14 = arith.constant 0 : index
    %55 = vector.load %arg4[%c0_12, %c0_13, %c0_14] : memref<8x1x1xf32, #tpu.memory_space<vmem>>, vector<8x1x1xf32>
    %56 = vector.broadcast %55 : vector<8x1x1xf32> to vector<8x2x1xf32>
    %57 = arith.mulf %54, %56 : vector<8x2x1xf32>
    %58 = vector.broadcast %44 : vector<8x2x1xf32> to vector<8x2x512xf32>
    %59 = arith.subf %40, %58 : vector<8x2x512xf32>
    %60 = vector.broadcast %57 : vector<8x2x1xf32> to vector<8x2x512xf32>
    %61 = arith.mulf %59, %60 : vector<8x2x512xf32>
    %c0_15 = arith.constant 0 : index
    %c0_16 = arith.constant 0 : index
    %c0_17 = arith.constant 0 : index
    %62 = vector.load %arg5[%c0_15, %c0_16, %c0_17] : memref<8x1x1xf32, #tpu.memory_space<vmem>>, vector<8x1x1xf32>
    %63 = vector.broadcast %62 : vector<8x1x1xf32> to vector<8x2x512xf32>
    %64 = arith.addf %61, %63 : vector<8x2x512xf32>
    %cst_18 = arith.constant 0.000000e+00 : f32
    %65 = vector.broadcast %cst_18 : f32 to vector<8x2x512xf32>
    %66 = arith.maximumf %64, %65 : vector<8x2x512xf32>
    %67 = vector.shape_cast %66 : vector<8x2x512xf32> to vector<8x1024xf32>
    %c1023_i32_19 = arith.constant 1023 : i32
    %68 = tpu.dynamic_rotate %67 by %c1023_i32_19 dim 1 : vector<8x1024xf32>, i32 -> vector<8x1024xf32>
    %69 = arith.maximumf %67, %68 : vector<8x1024xf32>
    %c1008_i32_20 = arith.constant 1008 : i32
    %70 = tpu.dynamic_rotate %67 by %c1008_i32_20 dim 1 : vector<8x1024xf32>, i32 -> vector<8x1024xf32>
    %c1007_i32_21 = arith.constant 1007 : i32
    %71 = tpu.dynamic_rotate %67 by %c1007_i32_21 dim 1 : vector<8x1024xf32>, i32 -> vector<8x1024xf32>
    %72 = arith.maximumf %70, %71 : vector<8x1024xf32>
    %73 = arith.maximumf %69, %72 : vector<8x1024xf32>
    %74 = vector.shape_cast %73 : vector<8x1024xf32> to vector<8x4x256xf32>
    %c0_22 = arith.constant 0 : index
    %c0_23 = arith.constant 0 : index
    %c0_24 = arith.constant 0 : index
    %75 = vector.load %arg6[%c0_22, %c0_23, %c0_24] : memref<8x256x128xf32, #tpu.memory_space<vmem>>, vector<8x256x128xf32>
    %cst_25 = arith.constant dense<0.000000e+00> : vector<8x4x128xf32>
    %76 = tpu.matmul %74, %75, %cst_25 {dimension_numbers = #tpu.dot_dimension_numbers<[2], [1], [1], [2], [0, 0, 0, 1, 1, 2], [0], [0]>} : vector<8x4x256xf32>, vector<8x256x128xf32>, vector<8x4x128xf32> -> vector<8x4x128xf32>
    %cst_26 = arith.constant dense<0.000000e+00> : vector<4x128xf32>
    %77 = vector.multi_reduction <add>, %76, %cst_26 [0] : vector<8x4x128xf32> to vector<4x128xf32>
    %c0_27 = arith.constant 0 : index
    %c0_28 = arith.constant 0 : index
    %78 = vector.load %arg7[%c0_27, %c0_28] : memref<1x128xf32, #tpu.memory_space<vmem>>, vector<1x128xf32>
    %79 = vector.broadcast %78 : vector<1x128xf32> to vector<4x128xf32>
    %80 = arith.addf %77, %79 : vector<4x128xf32>
    %c0_29 = arith.constant 0 : index
    %c0_30 = arith.constant 0 : index
    %81 = vector.load %arg8[%c0_29, %c0_30] : memref<4x128xf32, #tpu.memory_space<vmem>>, vector<4x128xf32>
    tpu.vector_store %arg8[%c0_29, %c0_30], %80 {strides = array<i32>} : memref<4x128xf32, #tpu.memory_space<vmem>>, vector<4x128xf32>,
    return
  }
}

</mosaic_0001>

<bundles_post_ra>
// kernel: _forward_stacked.1
= control target key start
LH: loop header
LB: loop body
LE: loop exit
PB: predicated region body
PF: predicated region fallthrough
CT: control target
= control target key end

     0   :  { %13 = vsyncpa [#allocation3], 0  ;;  %s4215_s0 = inlined_call_operand.vmem [shape: f32[4,1024], index: 0, kind: input, shape index: {}]   ;;  %s4216_s1 = inlined_call_operand.vmem [shape: f32[8,1024], index: 1, kind: input, shape index: {}]   ;;  %s4217_s2 = inlined_call_operand.vmem [shape: f32[8,36], index: 2, kind: input, shape index: {}]   ;;  %s4218_s3 = inlined_call_operand.vmem [shape: f32[8,1], index: 3, kind: input, shape index: {}]   ;;  %s4219_s4 = inlined_call_operand.vmem [shape: f32[8,1,1], index: 4, kind: input, shape index: {}]   ;;  %s4220_s5 = inlined_call_operand.vmem [shape: f32[8,1,1], index: 5, kind: input, shape index: {}]   ;;  %s4221_s6 = inlined_call_operand.hbm [shape: f32[8,256,128], index: 6, kind: input, shape index: {}]   ;;  %s4222_s7 = inlined_call_operand.vmem [shape: f32[1,128], index: 7, kind: input, shape index: {}]   ;;  %s4223_s8 = inlined_call_operand.hbm [shape: f32[4,128], index: 8, kind: output, shape index: {}]  }
   0x1   :  { %14 = vsyncpa [#allocation4], 0  ;;  %s31_s29 = sshll.u32 %s4221_s6, 4  ;;  %s2851_s30 = smov [#allocation2]   ;;  %s32_s29 = int_to_ptr.hbm [resolvable:$true] %s31_s29 }
   0x2   :  { %s33_s9 = sshll.u32 %s2851_s30, 4  ;;  %s2852_s10 = smov 128   ;;  %s34_s9 = int_to_ptr.vmem [resolvable:$true] %s33_s9 }
   0x3   :  { %s2853_s11 = smov 8  }
   0x4   :  { %39 = dma.hbm_to_vmem [thread:$0]  %s32_s29, 32768, %s34_s9, [#allocation3], %s2852_s10, %s2852_s10, %s2853_s11  }
   0x5   :  { %2847 = dma.done.wait [#allocation3], 32768  }
   0x6   :  { %2848 = vsyncadd [#allocation3], 4294934528  ;;  %v2918_v0 = vld [vmem:[%s4215_s0 + $0x8] sm:$0xff]  ;;  %v2923_v1 = vld [vmem:[%s4215_s0] sm:$0xff]  ;;  %s2854_s19 = smov 17   ;;  %s2856_s20 = smov 15  }
   0x7   :  { %v2928_v2 = vld [vmem:[%s4215_s0 + $0x10] sm:$0xff]  ;;  %64 = vst [vmem:[#allocation1 + $0x10] ss:$2 sm:$0xff] %v2918_v0  ;;  %v2934_v3 = vld [vmem:[%s4215_s0 + $0x18] sm:$0xff]  ;;  %s2855_s0 = smov 16   ;;  %s2857_s21 = smov 1  }
   0x8   :  { %62 = vst [vmem:[#allocation1] ss:$2 sm:$0xff] %v2923_v1  ;;  %s2858_s22 = smov 127   ;;  %s2859_s23 = smov 113   ;;  %vm695_vm4 = vcmask 1043456   ;;  %vm735_vm9 = vcmask 293888  }
   0x9   :  { %66 = vst [vmem:[#allocation1 + $0x20] ss:$2 sm:$0xff] %v2928_v2  ;;  %s2860_s24 = smov 112   ;;  %s2861_s25 = smov 111   ;;  %vm939_vm10 = vcmask 1045508   ;;  %vm944_vm11 = vcmask 1045504  }
   0xa   :  { %68 = vst [vmem:[#allocation1 + $0x30] ss:$2 sm:$0xff] %v2934_v3  ;;  %vm937_vm12 = vcmask 1041408   ;;  %vm942_vm13 = vcmask 1043458   ;;  %vm946_vm14 = vcmask 1045506   ;;  %vm981_vm15 = vcmask 1047556  }
   0xb   :  { %s2721_s9 = sshll.u32 %s4223_s8, 4  ;;  %s2722_s9 = int_to_ptr.hbm [resolvable:$true] %s2721_s9 }
   0xe   :  { %v72_v4 = vld.sshfl [vmem:[#allocation1 + $0x18] sm:$0xff pattern:$0x75316420]  ;;  %v71_v5 = vld.sshfl [vmem:[#allocation1 + $0x10] sm:$0xff pattern:$0x75316420] }
   0xf   :  { %91 = vrot.lane.b32.xlu1 %v72_v4, %s2854_s19  ;;  %89 = vrot.lane.b32.xlu0 %v71_v5, %s2854_s19  ;;  %130 = vst [vmem:[#allocation1 + $0x10] ss:$2 sm:$0xff] %v2918_v0  ;;  %v70_v6 = vld.sshfl [vmem:[#allocation1 + $0x8] sm:$0xff pattern:$0x75316420] }
  0x10   :  { %87 = vrot.lane.b32.xlu2 %v70_v6, %s2854_s19  ;;  %v2943_v7 = vld.sshfl [vmem:[#allocation1] sm:$0xff pattern:$0x75316420]  ;;  %v2948_v9 = vld.sshfl [vmem:[#allocation1 + $0x28] sm:$0xff pattern:$0x75316420] }
  0x11   :  { %v2945_v8 = vld.sshfl [vmem:[#allocation1 + $0x20] sm:$0xff pattern:$0x75316420]  ;;  %128 = vst [vmem:[#allocation1] ss:$2 sm:$0xff] %v2923_v1 }
  0x12   :  { %132 = vst [vmem:[#allocation1 + $0x20] ss:$2 sm:$0xff] %v2928_v2  ;;  %v2951_v10 = vld.sshfl [vmem:[#allocation1 + $0x30] sm:$0xff pattern:$0x75316420] }
  0x13   :  { %v2953_v11 = vld.sshfl [vmem:[#allocation1 + $0x38] sm:$0xff pattern:$0x75316420] }
  0x14   :  { %134 = vst [vmem:[#allocation1 + $0x30] ss:$2 sm:$0xff] %v2934_v3 }
  0x16   :  { %v137_v12 = vld.sshfl [vmem:[#allocation1 + $0x10] sm:$0xff pattern:$0x75316420]  ;;  %v138_v13 = vld.sshfl [vmem:[#allocation1 + $0x18] sm:$0xff pattern:$0x75316420] }
  0x17   :  { %155 = vrot.lane.b32.xlu1 %v137_v12, %s2855_s0  ;;  %194 = vst [vmem:[#allocation1 + $0x10] ss:$2 sm:$0xff] %v2918_v0 }
  0x18   :  { %157 = vrot.lane.b32.xlu2 %v138_v13, %s2855_s0  ;;  %v136_v14 = vld.sshfl [vmem:[#allocation1 + $0x8] sm:$0xff pattern:$0x75316420]  ;;  %v2959_v15 = vld.sshfl [vmem:[#allocation1] sm:$0xff pattern:$0x75316420] }
  0x19   :  { %153 = vrot.lane.b32.xlu0 %v136_v14, %s2855_s0  ;;  %192 = vst [vmem:[#allocation1] ss:$2 sm:$0xff] %v2923_v1  ;;  %v2963_v16 = vld.sshfl [vmem:[#allocation1 + $0x20] sm:$0xff pattern:$0x75316420] }
  0x1a   :  { %v2965_v17 = vld.sshfl [vmem:[#allocation1 + $0x28] sm:$0xff pattern:$0x75316420] }
  0x1b   :  { %196 = vst [vmem:[#allocation1 + $0x20] ss:$2 sm:$0xff] %v2928_v2  ;;  %v2968_v18 = vld.sshfl [vmem:[#allocation1 + $0x30] sm:$0xff pattern:$0x75316420] }
  0x1c   :  { %v2970_v19 = vld.sshfl [vmem:[#allocation1 + $0x38] sm:$0xff pattern:$0x75316420] }
  0x1d   :  { %198 = vst [vmem:[#allocation1 + $0x30] ss:$2 sm:$0xff] %v2934_v3 }
  0x1e   :  { %v201_v20 = vld.sshfl [vmem:[#allocation1 + $0x10] sm:$0xff pattern:$0x75316420]  ;;  %v202_v21 = vld.sshfl [vmem:[#allocation1 + $0x18] sm:$0xff pattern:$0x75316420] }
  0x1f   :  { %219 = vrot.lane.b32.xlu1 %v201_v20, %s2856_s20  ;;  %258 = vst [vmem:[#allocation1 + $0x10] ss:$2 sm:$0xff] %v2918_v0 }
  0x20   :  { %221 = vrot.lane.b32.xlu2 %v202_v21, %s2856_s20  ;;  %v200_v22 = vld.sshfl [vmem:[#allocation1 + $0x8] sm:$0xff pattern:$0x75316420]  ;;  %v2976_v23 = vld.sshfl [vmem:[#allocation1] sm:$0xff pattern:$0x75316420] }
  0x21   :  { %217 = vrot.lane.b32.xlu0 %v200_v22, %s2856_s20  ;;  %256 = vst [vmem:[#allocation1] ss:$2 sm:$0xff] %v2923_v1 }
  0x22   :  { %v2980_v24 = vld.sshfl [vmem:[#allocation1 + $0x20] sm:$0xff pattern:$0x75316420]  ;;  %v2982_v25 = vld.sshfl [vmem:[#allocation1 + $0x28] sm:$0xff pattern:$0x75316420] }
  0x23   :  { %260 = vst [vmem:[#allocation1 + $0x20] ss:$2 sm:$0xff] %v2928_v2 }
  0x24   :  { %v2985_v26 = vld.sshfl [vmem:[#allocation1 + $0x30] sm:$0xff pattern:$0x75316420]  ;;  %v2987_v27 = vld.sshfl [vmem:[#allocation1 + $0x38] sm:$0xff pattern:$0x75316420] }
  0x25   :  { %262 = vst [vmem:[#allocation1 + $0x30] ss:$2 sm:$0xff] %v2934_v3 }
  0x26   :  { %v265_v28 = vld.sshfl [vmem:[#allocation1 + $0x10] sm:$0xff pattern:$0x75316420]  ;;  %v266_v29 = vld.sshfl [vmem:[#allocation1 + $0x18] sm:$0xff pattern:$0x75316420] }
  0x27   :  { %283 = vrot.lane.b32.xlu1 %v265_v28, %s2857_s21  ;;  %322 = vst [vmem:[#allocation1 + $0x10] ss:$2 sm:$0xff] %v2918_v0 }
  0x28   :  { %285 = vrot.lane.b32.xlu2 %v266_v29, %s2857_s21  ;;  %v264_v30 = vld.sshfl [vmem:[#allocation1 + $0x8] sm:$0xff pattern:$0x75316420]  ;;  %v2993_v31 = vld.sshfl [vmem:[#allocation1] sm:$0xff pattern:$0x75316420] }
  0x29   :  { %281 = vrot.lane.b32.xlu0 %v264_v30, %s2857_s21  ;;  %320 = vst [vmem:[#allocation1] ss:$2 sm:$0xff] %v2923_v1 }
  0x2a   :  { %v2997_v32 = vld.sshfl [vmem:[#allocation1 + $0x20] sm:$0xff pattern:$0x75316420]  ;;  %v2999_v33 = vld.sshfl [vmem:[#allocation1 + $0x28] sm:$0xff pattern:$0x75316420] }
  0x2b   :  { %324 = vst [vmem:[#allocation1 + $0x20] ss:$2 sm:$0xff] %v2928_v2 }
  0x2c   :  { %v3002_v34 = vld.sshfl [vmem:[#allocation1 + $0x30] sm:$0xff pattern:$0x75316420]  ;;  %v3004_v35 = vld.sshfl [vmem:[#allocation1 + $0x38] sm:$0xff pattern:$0x75316420] }
  0x2d   :  { %326 = vst [vmem:[#allocation1 + $0x30] ss:$2 sm:$0xff] %v2934_v3 }
  0x2e   :  { %v330_v36 = vld.sshfl [vmem:[#allocation1 + $0x18] sm:$0xff pattern:$0x75316420]  ;;  %v329_v37 = vld.sshfl [vmem:[#allocation1 + $0x10] sm:$0xff pattern:$0x75316420] }
  0x2f   :  { %349 = vrot.lane.b32.xlu1 %v330_v36, %s2858_s22  ;;  %386 = vst [vmem:[#allocation1 + $0x10] ss:$2 sm:$0xff] %v2918_v0 }
  0x30   :  { %v328_v38 = vld.sshfl [vmem:[#allocation1 + $0x8] sm:$0xff pattern:$0x75316420]  ;;  %v3009_v39 = vld.sshfl [vmem:[#allocation1] sm:$0xff pattern:$0x75316420] }
  0x31   :  { %347 = vrot.lane.b32.xlu0 %v329_v37, %s2858_s22  ;;  %384 = vst [vmem:[#allocation1] ss:$2 sm:$0xff] %v2923_v1 }
  0x32   :  { %v331_v40 = vld.sshfl [vmem:[#allocation1 + $0x20] sm:$0xff pattern:$0x75316420]  ;;  %v3013_v41 = vld.sshfl [vmem:[#allocation1 + $0x28] sm:$0xff pattern:$0x75316420] }
  0x33   :  { %388 = vst [vmem:[#allocation1 + $0x20] ss:$2 sm:$0xff] %v2928_v2  ;;  %351 = vrot.lane.b32.xlu2 %v331_v40, %s2858_s22 }
  0x34   :  { %v333_v42 = vld.sshfl [vmem:[#allocation1 + $0x30] sm:$0xff pattern:$0x75316420]  ;;  %v3017_v43 = vld.sshfl [vmem:[#allocation1 + $0x38] sm:$0xff pattern:$0x75316420] }
  0x35   :  { %390 = vst [vmem:[#allocation1 + $0x30] ss:$2 sm:$0xff] %v2934_v3 }
  0x36   :  { %v394_v44 = vld.sshfl [vmem:[#allocation1 + $0x18] sm:$0xff pattern:$0x75316420]  ;;  %v393_v45 = vld.sshfl [vmem:[#allocation1 + $0x10] sm:$0xff pattern:$0x75316420] }
  0x37   :  { %413 = vrot.lane.b32.xlu1 %v394_v44, %s2859_s23  ;;  %450 = vst [vmem:[#allocation1 + $0x10] ss:$2 sm:$0xff] %v2918_v0 }
  0x38   :  { %v391_v46 = vld.sshfl [vmem:[#allocation1] sm:$0xff pattern:$0x75316420]  ;;  %v392_v47 = vld.sshfl [vmem:[#allocation1 + $0x8] sm:$0xff pattern:$0x75316420] }
  0x39   :  { %411 = vrot.lane.b32.xlu0 %v393_v45, %s2859_s23  ;;  %448 = vst [vmem:[#allocation1] ss:$2 sm:$0xff] %v2923_v1 }
  0x3a   :  { %v395_v48 = vld.sshfl [vmem:[#allocation1 + $0x20] sm:$0xff pattern:$0x75316420]  ;;  %v3024_v49 = vld.sshfl [vmem:[#allocation1 + $0x28] sm:$0xff pattern:$0x75316420] }
  0x3b   :  { %452 = vst [vmem:[#allocation1 + $0x20] ss:$2 sm:$0xff] %v2928_v2  ;;  %345 = vrot.lane.b32.xlu2 %v328_v38, %s2858_s22 }
  0x3c   :  { %v397_v50 = vld.sshfl [vmem:[#allocation1 + $0x30] sm:$0xff pattern:$0x75316420]  ;;  %v398_v51 = vld.sshfl [vmem:[#allocation1 + $0x38] sm:$0xff pattern:$0x75316420] }
  0x3d   :  { %454 = vst [vmem:[#allocation1 + $0x30] ss:$2 sm:$0xff] %v2934_v3 }
  0x3e   :  { %v457_v52 = vld.sshfl [vmem:[#allocation1 + $0x10] sm:$0xff pattern:$0x75316420]  ;;  %v458_v53 = vld.sshfl [vmem:[#allocation1 + $0x18] sm:$0xff pattern:$0x75316420] }
  0x3f   :  { %514 = vst [vmem:[#allocation1 + $0x10] ss:$2 sm:$0xff] %v2918_v0 }
  0x40   :  { %v455_v54 = vld.sshfl [vmem:[#allocation1] sm:$0xff pattern:$0x75316420]  ;;  %v456_v55 = vld.sshfl [vmem:[#allocation1 + $0x8] sm:$0xff pattern:$0x75316420] }
  0x41   :  { %475 = vrot.lane.b32.xlu0 %v457_v52, %s2860_s24  ;;  %512 = vst [vmem:[#allocation1] ss:$2 sm:$0xff] %v2923_v1 }
  0x42   :  { %v459_v56 = vld.sshfl [vmem:[#allocation1 + $0x20] sm:$0xff pattern:$0x75316420]  ;;  %v3032_v57 = vld.sshfl [vmem:[#allocation1 + $0x28] sm:$0xff pattern:$0x75316420] }
  0x43   :  { %479 = vrot.lane.b32.xlu1 %v459_v56, %s2860_s24  ;;  %516 = vst [vmem:[#allocation1 + $0x20] ss:$2 sm:$0xff] %v2928_v2  ;;  %415 = vrot.lane.b32.xlu2 %v395_v48, %s2859_s23 }
  0x44   :  { %v461_v58 = vld.sshfl [vmem:[#allocation1 + $0x30] sm:$0xff pattern:$0x75316420]  ;;  %v462_v59 = vld.sshfl [vmem:[#allocation1 + $0x38] sm:$0xff pattern:$0x75316420] }
  0x45   :  { %518 = vst [vmem:[#allocation1 + $0x30] ss:$2 sm:$0xff] %v2934_v3 }
  0x46   :  { %v522_v60 = vld.sshfl [vmem:[#allocation1 + $0x18] sm:$0xff pattern:$0x75316420]  ;;  %v521_v61 = vld.sshfl [vmem:[#allocation1 + $0x10] sm:$0xff pattern:$0x75316420] }
  0x47   :  { %626 = vst [vmem:[#allocation1 + $0x10] ss:$2 sm:$0xff] %v2918_v0 }
  0x48   :  { %v520_v62 = vld.sshfl [vmem:[#allocation1 + $0x8] sm:$0xff pattern:$0x75316420]  ;;  %v519_v63 = vld.sshfl [vmem:[#allocation1] sm:$0xff pattern:$0x75316420] }
  0x49   :  { %477 = vrot.lane.b32.xlu0 %v458_v53, %s2860_s24  ;;  %624 = vst [vmem:[#allocation1] ss:$2 sm:$0xff] %v2923_v1 }
  0x4a   :  { %v523_v0 = vld.sshfl [vmem:[#allocation1 + $0x20] sm:$0xff pattern:$0x75316420]  ;;  %v524_v14 = vld.sshfl [vmem:[#allocation1 + $0x28] sm:$0xff pattern:$0x75316420] }
  0x4b   :  { %483 = vrot.lane.b32.xlu2 %v461_v58, %s2860_s24  ;;  %471 = vrot.lane.b32.xlu1 %v455_v54, %s2860_s24  ;;  %628 = vst [vmem:[#allocation1 + $0x20] ss:$2 sm:$0xff] %v2928_v2 }
  0x4c   :  { %v525_v4 = vld.sshfl [vmem:[#allocation1 + $0x30] sm:$0xff pattern:$0x75316420]  ;;  %v526_v5 = vld.sshfl [vmem:[#allocation1 + $0x38] sm:$0xff pattern:$0x75316420] }
  0x4d   :  { %630 = vst [vmem:[#allocation1 + $0x30] ss:$2 sm:$0xff] %v2934_v3 }
  0x51   :  { %473 = vrot.lane.b32.xlu0 %v456_v55, %s2860_s24 }
  0x53   :  { %541 = vrot.lane.b32.xlu2 %v522_v60, %s2861_s25  ;;  %539 = vrot.lane.b32.xlu1 %v521_v61, %s2861_s25  ;;  %v634_v61 = vld.sshfl [vmem:[#allocation1 + $0x18] sm:$0xff pattern:$0x75316420] }
  0x59   :  { %409 = vrot.lane.b32.xlu0 %v392_v47, %s2859_s23 }
  0x5b   :  { %543 = vrot.lane.b32.xlu2 %v523_v0, %s2861_s25  ;;  %537 = vrot.lane.b32.xlu1 %v520_v62, %s2861_s25 }
  0x61   :  { %485 = vrot.lane.b32.xlu0 %v462_v59, %s2860_s24 }
  0x63   :  { %547 = vrot.lane.b32.xlu2 %v525_v4, %s2861_s25  ;;  %535 = vrot.lane.b32.xlu1 %v519_v63, %s2861_s25 }
  0x69   :  { %549 = vrot.lane.b32.xlu0 %v526_v5, %s2861_s25 }
  0x6a   :  { %v3054_v1 = vpop.permute.xlu2 %87 }
  0x6b   :  { %343 = vrot.lane.b32.xlu2 %v3009_v39, %s2858_s22  ;;  %279 = vrot.lane.b32.xlu1 %v2993_v31, %s2857_s21 }
  0x71   :  { %355 = vrot.lane.b32.xlu0 %v333_v42, %s2858_s22 }
  0x72   :  { %v3061_v3 = vpop.permute.xlu2 %157 }
  0x73   :  { %407 = vrot.lane.b32.xlu2 %v391_v46, %s2859_s23  ;;  %357 = vrot.lane.b32.xlu1 %v3017_v43, %s2858_s22  ;;  %v3204_v46 = vld [vmem:[%s4216_s1 + $0x10] sm:$0xff] }
  0x74   :  { %v498_v53 = vperm.slane %v3204_v46, 6  ;;  %v370_v60 = vperm.slane %v3204_v46, 4  ;;  %v178_v62 = vperm.slane %v3204_v46, 1 }
  0x79   :  { %419 = vrot.lane.b32.xlu0 %v397_v50, %s2859_s23 }
  0x7a   :  { %v3067_v6 = vpop.permute.xlu2 %221 }
  0x7b   :  { %151 = vrot.lane.b32.xlu2 %v2959_v15, %s2855_s0  ;;  %421 = vrot.lane.b32.xlu1 %v398_v51, %s2859_s23 }
  0x81   :  { %215 = vrot.lane.b32.xlu0 %v2976_v23, %s2856_s20  ;;  %v3074_v12 = vpop.permute.xlu1 %91  ;;  %v3076_v13 = vpop.permute.xlu0 %89 }
  0x82   :  { %v3082_v20 = vpop.permute.xlu2 %285 }
  0x83   :  { %291 = vrot.lane.b32.xlu2 %v3002_v34, %s2857_s21  ;;  %289 = vrot.lane.b32.xlu1 %v2999_v33, %s2857_s21 }
  0x89   :  { %293 = vrot.lane.b32.xlu0 %v3004_v35, %s2857_s21  ;;  %v3087_v15 = vpop.permute.xlu1 %155 }
  0x8b   :  { %161 = vrot.lane.b32.xlu2 %v2965_v17, %s2855_s0  ;;  %85 = vrot.lane.b32.xlu1 %v2943_v7, %s2854_s19  ;;  %v3093_v21 = vpop.permute.xlu0 %153 }
  0x8d   :  { %v3095_v22 = vpop.permute.xlu2 %351 }
  0x91   :  { %163 = vrot.lane.b32.xlu0 %v2968_v18, %s2855_s0  ;;  %v3099_v23 = vpop.permute.xlu1 %219 }
  0x93   :  { %225 = vrot.lane.b32.xlu2 %v2982_v25, %s2856_s20  ;;  %165 = vrot.lane.b32.xlu1 %v2970_v19, %s2855_s0  ;;  %v3105_v2 = vpop.permute.xlu0 %217 }
  0x95   :  { %v3107_v17 = vpop.permute.xlu2 %345 }
  0x99   :  { %227 = vrot.lane.b32.xlu0 %v2985_v26, %s2856_s20  ;;  %v3111_v7 = vpop.permute.xlu1 %283 }
  0x9b   :  { %481 = vrot.lane.b32.xlu2 %v3032_v57, %s2860_s24  ;;  %229 = vrot.lane.b32.xlu1 %v2987_v27, %s2856_s20  ;;  %v3117_v18 = vpop.permute.xlu0 %281 }
  0x9d   :  { %v3119_v25 = vpop.permute.xlu2 %415 }
  0xa1   :  { %545 = vrot.lane.b32.xlu0 %v524_v14, %s2861_s25  ;;  %v3122_v19 = vpop.permute.xlu1 %349 }
  0xa3   :  { %97 = vrot.lane.b32.xlu2 %v2951_v10, %s2854_s19  ;;  %95 = vrot.lane.b32.xlu1 %v2948_v9, %s2854_s19  ;;  %v3128_v26 = vpop.permute.xlu0 %347  ;;  %v101_v10 = vlaneseq }
  0xa5   :  { %v3130_v28 = vpop.permute.xlu2 %483  ;;  %v3144_v9 = vand.u32 127, %v101_v10  ;;  %v306_v10 = vperm.slane %v3204_v46, 3 }
  0xa7   :  { %vm551_vm0 = vcmp.lt.s32.totalorder %v3144_v9, 111  ;;  %vm295_vm1 = vcmp.lt.s32.totalorder %v3144_v9, 1  ;;  %vm359_vm2 = vcmp.lt.s32.totalorder %v3144_v9, 127  ;;  %vm167_vm3 = vcmp.lt.s32.totalorder %v3144_v9, 16 }
  0xa8   :  { %v363_v36 = vsel %vm359_vm2, %v3122_v19, %v3095_v22  ;;  %vm487_vm5 = vcmp.lt.s32.totalorder %v3144_v9, 112  ;;  %v300_v40 = vsel %vm295_vm1, %v3111_v7, %v3082_v20  ;;  %vm423_vm6 = vcmp.lt.s32.totalorder %v3144_v9, 113 }
  0xa9   :  { %99 = vrot.lane.b32.xlu0 %v2953_v11, %s2854_s19  ;;  %v3138_v27 = vpop.permute.xlu1 %413  ;;  %v3151_v11 = vld [vmem:[%s4216_s1 + $0x18] sm:$0xff]  ;;  %vm103_vm7 = vcmp.lt.s32.totalorder %v3144_v9, 17  ;;  %vm231_vm8 = vcmp.lt.s32.totalorder %v3144_v9, 15  ;;  %v364_v4 = vsel %vm359_vm2, %v3128_v26, %v3122_v19 }
  0xaa   :  { %v563_v33 = vperm.slane %v3151_v11, 7  ;;  %v307_v37 = vperm.slane %v3151_v11, 3  ;;  %v499_v38 = vperm.slane %v3151_v11, 6  ;;  %v179_v39 = vperm.slane %v3151_v11, 1 }
  0xab   :  { %417 = vrot.lane.b32.xlu2 %v3024_v49, %s2859_s23  ;;  %353 = vrot.lane.b32.xlu1 %v3013_v41, %s2858_s22  ;;  %v3140_v29 = vpop.permute.xlu0 %411  ;;  %v172_v41 = vsel %vm167_vm3, %v3087_v15, %v3061_v3  ;;  %v427_v44 = vsel %vm423_vm6, %v3138_v27, %v3119_v25  ;;  %v243_v52 = vperm.slane %v3151_v11, 2  ;;  %v115_v58 = vperm.slane %v3151_v11, 0 }
  0xac   :  { %v315_v47 = vmul.f32 %v307_v37, %v300_v40  ;;  %v187_v51 = vmul.f32 %v179_v39, %v172_v41  ;;  %v236_v59 = vsel %vm231_vm8, %v3099_v23, %v3067_v6  ;;  %v108_v0 = vsel %vm103_vm7, %v3076_v13, %v3074_v12 }
  0xad   :  { %v3142_v30 = vpop.permute.xlu2 %541  ;;  %v378_v37 = vmul.f32 %v370_v60, %v364_v4  ;;  %v123_v39 = vmul.f32 %v115_v58, %v108_v0  ;;  %v428_v40 = vsel %vm423_vm6, %v3140_v29, %v3138_v27  ;;  %v633_v58 = vld.sshfl [vmem:[#allocation1 + $0x10] sm:$0xff pattern:$0x75316420] }
  0xae   :  { %v611_v63 = vrot.slane %v315_v47, 4  ;;  %v587_v14 = vrot.slane %v187_v51, 4 }
  0xb0   :  { %v699_v51 = vsel %vm695_vm4, %v123_v39, %v587_v14 }
  0xb1   :  { %287 = vrot.lane.b32.xlu0 %v2997_v32, %s2857_s21 }
  0xb3   :  { %223 = vrot.lane.b32.xlu2 %v2980_v24, %s2856_s20  ;;  %159 = vrot.lane.b32.xlu1 %v2963_v16, %s2855_s0  ;;  %v3157_v31 = vpop.permute.xlu0 %475  ;;  %v371_v16 = vperm.slane %v3151_v11, 4 }
  0xb5   :  { %v3161_v34 = vpop.permute.xlu1 %479  ;;  %v3163_v32 = vpop.permute.xlu2 %543  ;;  %v379_v42 = vmul.f32 %v371_v16, %v363_v36  ;;  %v173_v36 = vsel %vm167_vm3, %v3093_v21, %v3087_v15 }
  0xb6   :  { %v555_v35 = vsel %vm551_vm0, %v3142_v30, %v3163_v32  ;;  %v186_v47 = vmul.f32 %v178_v62, %v173_v36 }
  0xb7   :  { %v571_v24 = vmul.f32 %v563_v33, %v555_v35  ;;  %v658_v54 = vrot.slane %v379_v42, 4  ;;  %v251_v33 = vmul.f32 %v243_v52, %v236_v59  ;;  %v301_v35 = vsel %vm295_vm1, %v3117_v18, %v3111_v7  ;;  %v3250_v7 = vld [vmem:[%s4216_s1 + $0x8] sm:$0xff] }
  0xb8   :  { %v242_v52 = vperm.slane %v3204_v46, 2 }
  0xb9   :  { %93 = vrot.lane.b32.xlu0 %v2945_v8, %s2854_s19  ;;  %2737 = vmatpush.msk.msra.mxu3 %vm695_vm4, %v571_v24  ;;  %v435_v8 = vperm.slane %v3151_v11, 5  ;;  %v715_v19 = vsel %vm695_vm4, %v634_v61, %v658_v54  ;;  %v562_v24 = vperm.slane %v3204_v46, 7  ;;  %v707_v15 = vsel %vm695_vm4, %v251_v33, %v611_v63 }
  0xba   :  { %v657_v54 = vrot.slane %v378_v37, 4  ;;  %v561_v63 = vperm.slane %v3250_v7, 7 }
  0xbb   :  { %v478_v43 = vpop.permute.xlu0 %477  ;;  %v443_v55 = vmul.f32 %v435_v8, %v427_v44  ;;  %v314_v8 = vmul.f32 %v306_v10, %v301_v35  ;;  %v497_v44 = vperm.slane %v3250_v7, 6 }
  0xbc   :  { %v491_v45 = vsel %vm487_vm5, %v478_v43, %v3161_v34  ;;  %v492_v56 = vsel %vm487_vm5, %v3157_v31, %v478_v43  ;;  %v714_v0 = vsel %vm695_vm4, %v633_v58, %v657_v54 }
  0xbd   :  { %v507_v48 = vmul.f32 %v499_v38, %v491_v45  ;;  %v3207_v49 = vpop.permute.xlu2 %547  ;;  %v3209_v50 = vpop.permute.xlu1 %471  ;;  %v506_v11 = vmul.f32 %v498_v53, %v492_v56  ;;  %v434_v38 = vperm.slane %v3204_v46, 5  ;;  %v369_v53 = vperm.slane %v3250_v7, 4 }
  0xbe   :  { %v114_v56 = vperm.slane %v3204_v46, 0  ;;  %v109_v46 = vsel %vm103_vm7, %v3054_v1, %v3076_v13  ;;  %v610_v59 = vrot.slane %v314_v8, 4  ;;  %v3294_v13 = vld [vmem:[%s4216_s1] sm:$0xff]  ;;  %v632_v8 = vld.sshfl [vmem:[#allocation1 + $0x8] sm:$0xff pattern:$0x75316420] }
  0xbf   :  { %v682_v57 = vrot.slane %v507_v48, 4  ;;  %v681_v43 = vrot.slane %v506_v11, 4  ;;  %v496_v39 = vperm.slane %v3294_v13, 6 }
  0xc0   :  { %v122_v14 = vmul.f32 %v114_v56, %v109_v46  ;;  %v631_v46 = vld.sshfl [vmem:[#allocation1] sm:$0xff pattern:$0x75316420] }
  0xc1   :  { %v723_v5 = vsel %vm695_vm4, %v443_v55, %v682_v57  ;;  %v442_v55 = vmul.f32 %v434_v38, %v428_v40  ;;  %v433_v57 = vperm.slane %v3250_v7, 5  ;;  %v368_v38 = vperm.slane %v3294_v13, 4 }
  0xc2   :  { %835 = vmatpush.msra.mxu3 %v723_v5 }
  0xc3   :  { %v3238_v16 = vpop.permute.xlu0 %473  ;;  %v722_v61 = vsel %vm695_vm4, %v442_v55, %v681_v43  ;;  %v432_v43 = vperm.slane %v3294_v13, 5 }
  0xc4   :  { %836 = vmatpush.msra.mxu3 %v715_v19  ;;  %v493_v27 = vsel %vm487_vm5, %v3238_v16, %v3157_v31  ;;  %v365_v31 = vsel %vm359_vm2, %v3107_v17, %v3128_v26 }
  0xc5   :  { %v3256_v41 = vpop.permute.xlu2 %343  ;;  %v540_v42 = vpop.permute.xlu1 %539  ;;  %v505_v60 = vmul.f32 %v497_v44, %v493_v27  ;;  %v377_v4 = vmul.f32 %v369_v53, %v365_v31  ;;  %v3332_v31 = vld [vmem:[%s4216_s1 + $0x38] sm:$0xff] }
  0xc6   :  { %v556_v45 = vsel %vm551_vm0, %v540_v42, %v3142_v30  ;;  %837 = vmatpush.msra.mxu3 %v707_v15  ;;  %v237_v30 = vsel %vm231_vm8, %v3105_v2, %v3099_v23  ;;  %v586_v23 = vrot.slane %v186_v47, 4  ;;  %v366_v15 = vsel %vm359_vm2, %v3256_v41, %v3107_v17 }
  0xc7   :  { %v570_v48 = vmul.f32 %v562_v24, %v556_v45  ;;  %v250_v26 = vmul.f32 %v242_v52, %v237_v30  ;;  %v680_v35 = vrot.slane %v505_v60, 4  ;;  %v656_v37 = vrot.slane %v377_v4, 4  ;;  %v3327_v30 = vld [vmem:[%s4216_s1 + $0x30] sm:$0xff] }
  0xc8   :  { %838 = vmatpush.msra.mxu3 %v699_v51  ;;  %v698_v36 = vsel %vm695_vm4, %v122_v14, %v586_v23  ;;  %v560_v47 = vperm.slane %v3294_v13, 7  ;;  %v376_v17 = vmul.f32 %v368_v38, %v366_v15  ;;  %v567_v58 = vperm.slane %v3332_v31, 7 }
  0xc9   :  { %2735 = vmatpush.msk.msra.mxu2 %vm695_vm4, %v570_v48  ;;  %v706_v24 = vsel %vm695_vm4, %v250_v26, %v610_v59  ;;  %v713_v48 = vsel %vm695_vm4, %v632_v8, %v656_v37  ;;  %v502_v14 = vperm.slane %v3327_v30, 6 }
  0xca   :  { %v655_v55 = vrot.slane %v376_v17, 4 }
  0xcb   :  { %815 = vmatpush.msra.mxu2 %v722_v61  ;;  %v410_v62 = vpop.permute.xlu0 %409 }
  0xcc   :  { %v429_v5 = vsel %vm423_vm6, %v410_v62, %v3140_v29 }
  0xcd   :  { %v3296_v10 = vpop.permute.xlu2 %407  ;;  %v441_v11 = vmul.f32 %v433_v57, %v429_v5  ;;  %816 = vmatpush.msra.mxu2 %v714_v0  ;;  %v538_v33 = vpop.permute.xlu1 %537  ;;  %v566_v57 = vperm.slane %v3327_v30, 7 }
  0xce   :  { %v557_v19 = vsel %vm551_vm0, %v538_v33, %v540_v42  ;;  %v494_v42 = vsel %vm487_vm5, %v3209_v50, %v3238_v16  ;;  %v430_v44 = vsel %vm423_vm6, %v3296_v10, %v410_v62  ;;  %v712_v62 = vsel %vm695_vm4, %v631_v46, %v655_v55 }
  0xcf   :  { %817 = vmatpush.msra.mxu2 %v706_v24  ;;  %v569_v29 = vmul.f32 %v561_v63, %v557_v19  ;;  %v721_v40 = vsel %vm695_vm4, %v441_v11, %v680_v35  ;;  %v504_v27 = vmul.f32 %v496_v39, %v494_v42  ;;  %v440_v52 = vmul.f32 %v432_v43, %v430_v44 }
  0xd0   :  { %v439_v43 = vperm.slane %v3332_v31, 5 }
  0xd1   :  { %2733 = vmatpush.msk.msra.mxu1 %vm695_vm4, %v569_v29  ;;  %818 = vmatpush.msra.mxu2 %v698_v36  ;;  %v679_v56 = vrot.slane %v504_v27, 4  ;;  %v374_v29 = vperm.slane %v3327_v30, 4  ;;  %v375_v36 = vperm.slane %v3332_v31, 4 }
  0xd3   :  { %795 = vmatpush.msra.mxu1 %v721_v40  ;;  %v486_v45 = vpop.permute.xlu0 %485  ;;  %v720_v59 = vsel %vm695_vm4, %v440_v52, %v679_v56  ;;  %v637_v56 = vld.sshfl [vmem:[#allocation1 + $0x30] sm:$0xff pattern:$0x75316420] }
  0xd4   :  { %v488_v35 = vsel %vm487_vm5, %v3130_v28, %v486_v45  ;;  %v495_v24 = vsel %vm487_vm5, %v486_v45, %v3209_v50  ;;  %v438_v50 = vperm.slane %v3327_v30, 5  ;;  %v305_v45 = vperm.slane %v3250_v7, 3 }
  0xd5   :  { %v3320_v51 = vpop.permute.xlu2 %151  ;;  %v536_v16 = vpop.permute.xlu1 %535  ;;  %796 = vmatpush.msra.mxu1 %v713_v48  ;;  %v510_v39 = vmul.f32 %v502_v14, %v488_v35  ;;  %v177_v14 = vperm.slane %v3250_v7, 1 }
  0xd6   :  { %v558_v53 = vsel %vm551_vm0, %v536_v16, %v538_v33  ;;  %v503_v33 = vperm.slane %v3332_v31, 6 }
  0xd7   :  { %v568_v54 = vmul.f32 %v560_v47, %v558_v53  ;;  %v685_v44 = vrot.slane %v510_v39, 4 }
  0xd8   :  { %v511_v40 = vmul.f32 %v503_v33, %v495_v24  ;;  %v174_v33 = vsel %vm167_vm3, %v3320_v51, %v3093_v21 }
  0xd9   :  { %2731 = vmatpush.msk.msra.mxu0 %vm695_vm4, %v568_v54  ;;  %v185_v24 = vmul.f32 %v177_v14, %v174_v33 }
  0xda   :  { %v686_v17 = vrot.slane %v511_v40, 4 }
  0xdb   :  { %775 = vmatpush.msra.mxu0 %v720_v59  ;;  %v550_v60 = vpop.permute.xlu0 %549  ;;  %v241_v59 = vperm.slane %v3250_v7, 2 }
  0xdc   :  { %v552_v61 = vsel %vm551_vm0, %v3207_v49, %v550_v60  ;;  %v559_v23 = vsel %vm551_vm0, %v550_v60, %v536_v16 }
  0xdd   :  { %v3344_v63 = vpop.permute.xlu2 %291  ;;  %v574_v26 = vmul.f32 %v566_v57, %v552_v61  ;;  %v575_v4 = vmul.f32 %v567_v58, %v559_v23  ;;  %v3346_v5 = vpop.permute.xlu1 %279  ;;  %776 = vmatpush.msra.mxu0 %v712_v62  ;;  %v638_v57 = vld.sshfl [vmem:[#allocation1 + $0x38] sm:$0xff pattern:$0x75316420] }
  0xdf   :  { %2743 = vmatpush.msk.msrb.mxu2 %vm695_vm4, %v574_v26  ;;  %2745 = vmatpush.msk.msrb.mxu3 %vm695_vm4, %v575_v4 }
  0xe3   :  { %v3350_v0 = vpop.permute.xlu0 %355 }
  0xe5   :  { %v358_v11 = vpop.permute.xlu1 %357  ;;  %v3357_v19 = vpop.permute.xlu2 %161 }
  0xe6   :  { %v360_v37 = vsel %vm359_vm2, %v3350_v0, %v358_v11  ;;  %v367_v38 = vsel %vm359_vm2, %v358_v11, %v3256_v41  ;;  %v302_v41 = vsel %vm295_vm1, %v3346_v5, %v3117_v18 }
  0xe7   :  { %v382_v15 = vmul.f32 %v374_v29, %v360_v37  ;;  %v383_v42 = vmul.f32 %v375_v36, %v367_v38  ;;  %v313_v58 = vmul.f32 %v305_v45, %v302_v41  ;;  %v585_v38 = vrot.slane %v185_v24, 4  ;;  %v3447_v41 = vld [vmem:[%s4216_s1 + $0x28] sm:$0xff] }
  0xe8   :  { %v565_v24 = vperm.slane %v3447_v41, 7 }
  0xe9   :  { %v661_v16 = vrot.slane %v382_v15, 4  ;;  %v662_v52 = vrot.slane %v383_v42, 4  ;;  %v609_v62 = vrot.slane %v313_v58, 4 }
  0xeb   :  { %v3370_v8 = vpop.permute.xlu0 %419  ;;  %v718_v60 = vsel %vm695_vm4, %v637_v56, %v661_v16  ;;  %v182_v56 = vperm.slane %v3327_v30, 1 }
  0xed   :  { %v422_v47 = vpop.permute.xlu1 %421  ;;  %v3385_v55 = vpop.permute.xlu2 %225 }
  0xee   :  { %v424_v27 = vsel %vm423_vm6, %v3370_v8, %v422_v47  ;;  %v431_v48 = vsel %vm423_vm6, %v422_v47, %v3296_v10  ;;  %v719_v10 = vsel %vm695_vm4, %v638_v57, %v662_v52 }
  0xef   :  { %v446_v53 = vmul.f32 %v438_v50, %v424_v27  ;;  %v447_v54 = vmul.f32 %v439_v43, %v431_v48  ;;  %v304_v43 = vperm.slane %v3294_v13, 3 }
  0xf1   :  { %v726_v46 = vsel %vm695_vm4, %v446_v53, %v685_v44  ;;  %v727_v18 = vsel %vm695_vm4, %v447_v54, %v686_v17  ;;  %v311_v44 = vperm.slane %v3332_v31, 3  ;;  %v246_v17 = vperm.slane %v3327_v30, 2 }
  0xf2   :  { %895 = vmatpush.msrb.mxu2 %v726_v46  ;;  %915 = vmatpush.msrb.mxu3 %v727_v18  ;;  %v240_v53 = vperm.slane %v3294_v13, 2  ;;  %v247_v54 = vperm.slane %v3332_v31, 2 }
  0xf3   :  { %v216_v61 = vpop.permute.xlu0 %215 }
  0xf4   :  { %896 = vmatpush.msrb.mxu2 %v718_v60  ;;  %916 = vmatpush.msrb.mxu3 %v719_v10  ;;  %v238_v23 = vsel %vm231_vm8, %v216_v61, %v3105_v2  ;;  %v113_v2 = vperm.slane %v3250_v7, 0  ;;  %v3420_v7 = vld [vmem:[%s4217_s2] sm:$0xff] }
  0xf5   :  { %v249_v26 = vmul.f32 %v241_v59, %v238_v23  ;;  %v3395_v4 = vpop.permute.xlu1 %289  ;;  %v3403_v35 = vpop.permute.xlu2 %481  ;;  %2738 = vmatmul.msk.f32.vlgmr.msra.gmra.mxu3 %vm735_vm9, %v3420_v7  ;;  %2736 = vmatmul.msk.f32.vlgmr.msra.gmra.mxu2 %vm735_vm9, %v3420_v7 }
  0xf6   :  { %v297_v50 = vsel %vm295_vm1, %v3395_v4, %v3344_v63  ;;  %v489_v46 = vsel %vm487_vm5, %v3403_v35, %v3130_v28 }
  0xf7   :  { %v705_v11 = vsel %vm695_vm4, %v249_v26, %v609_v62 }
  0xf8   :  { %797 = vmatpush.msra.mxu1 %v705_v11  ;;  %v437_v11 = vperm.slane %v3447_v41, 5 }
  0xfb   :  { %v294_v29 = vpop.permute.xlu0 %293 }
  0xfc   :  { %v296_v45 = vsel %vm295_vm1, %v3344_v63, %v294_v29  ;;  %v303_v47 = vsel %vm295_vm1, %v294_v29, %v3346_v5  ;;  %v501_v5 = vperm.slane %v3447_v41, 6  ;;  %v3474_v29 = vld [vmem:[%s4216_s1 + $0x20] sm:$0xff] }
  0xfd   :  { %v3406_v36 = vpop.permute.xlu1 %85  ;;  %v3415_v15 = vpop.permute.xlu2 %97  ;;  %v312_v48 = vmul.f32 %v304_v43, %v303_v47  ;;  %v319_v16 = vmul.f32 %v311_v44, %v296_v45  ;;  %v2862_v43 = vmov 0   ;;  %v490_v47 = vsel %vm487_vm5, %v3161_v34, %v3403_v35 }
  0xfe   :  { %v110_v37 = vsel %vm103_vm7, %v3406_v36, %v3054_v1  ;;  %v310_v1 = vperm.slane %v3327_v30, 3  ;;  %2763 = vset.pattern.permute.xlu1 %v2862_v43  ;;  %2764 = vset.pattern.permute.xlu0 %v2862_v43 }
  0xff   :  { %v121_v39 = vmul.f32 %v113_v2, %v110_v37  ;;  %v608_v23 = vrot.slane %v312_v48, 4  ;;  %v615_v62 = vrot.slane %v319_v16, 4  ;;  %2765 = vset.pattern.permute.xlu2 %v2862_v43  ;;  %v244_v43 = vperm.slane %v3474_v29, 2 }
 0x100   :  { %v318_v27 = vmul.f32 %v310_v1, %v297_v50  ;;  %v118_v50 = vperm.slane %v3327_v30, 0  ;;  %v183_v30 = vperm.slane %v3332_v31, 1 }
 0x101   :  { %v697_v40 = vsel %vm695_vm4, %v121_v39, %v585_v38  ;;  %v729_v38 = vld [vmem:[%s4218_s3] sm:$0xff]  ;;  %v509_v39 = vmul.f32 %v501_v5, %v489_v46  ;;  %v112_v5 = vperm.slane %v3294_v13, 0 }
 0x102   :  { %798 = vmatpush.msra.mxu1 %v697_v40  ;;  %v614_v18 = vrot.slane %v318_v27, 4  ;;  %732 = vperm.xlu1 %2763, %v729_v38   ;;  %v636_v38 = vld.sshfl [vmem:[#allocation1 + $0x28] sm:$0xff pattern:$0x75316420] }
 0x103   :  { %v3413_v21 = vpop.permute.xlu0 %163  ;;  %2734 = vmatmul.msk.f32.vlgmr.msra.gmra.mxu1 %vm735_vm9, %v3420_v7  ;;  %v684_v16 = vrot.slane %v509_v39, 4  ;;  %v635_v39 = vld.sshfl [vmem:[#allocation1 + $0x20] sm:$0xff pattern:$0x75316420] }
 0x104   :  { %v169_v33 = vsel %vm167_vm3, %v3357_v19, %v3413_v21 }
 0x105   :  { %v3422_v42 = vpop.permute.xlu1 %165  ;;  %v418_v59 = vpop.permute.xlu2 %417  ;;  %v190_v40 = vmul.f32 %v182_v56, %v169_v33 }
 0x106   :  { %v426_v46 = vsel %vm423_vm6, %v3119_v25, %v418_v59 }
 0x107   :  { %v590_v35 = vrot.slane %v190_v40, 4 }
 0x10b   :  { %v228_v52 = vpop.permute.xlu0 %227 }
 0x10c   :  { %v233_v63 = vsel %vm231_vm8, %v3385_v55, %v228_v52 }
 0x10d   :  { %v254_v57 = vmul.f32 %v246_v17, %v233_v63  ;;  %v230_v58 = vpop.permute.xlu1 %229  ;;  %v176_v17 = vperm.slane %v3294_v13, 1 }
 0x10e   :  { %v232_v60 = vsel %vm231_vm8, %v228_v52, %v230_v58  ;;  %v239_v10 = vsel %vm231_vm8, %v230_v58, %v216_v61  ;;  %v425_v61 = vsel %vm423_vm6, %v418_v59, %v3370_v8  ;;  %v500_v8 = vperm.slane %v3474_v29, 6 }
 0x10f   :  { %v248_v26 = vmul.f32 %v240_v53, %v239_v10  ;;  %v255_v14 = vmul.f32 %v247_v54, %v232_v60  ;;  %v710_v28 = vsel %vm695_vm4, %v254_v57, %v614_v18  ;;  %v445_v44 = vmul.f32 %v437_v11, %v425_v61 }
 0x110   :  { %897 = vmatpush.msrb.mxu2 %v710_v28  ;;  %v175_v52 = vsel %vm167_vm3, %v3422_v42, %v3320_v51  ;;  %v508_v54 = vmul.f32 %v500_v8, %v490_v47  ;;  %v119_v51 = vperm.slane %v3332_v31, 0  ;;  %v564_v58 = vperm.slane %v3474_v29, 7 }
 0x111   :  { %v704_v2 = vsel %vm695_vm4, %v248_v26, %v608_v23  ;;  %v711_v37 = vsel %vm695_vm4, %v255_v14, %v615_v62  ;;  %v725_v63 = vsel %vm695_vm4, %v445_v44, %v684_v16  ;;  %v372_v60 = vperm.slane %v3474_v29, 4 }
 0x112   :  { %777 = vmatpush.msra.mxu0 %v704_v2  ;;  %917 = vmatpush.msrb.mxu3 %v711_v37  ;;  %v373_v10 = vperm.slane %v3447_v41, 4  ;;  %v683_v31 = vrot.slane %v508_v54, 4  ;;  %v224_v37 = vpop.permute.xlu2 %223  ;;  %v245_v8 = vperm.slane %v3447_v41, 2 }
 0x113   :  { %v546_v1 = vpop.permute.xlu0 %545  ;;  %v234_v44 = vsel %vm231_vm8, %v224_v37, %v3385_v55 }
 0x114   :  { %v553_v45 = vsel %vm551_vm0, %v546_v1, %v3207_v49  ;;  %v168_v49 = vsel %vm167_vm3, %v3413_v21, %v3422_v42  ;;  %v184_v21 = vmul.f32 %v176_v17, %v175_v52  ;;  %v436_v42 = vperm.slane %v3474_v29, 5 }
 0x115   :  { %v573_v27 = vmul.f32 %v565_v24, %v553_v45  ;;  %v3495_v48 = vpop.permute.xlu1 %95  ;;  %v191_v56 = vmul.f32 %v183_v30, %v168_v49  ;;  %v554_v13 = vsel %vm551_vm0, %v3163_v32, %v546_v1  ;;  %v235_v17 = vsel %vm231_vm8, %v3067_v6, %v224_v37 }
 0x116   :  { %v105_v34 = vsel %vm103_vm7, %v3495_v48, %v3415_v15  ;;  %v584_v59 = vrot.slane %v184_v21, 4  ;;  %v444_v11 = vmul.f32 %v436_v42, %v426_v46  ;;  %v572_v33 = vmul.f32 %v564_v58, %v554_v13 }
 0x117   :  { %v126_v53 = vmul.f32 %v118_v50, %v105_v34  ;;  %2741 = vmatpush.msk.msrb.mxu1 %vm695_vm4, %v573_v27  ;;  %v591_v62 = vrot.slane %v191_v56, 4  ;;  %v309_v50 = vperm.slane %v3447_v41, 3  ;;  %v180_v52 = vperm.slane %v3474_v29, 1 }
 0x118   :  { %v181_v34 = vperm.slane %v3447_v41, 1  ;;  %v117_v21 = vperm.slane %v3447_v41, 0 }
 0x119   :  { %v702_v57 = vsel %vm695_vm4, %v126_v53, %v590_v35  ;;  %875 = vmatpush.msrb.mxu1 %v725_v63  ;;  %v252_v53 = vmul.f32 %v244_v43, %v235_v17 }
 0x11a   :  { %898 = vmatpush.msrb.mxu2 %v702_v57 }
 0x11b   :  { %v100_v18 = vpop.permute.xlu0 %99  ;;  %2744 = vmatmul.msk.f32.vlgmr.msrb.gmra.mxu2 %vm735_vm9, %v3420_v7 }
 0x11c   :  { %v104_v23 = vsel %vm103_vm7, %v3415_v15, %v100_v18  ;;  %v111_v25 = vsel %vm103_vm7, %v100_v18, %v3406_v36 }
 0x11d   :  { %v120_v32 = vmul.f32 %v112_v5, %v111_v25  ;;  %v127_v26 = vmul.f32 %v119_v51, %v104_v23  ;;  %v354_v14 = vpop.permute.xlu1 %353  ;;  %v116_v5 = vperm.slane %v3474_v29, 0 }
 0x11e   :  { %v361_v28 = vsel %vm359_vm2, %v354_v14, %v3350_v0  ;;  %v362_v24 = vsel %vm359_vm2, %v3095_v22, %v354_v14  ;;  %v308_v0 = vperm.slane %v3474_v29, 3  ;;  %v724_v22 = vsel %vm695_vm4, %v444_v11, %v683_v31 }
 0x11f   :  { %v380_v15 = vmul.f32 %v372_v60, %v362_v24  ;;  %v381_v61 = vmul.f32 %v373_v10, %v361_v28  ;;  %v696_v2 = vsel %vm695_vm4, %v120_v32, %v584_v59  ;;  %v703_v36 = vsel %vm695_vm4, %v127_v26, %v591_v62 }
 0x120   :  { %778 = vmatpush.msra.mxu0 %v696_v2  ;;  %918 = vmatpush.msrb.mxu3 %v703_v36 }
 0x121   :  { %v659_v40 = vrot.slane %v380_v15, 4  ;;  %v660_v1 = vrot.slane %v381_v61, 4  ;;  %2746 = vmatmul.msk.f32.vlgmr.msrb.gmra.mxu3 %vm735_vm9, %v3420_v7  ;;  %2732 = vmatmul.msk.f32.vlgmr.msra.gmra.mxu0 %vm735_vm9, %v3420_v7 }
 0x122   :  { %2739 = vmatpush.msk.msrb.mxu0 %vm695_vm4, %v572_v33 }
 0x123   :  { %v717_v45 = vsel %vm695_vm4, %v636_v38, %v660_v1  ;;  %v288_v47 = vpop.permute.xlu0 %287  ;;  %v716_v16 = vsel %vm695_vm4, %v635_v39, %v659_v40 }
 0x124   :  { %855 = vmatpush.msrb.mxu0 %v724_v22  ;;  %876 = vmatpush.msrb.mxu1 %v717_v45  ;;  %v298_v30 = vsel %vm295_vm1, %v288_v47, %v3395_v4  ;;  %v299_v27 = vsel %vm295_vm1, %v3082_v20, %v288_v47  ;;  %v253_v20 = vmul.f32 %v245_v8, %v234_v44 }
 0x125   :  { %v316_v55 = vmul.f32 %v308_v0, %v299_v27  ;;  %v317_v49 = vmul.f32 %v309_v50, %v298_v30  ;;  %v160_v35 = vpop.permute.xlu1 %159  ;;  %v2863_v0 = vmov 1934713408  }
 0x126   :  { %856 = vmatpush.msrb.mxu0 %v716_v16  ;;  %v170_v6 = vsel %vm167_vm3, %v160_v35, %v3357_v19  ;;  %v171_v4 = vsel %vm167_vm3, %v3061_v3, %v160_v35  ;;  %v986_v50 = vunpack.c.l.s4 %v2863_v0 }
 0x127   :  { %v612_v54 = vrot.slane %v316_v55, 4  ;;  %v613_v63 = vrot.slane %v317_v49, 4  ;;  %v188_v56 = vmul.f32 %v180_v52, %v171_v4  ;;  %v189_v57 = vmul.f32 %v181_v34, %v170_v6 }
 0x128   :  { %v3598_v16 = vunpack.c.0.s8 %v986_v50 }
 0x129   :  { %v708_v51 = vsel %vm695_vm4, %v252_v53, %v612_v54  ;;  %v709_v42 = vsel %vm695_vm4, %v253_v20, %v613_v63  ;;  %v588_v29 = vrot.slane %v188_v56, 4  ;;  %v589_v46 = vrot.slane %v189_v57, 4 }
 0x12a   :  { %857 = vmatpush.msrb.mxu0 %v708_v51  ;;  %877 = vmatpush.msrb.mxu1 %v709_v42 }
 0x12b   :  { %v94_v19 = vpop.permute.xlu0 %93 }
 0x12c   :  { %v106_v3 = vsel %vm103_vm7, %v94_v19, %v3495_v48  ;;  %v107_v58 = vsel %vm103_vm7, %v3074_v12, %v94_v19 }
 0x12d   :  { %v124_v41 = vmul.f32 %v116_v5, %v107_v58  ;;  %v125_v13 = vmul.f32 %v117_v21, %v106_v3 }
 0x12f   :  { %v700_v18 = vsel %vm695_vm4, %v124_v41, %v588_v29  ;;  %v701_v60 = vsel %vm695_vm4, %v125_v13, %v589_v46 }
 0x130   :  { %858 = vmatpush.msrb.mxu0 %v700_v18  ;;  %878 = vmatpush.msrb.mxu1 %v701_v60 }
 0x131   :  { %2740 = vmatmul.msk.f32.vlgmr.msrb.gmra.mxu0 %vm735_vm9, %v3420_v7  ;;  %2742 = vmatmul.msk.f32.vlgmr.msrb.gmra.mxu1 %vm735_vm9, %v3420_v7 }
 0x174   :  { %v733_v31 = vpop.permute.xlu1 %732 }
 0x178   :  { %v820_v48 = vpop.f32.mrf.mxu2  ;;  %v840_v10 = vpop.f32.mrf.mxu3 }
 0x179   :  { %v821_v23 = vadd.f32 %v820_v48, %v733_v31  ;;  %v841_v25 = vadd.f32 %v840_v10, %v733_v31 }
 0x17b   :  { %v932_v14 = vrot.slane %v821_v23, 4  ;;  %v933_v11 = vrot.slane %v841_v25, 2 }
 0x17d   :  { %v940_v7 = vsel %vm939_vm10, %v932_v14, %v933_v11  ;;  %v945_v61 = vsel %vm944_vm11, %v933_v11, %v932_v14  ;;  %v950_v35 = vsel %vm937_vm12, %v932_v14, %v933_v11  ;;  %v954_v29 = vsel %vm942_vm13, %v932_v14, %v933_v11 }
 0x180   :  { %v800_v12 = vpop.f32.mrf.mxu1 }
 0x181   :  { %v801_v62 = vadd.f32 %v800_v12, %v733_v31 }
 0x183   :  { %v931_v28 = vrot.slane %v801_v62, 6 }
 0x19e   :  { %v780_v59 = vpop.f32.mrf.mxu0  ;;  %v900_v32 = vpop.f32.mrf.mxu2 }
 0x19f   :  { %v781_v33 = vadd.f32 %v780_v59, %v733_v31  ;;  %v901_v24 = vadd.f32 %v900_v32, %v733_v31 }
 0x1a1   :  { %v938_v2 = vsel %vm937_vm12, %v781_v33, %v931_v28  ;;  %v943_v36 = vsel %vm942_vm13, %v781_v33, %v931_v28  ;;  %v935_v37 = vrot.slane %v901_v24, 4  ;;  %v949_v34 = vsel %vm939_vm10, %v781_v33, %v931_v28 }
 0x1a2   :  { %v941_v22 = vsel %vm695_vm4, %v938_v2, %v940_v7  ;;  %v947_v43 = vsel %vm946_vm14, %v943_v36, %v945_v61  ;;  %v951_v57 = vsel %vm695_vm4, %v950_v35, %v949_v34  ;;  %v953_v58 = vsel %vm944_vm11, %v931_v28, %v781_v33 }
 0x1a3   :  { %v948_v17 = vrot.slane %v947_v43, 2  ;;  %v983_v55 = vrot.slane %v941_v22, 4  ;;  %v952_v41 = vrot.slane %v951_v57, 4  ;;  %v955_v25 = vsel %vm946_vm14, %v954_v29, %v953_v58 }
 0x1a4   :  { %v920_v26 = vpop.f32.mrf.mxu3  ;;  %v956_v14 = vrot.slane %v955_v25, 6 }
 0x1a5   :  { %v921_v15 = vadd.f32 %v920_v26, %v733_v31  ;;  %v999_v63 = vrot.slane %v948_v17, 4  ;;  %v1015_v62 = vrot.slane %v952_v41, 4 }
 0x1a7   :  { %v936_v38 = vrot.slane %v921_v15, 2 }
 0x1a9   :  { %v958_v45 = vsel %vm939_vm10, %v935_v37, %v936_v38  ;;  %v961_v47 = vsel %vm944_vm11, %v936_v38, %v935_v37  ;;  %v965_v20 = vsel %vm937_vm12, %v935_v37, %v936_v38  ;;  %v969_v13 = vsel %vm942_vm13, %v935_v37, %v936_v38 }
 0x1ae   :  { %v860_v39 = vpop.f32.mrf.mxu0  ;;  %v880_v40 = vpop.f32.mrf.mxu1 }
 0x1af   :  { %v881_v1 = vadd.f32 %v880_v40, %v733_v31  ;;  %v861_v8 = vadd.f32 %v860_v39, %v733_v31 }
 0x1b1   :  { %v934_v44 = vrot.slane %v881_v1, 6 }
 0x1b3   :  { %v957_v30 = vsel %vm937_vm12, %v861_v8, %v934_v44  ;;  %v960_v27 = vsel %vm942_vm13, %v861_v8, %v934_v44  ;;  %v964_v53 = vsel %vm939_vm10, %v861_v8, %v934_v44  ;;  %v968_v48 = vsel %vm944_vm11, %v934_v44, %v861_v8 }
 0x1b4   :  { %v959_v49 = vsel %vm695_vm4, %v957_v30, %v958_v45  ;;  %v962_v52 = vsel %vm946_vm14, %v960_v27, %v961_v47  ;;  %v966_v42 = vsel %vm695_vm4, %v965_v20, %v964_v53  ;;  %v970_v59 = vsel %vm946_vm14, %v969_v13, %v968_v48 }
 0x1b5   :  { %v963_v6 = vrot.slane %v962_v52, 2  ;;  %v980_v4 = vrot.slane %v959_v49, 4  ;;  %v984_v54 = vsel %vm981_vm15, %v959_v49, %v983_v55  ;;  %v967_v10 = vrot.slane %v966_v42, 4 }
 0x1b6   :  { %v992_v21 = vperm.slane %v984_v54, %v3598_v16  ;;  %v971_v11 = vrot.slane %v970_v59, 6  ;;  %v1031_v45 = vrot.slane %v956_v14, 4 }
 0x1b7   :  { %v982_v5 = vsel %vm981_vm15, %v980_v4, %v941_v22  ;;  %v997_v56 = vrot.slane %v963_v6, 4  ;;  %v1000_v3 = vsel %vm981_vm15, %v963_v6, %v999_v63  ;;  %v1013_v26 = vrot.slane %v967_v10, 4 }
 0x1b8   :  { %v988_v51 = vperm.slane %v982_v5, %v3598_v16  ;;  %v993_v19 = vrot.slane %v992_v21, 4  ;;  %v1008_v12 = vperm.slane %v1000_v3, %v3598_v16  ;;  %v1016_v28 = vsel %vm981_vm15, %v967_v10, %v1015_v62 }
 0x1b9   :  { %v998_v60 = vsel %vm981_vm15, %v997_v56, %v948_v17  ;;  %v1014_v61 = vsel %vm981_vm15, %v1013_v26, %v952_v41  ;;  %v1024_v37 = vperm.slane %v1016_v28, %v3598_v16  ;;  %v1029_v55 = vrot.slane %v971_v11, 4 }
 0x1ba   :  { %v995_v46 = vrot.slane %v988_v51, 4  ;;  %v3617_v18 = vsel %vm981_vm15, %v993_v19, %v988_v51  ;;  %v1004_v23 = vperm.slane %v998_v60, %v3598_v16  ;;  %v1009_v32 = vrot.slane %v1008_v12, 4 }
 0x1bb   :  { %1053 = vst [vmem:[#allocation1] ss:$4 sm:$0xff] %v3617_v18  ;;  %v1020_v43 = vperm.slane %v1014_v61, %v3598_v16  ;;  %v1025_v27 = vrot.slane %v1024_v37, 4  ;;  %v1032_v52 = vsel %vm981_vm15, %v971_v11, %v1031_v45  ;;  %v1030_v63 = vsel %vm981_vm15, %v1029_v55, %v956_v14 }
 0x1bc   :  { %v3622_v31 = vsel %vm981_vm15, %v992_v21, %v995_v46  ;;  %v1011_v33 = vrot.slane %v1004_v23, 4  ;;  %v3632_v7 = vsel %vm981_vm15, %v1009_v32, %v1004_v23  ;;  %v1040_v5 = vperm.slane %v1032_v52, %v3598_v16 }
 0x1bd   :  { %1059 = vst [vmem:[#allocation1 + $0x20] ss:$4 sm:$0xff] %v3622_v31  ;;  %v1027_v6 = vrot.slane %v1020_v43, 4  ;;  %v3651_v54 = vsel %vm981_vm15, %v1025_v27, %v1020_v43  ;;  %v1036_v41 = vperm.slane %v1030_v63, %v3598_v16  ;;  %v1206_v52 = vmul.f32 %v3617_v18, %v3617_v18 }
 0x1be   :  { %v3641_v22 = vsel %vm981_vm15, %v1008_v12, %v1011_v33  ;;  %v1041_v25 = vrot.slane %v1040_v5, 4 }
 0x1bf   :  { %v3660_v46 = vsel %vm981_vm15, %v1024_v37, %v1027_v6  ;;  %v1043_v14 = vrot.slane %v1036_v41, 4 }
 0x1c2   :  { %v1054_v24 = vld.sshfl [vmem:[#allocation1] sm:$0xff pattern:$0x73625140]  ;;  %v1055_v15 = vld.sshfl [vmem:[#allocation1 + $0x8] sm:$0xff pattern:$0x73625140] }
 0x1c3   :  { %v1056_v2 = vld.sshfl [vmem:[#allocation1 + $0x10] sm:$0xff pattern:$0x73625140]  ;;  %v1057_v36 = vld.sshfl [vmem:[#allocation1 + $0x18] sm:$0xff pattern:$0x73625140] }
 0x1c4   :  { %v1126_v38 = vsel %vm937_vm12, %v1054_v24, 0.0  ;;  %v1127_v39 = vsel %vm937_vm12, %v1055_v15, 0.0  ;;  %v1129_v40 = vsel %vm937_vm12, %v1056_v2, 0.0  ;;  %1064 = vst [vmem:[#allocation1] ss:$4 sm:$0xff] %v3632_v7  ;;  %v1131_v49 = vsel %vm937_vm12, %v1057_v36, 0.0 }
 0x1c5   :  { %v1128_v1 = vadd.f32 %v1127_v39, %v1126_v38  ;;  %v1060_v0 = vld.sshfl [vmem:[#allocation1 + $0x20] sm:$0xff pattern:$0x73625140]  ;;  %v1061_v50 = vld.sshfl [vmem:[#allocation1 + $0x28] sm:$0xff pattern:$0x73625140]  ;;  %v3670_v24 = vsel %vm981_vm15, %v1041_v25, %v1036_v41 }
 0x1c6   :  { %v1062_v8 = vld.sshfl [vmem:[#allocation1 + $0x30] sm:$0xff pattern:$0x73625140]  ;;  %v1063_v44 = vld.sshfl [vmem:[#allocation1 + $0x38] sm:$0xff pattern:$0x73625140] }
 0x1c7   :  { %v1130_v47 = vadd.f32 %v1129_v40, %v1128_v1  ;;  %v1135_v17 = vsel %vm937_vm12, %v1060_v0, 0.0  ;;  %v1136_v30 = vsel %vm937_vm12, %v1061_v50, 0.0  ;;  %1069 = vst [vmem:[#allocation1 + $0x20] ss:$4 sm:$0xff] %v3641_v22  ;;  %v1138_v4 = vsel %vm937_vm12, %v1062_v8, 0.0 }
 0x1c8   :  { %v1137_v35 = vadd.f32 %v1136_v30, %v1135_v17  ;;  %v1140_v48 = vsel %vm937_vm12, %v1063_v44, 0.0  ;;  %v3677_v0 = vsel %vm981_vm15, %v1040_v5, %v1043_v14 }
 0x1c9   :  { %v1132_v34 = vadd.f32 %v1131_v49, %v1130_v47 }
 0x1ca   :  { %v1139_v57 = vadd.f32 %v1138_v4, %v1137_v35 }
 0x1cb   :  { %1133 = vadd.xlane.f32.xlu2 %v1132_v34  ;;  %v1065_v53 = vld.sshfl [vmem:[#allocation1] sm:$0xff pattern:$0x73625140]  ;;  %v1066_v20 = vld.sshfl [vmem:[#allocation1 + $0x8] sm:$0xff pattern:$0x73625140] }
 0x1cc   :  { %v1067_v21 = vld.sshfl [vmem:[#allocation1 + $0x10] sm:$0xff pattern:$0x73625140]  ;;  %v1068_v56 = vld.sshfl [vmem:[#allocation1 + $0x18] sm:$0xff pattern:$0x73625140]  ;;  %v1141_v59 = vadd.f32 %v1140_v48, %v1139_v57 }
 0x1cd   :  { %v1144_v51 = vsel %vm937_vm12, %v1065_v53, 0.0  ;;  %v1145_v42 = vsel %vm937_vm12, %v1066_v20, 0.0  ;;  %v1147_v19 = vsel %vm937_vm12, %v1067_v21, 0.0  ;;  %1074 = vst [vmem:[#allocation1] ss:$4 sm:$0xff] %v3651_v54  ;;  %v1149_v62 = vsel %vm937_vm12, %v1068_v56, 0.0 }
 0x1ce   :  { %v1146_v3 = vadd.f32 %v1145_v42, %v1144_v51  ;;  %v1070_v58 = vld.sshfl [vmem:[#allocation1 + $0x20] sm:$0xff pattern:$0x73625140]  ;;  %v1071_v29 = vld.sshfl [vmem:[#allocation1 + $0x28] sm:$0xff pattern:$0x73625140]  ;;  %v1207_v21 = vmul.f32 %v3622_v31, %v3622_v31 }
 0x1cf   :  { %v1072_v13 = vld.sshfl [vmem:[#allocation1 + $0x30] sm:$0xff pattern:$0x73625140]  ;;  %v1073_v60 = vld.sshfl [vmem:[#allocation1 + $0x38] sm:$0xff pattern:$0x73625140] }
 0x1d0   :  { %v1148_v10 = vadd.f32 %v1147_v19, %v1146_v3  ;;  %v1153_v12 = vsel %vm937_vm12, %v1070_v58, 0.0  ;;  %v1154_v23 = vsel %vm937_vm12, %v1071_v29, 0.0  ;;  %1079 = vst [vmem:[#allocation1 + $0x20] ss:$4 sm:$0xff] %v3660_v46  ;;  %v1156_v11 = vsel %vm937_vm12, %v1072_v13, 0.0 }
 0x1d1   :  { %v1155_v26 = vadd.f32 %v1154_v23, %v1153_v12  ;;  %v1158_v8 = vsel %vm937_vm12, %v1073_v60, 0.0  ;;  %v1208_v23 = vmul.f32 %v3632_v7, %v3632_v7 }
 0x1d2   :  { %v1150_v32 = vadd.f32 %v1149_v62, %v1148_v10 }
 0x1d3   :  { %1142 = vadd.xlane.f32.xlu2 %v1141_v59  ;;  %v1157_v2 = vadd.f32 %v1156_v11, %v1155_v26 }
 0x1d4   :  { %1151 = vadd.xlane.f32.xlu0 %v1150_v32  ;;  %v1075_v33 = vld.sshfl [vmem:[#allocation1] sm:$0xff pattern:$0x73625140]  ;;  %v1076_v28 = vld.sshfl [vmem:[#allocation1 + $0x8] sm:$0xff pattern:$0x73625140] }
 0x1d5   :  { %v1077_v15 = vld.sshfl [vmem:[#allocation1 + $0x10] sm:$0xff pattern:$0x73625140]  ;;  %v1078_v61 = vld.sshfl [vmem:[#allocation1 + $0x18] sm:$0xff pattern:$0x73625140]  ;;  %v1159_v17 = vadd.f32 %v1158_v8, %v1157_v2 }
 0x1d6   :  { %v1162_v36 = vsel %vm937_vm12, %v1075_v33, 0.0  ;;  %v1163_v37 = vsel %vm937_vm12, %v1076_v28, 0.0  ;;  %v1165_v38 = vsel %vm937_vm12, %v1077_v15, 0.0  ;;  %1084 = vst [vmem:[#allocation1] ss:$4 sm:$0xff] %v3670_v24  ;;  %v1167_v30 = vsel %vm937_vm12, %v1078_v61, 0.0 }
 0x1d7   :  { %v1164_v39 = vadd.f32 %v1163_v37, %v1162_v36  ;;  %v1080_v40 = vld.sshfl [vmem:[#allocation1 + $0x20] sm:$0xff pattern:$0x73625140]  ;;  %v1081_v1 = vld.sshfl [vmem:[#allocation1 + $0x28] sm:$0xff pattern:$0x73625140]  ;;  %v1209_v28 = vmul.f32 %v3641_v22, %v3641_v22 }
 0x1d8   :  { %v1082_v50 = vld.sshfl [vmem:[#allocation1 + $0x30] sm:$0xff pattern:$0x73625140]  ;;  %v1083_v43 = vld.sshfl [vmem:[#allocation1 + $0x38] sm:$0xff pattern:$0x73625140] }
 0x1d9   :  { %v1166_v44 = vadd.f32 %v1165_v38, %v1164_v39  ;;  %v1171_v45 = vsel %vm937_vm12, %v1080_v40, 0.0  ;;  %v1172_v47 = vsel %vm937_vm12, %v1081_v1, 0.0  ;;  %1089 = vst [vmem:[#allocation1 + $0x20] ss:$4 sm:$0xff] %v3677_v0  ;;  %v1174_v49 = vsel %vm937_vm12, %v1082_v50, 0.0 }
 0x1da   :  { %v1173_v55 = vadd.f32 %v1172_v47, %v1171_v45  ;;  %v1176_v3 = vsel %vm937_vm12, %v1083_v43, 0.0 }
 0x1db   :  { %v1168_v27 = vadd.f32 %v1167_v30, %v1166_v44  ;;  %v1210_v30 = vmul.f32 %v3651_v54, %v3651_v54 }
 0x1dc   :  { %1160 = vadd.xlane.f32.xlu0 %v1159_v17  ;;  %v1175_v53 = vadd.f32 %v1174_v49, %v1173_v55 }
 0x1dd   :  { %1169 = vadd.xlane.f32.xlu1 %v1168_v27  ;;  %v1085_v34 = vld.sshfl [vmem:[#allocation1] sm:$0xff pattern:$0x73625140]  ;;  %v1086_v35 = vld.sshfl [vmem:[#allocation1 + $0x8] sm:$0xff pattern:$0x73625140] }
 0x1de   :  { %v1087_v6 = vld.sshfl [vmem:[#allocation1 + $0x10] sm:$0xff pattern:$0x73625140]  ;;  %v1088_v4 = vld.sshfl [vmem:[#allocation1 + $0x18] sm:$0xff pattern:$0x73625140]  ;;  %v1177_v13 = vadd.f32 %v1176_v3, %v1175_v53  ;;  %v1211_v53 = vmul.f32 %v3660_v46, %v3660_v46 }
 0x1df   :  { %v1180_v20 = vsel %vm937_vm12, %v1085_v34, 0.0  ;;  %v1181_v63 = vsel %vm937_vm12, %v1086_v35, 0.0  ;;  %v1183_v5 = vsel %vm937_vm12, %v1087_v6, 0.0  ;;  %1222 = vst [vmem:[#allocation1] ss:$4 sm:$0xff] %v1206_v52  ;;  %v1185_v60 = vsel %vm937_vm12, %v1088_v4, 0.0 }
 0x1e0   :  { %v1182_v56 = vadd.f32 %v1181_v63, %v1180_v20  ;;  %v1090_v57 = vld.sshfl [vmem:[#allocation1 + $0x20] sm:$0xff pattern:$0x73625140]  ;;  %v1091_v51 = vld.sshfl [vmem:[#allocation1 + $0x28] sm:$0xff pattern:$0x73625140] }
 0x1e1   :  { %v1092_v42 = vld.sshfl [vmem:[#allocation1 + $0x30] sm:$0xff pattern:$0x73625140]  ;;  %v1093_v19 = vld.sshfl [vmem:[#allocation1 + $0x38] sm:$0xff pattern:$0x73625140] }
 0x1e2   :  { %v1184_v58 = vadd.f32 %v1183_v5, %v1182_v56  ;;  %v1189_v29 = vsel %vm937_vm12, %v1090_v57, 0.0  ;;  %v1190_v41 = vsel %vm937_vm12, %v1091_v51, 0.0  ;;  %1228 = vst [vmem:[#allocation1 + $0x20] ss:$4 sm:$0xff] %v1207_v21  ;;  %v1192_v12 = vsel %vm937_vm12, %v1092_v42, 0.0 }
 0x1e3   :  { %v1191_v10 = vadd.f32 %v1190_v41, %v1189_v29  ;;  %v1194_v39 = vsel %vm937_vm12, %v1093_v19, 0.0 }
 0x1e4   :  { %v1186_v48 = vadd.f32 %v1185_v60, %v1184_v58 }
 0x1e5   :  { %1178 = vadd.xlane.f32.xlu1 %v1177_v13  ;;  %v1193_v33 = vadd.f32 %v1192_v12, %v1191_v10  ;;  %v1212_v13 = vmul.f32 %v3670_v24, %v3670_v24 }
 0x1e6   :  { %1187 = vadd.xlane.f32.xlu2 %v1186_v48  ;;  %v1223_v25 = vld.sshfl [vmem:[#allocation1] sm:$0xff pattern:$0x73625140]  ;;  %v1224_v59 = vld.sshfl [vmem:[#allocation1 + $0x8] sm:$0xff pattern:$0x73625140] }
 0x1e7   :  { %v1225_v62 = vld.sshfl [vmem:[#allocation1 + $0x10] sm:$0xff pattern:$0x73625140]  ;;  %v1226_v32 = vld.sshfl [vmem:[#allocation1 + $0x18] sm:$0xff pattern:$0x73625140]  ;;  %v1195_v43 = vadd.f32 %v1194_v39, %v1193_v33 }
 0x1e8   :  { %v1295_v26 = vsel %vm937_vm12, %v1223_v25, 0.0  ;;  %v1296_v14 = vsel %vm937_vm12, %v1224_v59, 0.0  ;;  %v1298_v11 = vsel %vm937_vm12, %v1225_v62, 0.0  ;;  %1233 = vst [vmem:[#allocation1] ss:$4 sm:$0xff] %v1208_v23  ;;  %v1300_v50 = vsel %vm937_vm12, %v1226_v32, 0.0 }
 0x1e9   :  { %v1297_v15 = vadd.f32 %v1296_v14, %v1295_v26  ;;  %v1229_v61 = vld.sshfl [vmem:[#allocation1 + $0x20] sm:$0xff pattern:$0x73625140]  ;;  %v1230_v2 = vld.sshfl [vmem:[#allocation1 + $0x28] sm:$0xff pattern:$0x73625140]  ;;  %v1213_v26 = vmul.f32 %v3677_v0, %v3677_v0 }
 0x1ea   :  { %v1231_v36 = vld.sshfl [vmem:[#allocation1 + $0x30] sm:$0xff pattern:$0x73625140]  ;;  %v1232_v37 = vld.sshfl [vmem:[#allocation1 + $0x38] sm:$0xff pattern:$0x73625140] }
 0x1eb   :  { %v1299_v38 = vadd.f32 %v1298_v11, %v1297_v15  ;;  %v1304_v40 = vsel %vm937_vm12, %v1229_v61, 0.0  ;;  %v1305_v1 = vsel %vm937_vm12, %v1230_v2, 0.0  ;;  %1238 = vst [vmem:[#allocation1 + $0x20] ss:$4 sm:$0xff] %v1209_v28  ;;  %v1307_v45 = vsel %vm937_vm12, %v1231_v36, 0.0 }
 0x1ec   :  { %v1306_v8 = vadd.f32 %v1305_v1, %v1304_v40  ;;  %v1309_v17 = vsel %vm937_vm12, %v1232_v37, 0.0 }
 0x1ed   :  { %v1301_v44 = vadd.f32 %v1300_v50, %v1299_v38 }
 0x1ee   :  { %1196 = vadd.xlane.f32.xlu2 %v1195_v43  ;;  %v1308_v47 = vadd.f32 %v1307_v45, %v1306_v8 }
 0x1ef   :  { %1302 = vadd.xlane.f32.xlu0 %v1301_v44  ;;  %v1234_v27 = vld.sshfl [vmem:[#allocation1] sm:$0xff pattern:$0x73625140]  ;;  %v1235_v55 = vld.sshfl [vmem:[#allocation1 + $0x8] sm:$0xff pattern:$0x73625140] }
 0x1f0   :  { %v1310_v49 = vadd.f32 %v1309_v17, %v1308_v47  ;;  %v1236_v52 = vld.sshfl [vmem:[#allocation1 + $0x10] sm:$0xff pattern:$0x73625140]  ;;  %v1237_v34 = vld.sshfl [vmem:[#allocation1 + $0x18] sm:$0xff pattern:$0x73625140] }
 0x1f1   :  { %v1313_v35 = vsel %vm937_vm12, %v1234_v27, 0.0  ;;  %v1314_v6 = vsel %vm937_vm12, %v1235_v55, 0.0  ;;  %v1316_v4 = vsel %vm937_vm12, %v1236_v52, 0.0  ;;  %1243 = vst [vmem:[#allocation1] ss:$4 sm:$0xff] %v1210_v30  ;;  %v1318_v58 = vsel %vm937_vm12, %v1237_v34, 0.0 }
 0x1f2   :  { %1311 = vadd.xlane.f32.xlu1 %v1310_v49  ;;  %v1315_v20 = vadd.f32 %v1314_v6, %v1313_v35  ;;  %v1239_v63 = vld.sshfl [vmem:[#allocation1 + $0x20] sm:$0xff pattern:$0x73625140]  ;;  %v1240_v5 = vld.sshfl [vmem:[#allocation1 + $0x28] sm:$0xff pattern:$0x73625140] }
 0x1f3   :  { %v1241_v21 = vld.sshfl [vmem:[#allocation1 + $0x30] sm:$0xff pattern:$0x73625140]  ;;  %v1242_v56 = vld.sshfl [vmem:[#allocation1 + $0x38] sm:$0xff pattern:$0x73625140] }
 0x1f4   :  { %v1317_v57 = vadd.f32 %v1316_v4, %v1315_v20  ;;  %v1322_v51 = vsel %vm937_vm12, %v1239_v63, 0.0  ;;  %v1323_v42 = vsel %vm937_vm12, %v1240_v5, 0.0  ;;  %1248 = vst [vmem:[#allocation1 + $0x20] ss:$4 sm:$0xff] %v1211_v53  ;;  %v1325_v3 = vsel %vm937_vm12, %v1241_v21, 0.0 }
 0x1f5   :  { %v1324_v19 = vadd.f32 %v1323_v42, %v1322_v51  ;;  %v1327_v41 = vsel %vm937_vm12, %v1242_v56, 0.0  ;;  %v2766_v34 = vld [vmem:[%s4220_s5 + $0x2] ss:$0 sm:$0xff] }
 0x1f6   :  { %v1319_v60 = vadd.f32 %v1318_v58, %v1317_v57 }
 0x1f7   :  { %v1326_v29 = vadd.f32 %v1325_v3, %v1324_v19  ;;  %v2768_v3 = vld [vmem:[%s4220_s5] ss:$0 sm:$0xff] }
 0x1f8   :  { %v1244_v48 = vld.sshfl [vmem:[#allocation1] sm:$0xff pattern:$0x73625140]  ;;  %v1245_v10 = vld.sshfl [vmem:[#allocation1 + $0x8] sm:$0xff pattern:$0x73625140] }
 0x1f9   :  { %v1328_v12 = vadd.f32 %v1327_v41, %v1326_v29  ;;  %v1246_v23 = vld.sshfl [vmem:[#allocation1 + $0x10] sm:$0xff pattern:$0x73625140]  ;;  %v1247_v25 = vld.sshfl [vmem:[#allocation1 + $0x18] sm:$0xff pattern:$0x73625140] }
 0x1fa   :  { %1320 = vadd.xlane.f32.xlu1 %v1319_v60  ;;  %v1331_v59 = vsel %vm937_vm12, %v1244_v48, 0.0  ;;  %v1332_v62 = vsel %vm937_vm12, %v1245_v10, 0.0  ;;  %v1334_v32 = vsel %vm937_vm12, %v1246_v23, 0.0  ;;  %1253 = vst [vmem:[#allocation1] ss:$4 sm:$0xff] %v1212_v13  ;;  %v1336_v2 = vsel %vm937_vm12, %v1247_v25, 0.0 }
 0x1fb   :  { %1329 = vadd.xlane.f32.xlu2 %v1328_v12  ;;  %v1333_v14 = vadd.f32 %v1332_v62, %v1331_v59  ;;  %v1249_v11 = vld.sshfl [vmem:[#allocation1 + $0x20] sm:$0xff pattern:$0x73625140]  ;;  %v1250_v33 = vld.sshfl [vmem:[#allocation1 + $0x28] sm:$0xff pattern:$0x73625140] }
 0x1fc   :  { %v1251_v28 = vld.sshfl [vmem:[#allocation1 + $0x30] sm:$0xff pattern:$0x73625140]  ;;  %v1252_v15 = vld.sshfl [vmem:[#allocation1 + $0x38] sm:$0xff pattern:$0x73625140] }
 0x1fd   :  { %v1335_v61 = vadd.f32 %v1334_v32, %v1333_v14  ;;  %1258 = vst [vmem:[#allocation1 + $0x20] ss:$4 sm:$0xff] %v1213_v26  ;;  %v1340_v44 = vsel %vm937_vm12, %v1249_v11, 0.0  ;;  %v1341_v45 = vsel %vm937_vm12, %v1250_v33, 0.0  ;;  %v1343_v55 = vsel %vm937_vm12, %v1251_v28, 0.0 }
 0x1fe   :  { %v1342_v27 = vadd.f32 %v1341_v45, %v1340_v44  ;;  %v1345_v52 = vsel %vm937_vm12, %v1252_v15, 0.0  ;;  %v2767_v29 = vld [vmem:[%s4220_s5 + $0x1] ss:$0 sm:$0xff]  ;;  %v2769_v60 = vld [vmem:[%s4220_s5 + $0x4] ss:$0 sm:$0xff] }
 0x1ff   :  { %v1337_v36 = vadd.f32 %v1336_v2, %v1335_v61  ;;  %v2772_v62 = vld [vmem:[%s4220_s5 + $0x6] ss:$0 sm:$0xff] }
 0x200   :  { %v1344_v49 = vadd.f32 %v1343_v55, %v1342_v27 }
 0x201   :  { %v1254_v37 = vld.sshfl [vmem:[#allocation1] sm:$0xff pattern:$0x73625140]  ;;  %v1255_v38 = vld.sshfl [vmem:[#allocation1 + $0x8] sm:$0xff pattern:$0x73625140] }
 0x202   :  { %v1256_v39 = vld.sshfl [vmem:[#allocation1 + $0x10] sm:$0xff pattern:$0x73625140]  ;;  %v1349_v40 = vsel %vm937_vm12, %v1254_v37, 0.0  ;;  %v1350_v1 = vsel %vm937_vm12, %v1255_v38, 0.0  ;;  %v1346_v35 = vadd.f32 %v1345_v52, %v1344_v49 }
 0x203   :  { %1338 = vadd.xlane.f32.xlu2 %v1337_v36  ;;  %v1257_v50 = vld.sshfl [vmem:[#allocation1 + $0x18] sm:$0xff pattern:$0x73625140]  ;;  %v1351_v43 = vadd.f32 %v1350_v1, %v1349_v40  ;;  %v1352_v8 = vsel %vm937_vm12, %v1256_v39, 0.0 }
 0x204   :  { %v1354_v17 = vsel %vm937_vm12, %v1257_v50, 0.0  ;;  %v1259_v6 = vld.sshfl [vmem:[#allocation1 + $0x20] sm:$0xff pattern:$0x73625140] }
 0x205   :  { %v1353_v47 = vadd.f32 %v1352_v8, %v1351_v43  ;;  %v1260_v4 = vld.sshfl [vmem:[#allocation1 + $0x28] sm:$0xff pattern:$0x73625140]  ;;  %v1358_v53 = vsel %vm937_vm12, %v1259_v6, 0.0 }
 0x206   :  { %v1359_v20 = vsel %vm937_vm12, %v1260_v4, 0.0  ;;  %v1261_v63 = vld.sshfl [vmem:[#allocation1 + $0x30] sm:$0xff pattern:$0x73625140] }
 0x207   :  { %v1355_v30 = vadd.f32 %v1354_v17, %v1353_v47  ;;  %v1360_v5 = vadd.f32 %v1359_v20, %v1358_v53  ;;  %v1361_v21 = vsel %vm937_vm12, %v1261_v63, 0.0  ;;  %v1262_v56 = vld.sshfl [vmem:[#allocation1 + $0x38] sm:$0xff pattern:$0x73625140] }
 0x208   :  { %v1363_v51 = vsel %vm937_vm12, %v1262_v56, 0.0 }
 0x209   :  { %1356 = vadd.xlane.f32.xlu0 %v1355_v30  ;;  %v1362_v57 = vadd.f32 %v1361_v21, %v1360_v5  ;;  %v2770_v21 = vld [vmem:[%s4219_s4] ss:$0 sm:$0xff] }
 0x20b   :  { %v1364_v42 = vadd.f32 %v1363_v51, %v1362_v57 }
 0x211   :  { %1347 = vadd.xlane.f32.xlu0 %v1346_v35 }
 0x213   :  { %1688 = vperm.xlu1 %2763, %v2766_v34  }
 0x21b   :  { %1696 = vperm.xlu2 %2765, %v2769_v60  }
 0x225   :  { %1680 = vperm.xlu0 %2764, %v2768_v3  }
 0x22d   :  { %1704 = vperm.xlu0 %2764, %v2772_v62  }
 0x23d   :  { %1365 = vadd.xlane.f32.xlu1 %v1364_v42 }
 0x23e   :  { %v1134_v19 = vpop.xlane.xlu2 %1133 }
 0x23f   :  { %v3756_v23 = vmul.f32 0.001953125, %v1134_v19 }
 0x241   :  { %v1375_v32 = vmul.f32 %v3756_v23, %v3756_v23 }
 0x246   :  { %v1143_v13 = vpop.xlane.xlu2 %1142 }
 0x247   :  { %v1152_v58 = vpop.xlane.xlu0 %1151  ;;  %v3758_v25 = vmul.f32 0.001953125, %v1143_v13 }
 0x248   :  { %v3769_v36 = vmul.f32 0.001953125, %v1152_v58  ;;  %v2771_v58 = vld [vmem:[%s4219_s4 + $0x1] ss:$0 sm:$0xff] }
 0x249   :  { %v1376_v33 = vmul.f32 %v3758_v25, %v3758_v25 }
 0x24a   :  { %v1377_v40 = vmul.f32 %v3769_v36, %v3769_v36 }
 0x24f   :  { %v1161_v48 = vpop.xlane.xlu0 %1160 }
 0x250   :  { %v1170_v41 = vpop.xlane.xlu1 %1169  ;;  %v3771_v38 = vmul.f32 0.001953125, %v1161_v48 }
 0x251   :  { %v3777_v49 = vmul.f32 0.001953125, %v1170_v41 }
 0x252   :  { %v1378_v8 = vmul.f32 %v3771_v38, %v3771_v38 }
 0x253   :  { %v1379_v20 = vmul.f32 %v3777_v49, %v3777_v49 }
 0x256   :  { %1684 = vperm.xlu1 %2763, %v2767_v29  }
 0x258   :  { %v3754_v12 = vpop.xlane.xlu1 %1178 }
 0x259   :  { %v1188_v10 = vpop.xlane.xlu2 %1187 }
 0x25a   :  { %v3787_v19 = vmul.f32 0.001953125, %v1188_v10 }
 0x261   :  { %v3767_v28 = vpop.xlane.xlu2 %1196 }
 0x262   :  { %v1303_v59 = vpop.xlane.xlu0 %1302 }
 0x263   :  { %v1367_v26 = vmul.f32 0.001953125, %v1303_v59 }
 0x265   :  { %v1383_v14 = vsub.f32 %v1367_v26, %v1375_v32  ;;  %v1312_v11 = vpop.xlane.xlu1 %1311  ;;  %v1381_v26 = vmul.f32 %v3787_v19, %v3787_v19 }
 0x266   :  { %v1368_v15 = vmul.f32 0.001953125, %v1312_v11 }
 0x267   :  { %v1391_v61 = vadd.f32 1e-05, %v1383_v14 }
 0x268   :  { %v1384_v2 = vsub.f32 %v1368_v15, %v1376_v33 }
 0x269   :  { %2783 = vrsqrt.f32 %v1391_v61  ;;  %vm1405_vm3 = vweird.f32 %v1391_v61 }
 0x26a   :  { %v1392_v37 = vadd.f32 1e-05, %v1384_v2 }
 0x26c   :  { %2785 = vrsqrt.f32 %v1392_v37  ;;  %vm1415_vm8 = vweird.f32 %v1392_v37 }
 0x26d   :  { %v1321_v39 = vpop.xlane.xlu1 %1320 }
 0x26e   :  { %v1369_v1 = vmul.f32 0.001953125, %v1321_v39  ;;  %v1330_v50 = vpop.xlane.xlu2 %1329 }
 0x26f   :  { %v2784_v43 = vpop.eup %2783  ;;  %v1370_v44 = vmul.f32 0.001953125, %v1330_v50  ;;  %v2773_v50 = vld [vmem:[%s4219_s4 + $0x2] ss:$0 sm:$0xff] }
 0x270   :  { %v1400_v45 = vmul.f32 %v2784_v43, %v1391_v61  ;;  %v1385_v47 = vsub.f32 %v1369_v1, %v1377_v40  ;;  %vm1406_vm1 = vweird.f32 %v2784_v43 }
 0x271   :  { %v1386_v17 = vsub.f32 %v1370_v44, %v1378_v8  ;;  %vm1407_vm6 = vmor %vm1405_vm3, %vm1406_vm1  ;;  %v2774_v44 = vld [vmem:[%s4219_s4 + $0x3] ss:$0 sm:$0xff] }
 0x272   :  { %v2786_v30 = vpop.eup %2785  ;;  %v1401_v27 = vmul.f32 %v2784_v43, %v1400_v45  ;;  %v1393_v55 = vadd.f32 1e-05, %v1385_v47 }
 0x273   :  { %v1410_v52 = vmul.f32 %v2786_v30, %v1392_v37  ;;  %v3779_v34 = vadd.f32 1e-05, %v1386_v17  ;;  %vm1416_vm7 = vweird.f32 %v2786_v30  ;;  %v3796_v37 = vmul.f32 0.001953125, %v3754_v12 }
 0x274   :  { %v1402_v35 = vmul.f32 0.5, %v1401_v27  ;;  %2787 = vrsqrt.f32 %v1393_v55  ;;  %vm1417_vm9 = vmor %vm1415_vm8, %vm1416_vm7  ;;  %vm1425_vm12 = vweird.f32 %v1393_v55 }
 0x275   :  { %v1411_v6 = vmul.f32 %v2786_v30, %v1410_v52  ;;  %2789 = vrsqrt.f32 %v3779_v34  ;;  %vm1435_vm13 = vweird.f32 %v3779_v34  ;;  %v1380_v47 = vmul.f32 %v3796_v37, %v3796_v37 }
 0x276   :  { %v1403_v4 = vsub.f32 1.5, %v1402_v35  ;;  %v1339_v53 = vpop.xlane.xlu2 %1338 }
 0x277   :  { %v1412_v63 = vmul.f32 0.5, %v1411_v6  ;;  %v1371_v5 = vmul.f32 0.001953125, %v1339_v53 }
 0x278   :  { %v1404_v56 = vmul.f32 %v2784_v43, %v1403_v4 }
 0x279   :  { %v1413_v57 = vsub.f32 1.5, %v1412_v63  ;;  %v1387_v51 = vsub.f32 %v1371_v5, %v1379_v20 }
 0x27a   :  { %v2788_v42 = vpop.eup %2787  ;;  %v1408_v3 = vsel %vm1407_vm6, %v2784_v43, %v1404_v56 }
 0x27b   :  { %v2790_v29 = vpop.eup %2789  ;;  %v1420_v41 = vmul.f32 %v2788_v42, %v1393_v55  ;;  %v1395_v13 = vadd.f32 1e-05, %v1387_v51  ;;  %v1511_v60 = vmul.f32 %v2770_v21, %v1408_v3  ;;  %v1414_v48 = vmul.f32 %v2786_v30, %v1413_v57  ;;  %v2775_v21 = vld [vmem:[%s4219_s4 + $0x4] ss:$0 sm:$0xff]  ;;  %v2778_v57 = vld [vmem:[%s4220_s5 + $0x5] ss:$0 sm:$0xff] }
 0x27c   :  { %v1430_v59 = vmul.f32 %v2790_v29, %v3779_v34  ;;  %v1357_v32 = vpop.xlane.xlu0 %1356  ;;  %vm1426_vm10 = vweird.f32 %v2788_v42  ;;  %vm1436_vm11 = vweird.f32 %v2790_v29 }
 0x27d   :  { %v1421_v62 = vmul.f32 %v2788_v42, %v1420_v41  ;;  %2791 = vrsqrt.f32 %v1395_v13  ;;  %1577 = vperm.xlu2 %2765, %v1511_v60   ;;  %v1418_v10 = vsel %vm1417_vm9, %v2786_v30, %v1414_v48  ;;  %v1373_v11 = vmul.f32 0.001953125, %v1357_v32  ;;  %vm1427_vm14 = vmor %vm1425_vm12, %vm1426_vm10 }
 0x27e   :  { %v1431_v14 = vmul.f32 %v2790_v29, %v1430_v59  ;;  %v1512_v33 = vmul.f32 %v2771_v58, %v1418_v10  ;;  %vm1437_vm1 = vmor %vm1435_vm13, %vm1436_vm11  ;;  %vm1445_vm6 = vweird.f32 %v1395_v13 }
 0x27f   :  { %v1422_v15 = vmul.f32 0.5, %v1421_v62  ;;  %v1389_v2 = vsub.f32 %v1373_v11, %v1381_v26 }
 0x280   :  { %v1432_v61 = vmul.f32 0.5, %v1431_v14  ;;  %1581 = vperm.xlu1 %2763, %v1512_v33   ;;  %v2777_v14 = vld [vmem:[%s4219_s4 + $0x5] ss:$0 sm:$0xff] }
 0x281   :  { %v1423_v39 = vsub.f32 1.5, %v1422_v15  ;;  %v1397_v1 = vadd.f32 1e-05, %v1389_v2 }
 0x282   :  { %v1433_v40 = vsub.f32 1.5, %v1432_v61  ;;  %v2779_v61 = vld [vmem:[%s4220_s5 + $0x7] ss:$0 sm:$0xff] }
 0x283   :  { %v2792_v43 = vpop.eup %2791  ;;  %v1424_v8 = vmul.f32 %v2788_v42, %v1423_v39  ;;  %2793 = vrsqrt.f32 %v1397_v1  ;;  %vm1465_vm9 = vweird.f32 %v1397_v1  ;;  %v3825_v39 = vmul.f32 0.001953125, %v3767_v28 }
 0x284   :  { %v1440_v12 = vmul.f32 %v2792_v43, %v1395_v13  ;;  %v1434_v45 = vmul.f32 %v2790_v29, %v1433_v40  ;;  %v1348_v17 = vpop.xlane.xlu0 %1347  ;;  %vm1446_vm3 = vweird.f32 %v2792_v43  ;;  %v2776_v13 = vld [vmem:[%s4219_s4 + $0x6] ss:$0 sm:$0xff] }
 0x285   :  { %v1428_v30 = vsel %vm1427_vm14, %v2788_v42, %v1424_v8  ;;  %v1372_v52 = vmul.f32 0.001953125, %v1348_v17  ;;  %vm1447_vm7 = vmor %vm1445_vm6, %vm1446_vm3  ;;  %v3822_v2 = vpop.permute.xlu1 %1688 }
 0x286   :  { %v1441_v27 = vmul.f32 %v2792_v43, %v1440_v12  ;;  %v1513_v55 = vmul.f32 %v2773_v50, %v1428_v30  ;;  %v1438_v35 = vsel %vm1437_vm1, %v2790_v29, %v1434_v45  ;;  %v2780_v30 = vld [vmem:[%s4219_s4 + $0x7] ss:$0 sm:$0xff] }
 0x287   :  { %v1514_v6 = vmul.f32 %v2774_v44, %v1438_v35  ;;  %v1388_v53 = vsub.f32 %v1372_v52, %v1380_v47  ;;  %v1697_v35 = vpop.permute.xlu2 %1696 }
 0x288   :  { %v1442_v4 = vmul.f32 0.5, %v1441_v27  ;;  %1585 = vperm.xlu0 %2764, %v1513_v55   ;;  %v2781_v55 = vld [vmem:[%s4220_s5 + $0x3] ss:$0 sm:$0xff] }
 0x289   :  { %1589 = vperm.xlu2 %2765, %v1514_v6   ;;  %v2794_v34 = vpop.eup %2793  ;;  %v1396_v63 = vadd.f32 1e-05, %v1388_v53  ;;  %v2864_v6 = vmov 269488144  }
 0x28a   :  { %v1443_v20 = vsub.f32 1.5, %v1442_v4  ;;  %v1460_v5 = vmul.f32 %v2794_v34, %v1397_v1  ;;  %vm1466_vm8 = vweird.f32 %v2794_v34  ;;  %v1382_v1 = vmul.f32 %v3825_v39, %v3825_v39 }
 0x28b   :  { %2795 = vrsqrt.f32 %v1396_v63  ;;  %vm1467_vm10 = vmor %vm1465_vm9, %vm1466_vm8  ;;  %vm1455_vm12 = vweird.f32 %v1396_v63  ;;  %v1528_v4 = vunpack.c.l.s4 %v2864_v6 }
 0x28c   :  { %v1444_v56 = vmul.f32 %v2792_v43, %v1443_v20  ;;  %v1461_v51 = vmul.f32 %v2794_v34, %v1460_v5 }
 0x28d   :  { %v3835_v53 = vunpack.c.0.s8 %v1528_v4 }
 0x28e   :  { %v1448_v42 = vsel %vm1447_vm7, %v2792_v43, %v1444_v56  ;;  %v1462_v3 = vmul.f32 0.5, %v1461_v51 }
 0x28f   :  { %v1515_v58 = vmul.f32 %v2775_v21, %v1448_v42  ;;  %v1530_v20 = vperm.slane %v3756_v23, %v3835_v53  ;;  %v1534_v51 = vperm.slane %v3758_v25, %v3835_v53 }
 0x290   :  { %1700 = vperm.xlu0 %2764, %v2778_v57   ;;  %v1463_v29 = vsub.f32 1.5, %v1462_v3 }
 0x291   :  { %1593 = vperm.xlu1 %2763, %v1515_v58   ;;  %v2796_v41 = vpop.eup %2795  ;;  %v1567_v21 = vsub.f32 %v3617_v18, %v1530_v20  ;;  %v1568_v58 = vsub.f32 %v3622_v31, %v1534_v51  ;;  %v1558_v51 = vperm.slane %v3825_v39, %v3835_v53 }
 0x292   :  { %v1450_v60 = vmul.f32 %v2796_v41, %v1396_v63  ;;  %v1464_v48 = vmul.f32 %v2794_v34, %v1463_v29  ;;  %vm1456_vm11 = vweird.f32 %v2796_v41 }
 0x293   :  { %vm1457_vm13 = vmor %vm1455_vm12, %vm1456_vm11 }
 0x294   :  { %v1451_v59 = vmul.f32 %v2796_v41, %v1450_v60  ;;  %v1468_v62 = vsel %vm1467_vm10, %v2794_v34, %v1464_v48 }
 0x295   :  { %v1517_v32 = vmul.f32 %v2776_v13, %v1468_v62 }
 0x296   :  { %v1452_v10 = vmul.f32 0.5, %v1451_v59 }
 0x297   :  { %1601 = vperm.xlu2 %2765, %v1517_v32   ;;  %v1681_v57 = vpop.permute.xlu0 %1680 }
 0x298   :  { %v1453_v26 = vsub.f32 1.5, %v1452_v10 }
 0x29a   :  { %v1454_v11 = vmul.f32 %v2796_v41, %v1453_v26 }
 0x29c   :  { %v1458_v33 = vsel %vm1457_vm13, %v2796_v41, %v1454_v11 }
 0x29d   :  { %v1516_v15 = vmul.f32 %v2777_v14, %v1458_v33 }
 0x29f   :  { %1597 = vperm.xlu1 %2763, %v1516_v15   ;;  %v1705_v11 = vpop.permute.xlu0 %1704  ;;  %v1546_v15 = vperm.slane %v3777_v49, %v3835_v53 }
 0x2a7   :  { %1708 = vperm.xlu1 %2763, %v2779_v61  }
 0x2b0   :  { %v1366_v40 = vpop.xlane.xlu1 %1365 }
 0x2b1   :  { %v1374_v50 = vmul.f32 0.001953125, %v1366_v40  ;;  %v1571_v40 = vsub.f32 %v3651_v54, %v1546_v15  ;;  %v1554_v54 = vperm.slane %v3787_v19, %v3835_v53 }
 0x2b3   :  { %v1390_v43 = vsub.f32 %v1374_v50, %v1382_v1  ;;  %v1573_v20 = vsub.f32 %v3670_v24, %v1554_v54 }
 0x2b5   :  { %v1398_v8 = vadd.f32 1e-05, %v1390_v43  ;;  %v1550_v43 = vperm.slane %v3796_v37, %v3835_v53 }
 0x2b7   :  { %2797 = vrsqrt.f32 %v1398_v8  ;;  %vm1475_vm1 = vweird.f32 %v1398_v8 }
 0x2bd   :  { %v2798_v44 = vpop.eup %2797 }
 0x2be   :  { %v1470_v12 = vmul.f32 %v2798_v44, %v1398_v8  ;;  %vm1476_vm14 = vweird.f32 %v2798_v44 }
 0x2bf   :  { %vm1477_vm3 = vmor %vm1475_vm1, %vm1476_vm14 }
 0x2c0   :  { %v1471_v45 = vmul.f32 %v2798_v44, %v1470_v12 }
 0x2c2   :  { %v1472_v47 = vmul.f32 0.5, %v1471_v45 }
 0x2c4   :  { %v1473_v17 = vsub.f32 1.5, %v1472_v47  ;;  %v1572_v47 = vsub.f32 %v3660_v46, %v1550_v43  ;;  %v1538_v46 = vperm.slane %v3769_v36, %v3835_v53 }
 0x2c6   :  { %v1474_v28 = vmul.f32 %v2798_v44, %v1473_v17 }
 0x2c8   :  { %v1478_v27 = vsel %vm1477_vm3, %v2798_v44, %v1474_v28  ;;  %v1685_v5 = vpop.permute.xlu1 %1684 }
 0x2c9   :  { %v1518_v52 = vmul.f32 %v2780_v30, %v1478_v27 }
 0x2cb   :  { %1605 = vperm.xlu2 %2765, %v1518_v52  }
 0x2d3   :  { %1692 = vperm.xlu2 %2765, %v2781_v55  }
 0x2d7   :  { %v1578_v34 = vpop.permute.xlu2 %1577 }
 0x2d8   :  { %v1610_v63 = vperm.slane %v1578_v34, %v3835_v53 }
 0x2da   :  { %v1647_v56 = vmul.f32 %v1610_v63, %v1567_v21 }
 0x2dc   :  { %v1711_v42 = vadd.f32 %v1681_v57, %v1647_v56 }
 0x2de   :  { %v1719_v41 = vmax.f32 %v1711_v42, 0.0  ;;  %v1569_v42 = vsub.f32 %v3632_v7, %v1538_v46  ;;  %v2099_v46 = vld [vmem:[#allocation2 + $0xf0] sm:$0xff] }
 0x2e0   :  { %v1729_v23 = vrot.slane %v1719_v41, 4 }
 0x2e3   :  { %v1590_v8 = vpop.permute.xlu2 %1589 }
 0x2f1   :  { %v1602_v27 = vpop.permute.xlu2 %1601 }
 0x2f2   :  { %v1582_v3 = vpop.permute.xlu1 %1581 }
 0x2f3   :  { %v1614_v29 = vperm.slane %v1582_v3, %v3835_v53 }
 0x2f5   :  { %v1648_v13 = vmul.f32 %v1614_v29, %v1568_v58  ;;  %v1542_v29 = vperm.slane %v3771_v38, %v3835_v53 }
 0x2f7   :  { %v1712_v60 = vadd.f32 %v1685_v5, %v1648_v13 }
 0x2f9   :  { %v1720_v48 = vmax.f32 %v1712_v60, 0.0  ;;  %v1622_v60 = vperm.slane %v1590_v8, %v3835_v53 }
 0x2fa   :  { %v1586_v1 = vpop.permute.xlu0 %1585 }
 0x2fb   :  { %v1727_v59 = vrot.slane %v1720_v48, 4  ;;  %v1730_v62 = vsel %vm981_vm15, %v1720_v48, %v1729_v23  ;;  %v1618_v19 = vperm.slane %v1586_v1, %v3835_v53 }
 0x2fc   :  { %v1738_v18 = vperm.slane %v1730_v62, %v3598_v16  ;;  %v1570_v62 = vsub.f32 %v3641_v22, %v1542_v29  ;;  %v2115_v29 = vld [vmem:[#allocation2 + $0x170] sm:$0xff] }
 0x2fd   :  { %v1728_v32 = vsel %vm981_vm15, %v1727_v59, %v1719_v41  ;;  %v1649_v58 = vmul.f32 %v1618_v19, %v1569_v42  ;;  %v1574_v41 = vsub.f32 %v3677_v0, %v1558_v51  ;;  %v2097_v19 = vld [vmem:[#allocation2 + $0xe0] sm:$0xff]  ;;  %v2080_v51 = vld [vmem:[#allocation2 + $0x58] sm:$0xff] }
 0x2fe   :  { %v1734_v25 = vperm.slane %v1728_v32, %v3598_v16  ;;  %v1739_v10 = vrot.slane %v1738_v18, 4  ;;  %v2096_v42 = vld [vmem:[#allocation2 + $0xd8] sm:$0xff] }
 0x2ff   :  { %v1713_v48 = vadd.f32 %v3822_v2, %v1649_v58  ;;  %v2079_v58 = vld [vmem:[#allocation2 + $0x50] sm:$0xff] }
 0x300   :  { %v1740_v26 = vsel %vm981_vm15, %v1739_v10, %v1734_v25  ;;  %v1741_v31 = vrot.slane %v1734_v25, 4  ;;  %v1650_v10 = vmul.f32 %v1622_v60, %v1570_v62  ;;  %v2078_v60 = vld [vmem:[#allocation2 + $0x48] sm:$0xff]  ;;  %v2113_v62 = vld [vmem:[#allocation2 + $0x160] sm:$0xff] }
 0x301   :  { %1795 = vst [vmem:[#allocation1] ss:$4 sm:$0xff] %v1740_v26  ;;  %v1721_v32 = vmax.f32 %v1713_v48, 0.0  ;;  %v2114_v48 = vld [vmem:[#allocation2 + $0x168] sm:$0xff] }
 0x302   :  { %v3851_v14 = vsel %vm981_vm15, %v1738_v18, %v1741_v31  ;;  %v1701_v17 = vpop.permute.xlu0 %1700 }
 0x303   :  { %v1594_v33 = vpop.permute.xlu1 %1593 }
 0x304   :  { %v1626_v61 = vperm.slane %v1594_v33, %v3835_v53 }
 0x306   :  { %v1651_v50 = vmul.f32 %v1626_v61, %v1571_v40 }
 0x308   :  { %v1715_v44 = vadd.f32 %v1697_v35, %v1651_v50  ;;  %v1634_v35 = vperm.slane %v1602_v27, %v3835_v53 }
 0x30a   :  { %v1723_v30 = vmax.f32 %v1715_v44, 0.0  ;;  %v1653_v21 = vmul.f32 %v1634_v35, %v1573_v20  ;;  %v2084_v35 = vld [vmem:[#allocation2 + $0x78] sm:$0xff]  ;;  %v2082_v20 = vld [vmem:[#allocation2 + $0x68] sm:$0xff] }
 0x30b   :  { %2331 = vmatpush.msra.mxu0 %v2084_v35  ;;  %v2071_v35 = vld [vmem:[#allocation2 + $0x10] sm:$0xff] }
 0x30c   :  { %v1761_v52 = vrot.slane %v1723_v30, 4  ;;  %v1717_v36 = vadd.f32 %v1705_v11, %v1653_v21  ;;  %v2081_v21 = vld [vmem:[#allocation2 + $0x60] sm:$0xff] }
 0x30e   :  { %v1725_v23 = vmax.f32 %v1717_v36, 0.0  ;;  %v2132_v36 = vld [vmem:[#allocation2 + $0x1f8] sm:$0xff] }
 0x30f   :  { %2397 = vmatpush.msra.mxu3 %v2132_v36  ;;  %v2121_v36 = vld [vmem:[#allocation2 + $0x1a0] sm:$0xff] }
 0x310   :  { %v1777_v18 = vrot.slane %v1725_v23, 4 }
 0x311   :  { %v1598_v12 = vpop.permute.xlu1 %1597 }
 0x312   :  { %v1630_v45 = vperm.slane %v1598_v12, %v3835_v53 }
 0x314   :  { %v1652_v28 = vmul.f32 %v1630_v45, %v1572_v47 }
 0x316   :  { %v1716_v49 = vadd.f32 %v1701_v17, %v1652_v28 }
 0x318   :  { %v1724_v55 = vmax.f32 %v1716_v49, 0.0 }
 0x319   :  { %v1709_v59 = vpop.permute.xlu1 %1708 }
 0x31a   :  { %v1759_v6 = vrot.slane %v1724_v55, 4  ;;  %v1762_v37 = vsel %vm981_vm15, %v1724_v55, %v1761_v52 }
 0x31b   :  { %v1770_v4 = vperm.slane %v1762_v37, %v3598_v16 }
 0x31c   :  { %v1760_v34 = vsel %vm981_vm15, %v1759_v6, %v1723_v30 }
 0x31d   :  { %v1766_v63 = vperm.slane %v1760_v34, %v3598_v16  ;;  %v1771_v5 = vrot.slane %v1770_v4, 4  ;;  %v2083_v34 = vld [vmem:[#allocation2 + $0x70] sm:$0xff] }
 0x31e   :  { %2332 = vmatpush.msra.mxu0 %v2083_v34  ;;  %v2107_v34 = vld [vmem:[#allocation2 + $0x130] sm:$0xff] }
 0x31f   :  { %v1772_v56 = vsel %vm981_vm15, %v1771_v5, %v1766_v63  ;;  %v1773_v57 = vrot.slane %v1766_v63, 4  ;;  %v2098_v63 = vld [vmem:[#allocation2 + $0xe8] sm:$0xff] }
 0x320   :  { %1799 = vst [vmem:[#allocation1 + $0x2] ss:$4 sm:$0xff] %v1772_v56  ;;  %2333 = vmatpush.msra.mxu0 %v2082_v20  ;;  %v2070_v20 = vld [vmem:[#allocation2 + $0x8] sm:$0xff] }
 0x321   :  { %v1774_v3 = vsel %vm981_vm15, %v1770_v4, %v1773_v57  ;;  %v2100_v4 = vld [vmem:[#allocation2 + $0xf8] sm:$0xff] }
 0x322   :  { %2351 = vmatpush.msra.mxu1 %v2100_v4  ;;  %2334 = vmatpush.msra.mxu0 %v2081_v21  ;;  %v2087_v4 = vld [vmem:[#allocation2 + $0x90] sm:$0xff]  ;;  %v2106_v21 = vld [vmem:[#allocation2 + $0x128] sm:$0xff] }
 0x324   :  { %2352 = vmatpush.msra.mxu1 %v2099_v46  ;;  %2335 = vmatpush.msra.mxu0 %v2080_v51  ;;  %v2123_v46 = vld [vmem:[#allocation2 + $0x1b0] sm:$0xff]  ;;  %v2069_v51 = vld [vmem:[#allocation2] sm:$0xff] }
 0x325   :  { %v1606_v24 = vpop.permute.xlu2 %1605 }
 0x326   :  { %v1638_v13 = vperm.slane %v1606_v24, %v3835_v53  ;;  %v1745_v53 = vrot.slane %v1721_v32, 4  ;;  %2353 = vmatpush.msra.mxu1 %v2098_v63  ;;  %v2095_v24 = vld [vmem:[#allocation2 + $0xd0] sm:$0xff]  ;;  %2336 = vmatpush.msra.mxu0 %v2079_v58  ;;  %v2086_v63 = vld [vmem:[#allocation2 + $0x88] sm:$0xff]  ;;  %v2148_v58 = vld [vmem:[#allocation2 + $0x278] sm:$0xff] }
 0x328   :  { %v1654_v39 = vmul.f32 %v1638_v13, %v1574_v41  ;;  %2354 = vmatpush.msra.mxu1 %v2097_v19  ;;  %v2131_v13 = vld [vmem:[#allocation2 + $0x1f0] sm:$0xff]  ;;  %2337 = vmatpush.msra.mxu0 %v2078_v60  ;;  %v2122_v19 = vld [vmem:[#allocation2 + $0x1a8] sm:$0xff] }
 0x329   :  { %2398 = vmatpush.msra.mxu3 %v2131_v13  ;;  %v2104_v13 = vld [vmem:[#allocation2 + $0x118] sm:$0xff] }
 0x32a   :  { %v1718_v7 = vadd.f32 %v1709_v59, %v1654_v39  ;;  %2355 = vmatpush.msra.mxu1 %v2096_v42  ;;  %v2130_v39 = vld [vmem:[#allocation2 + $0x1e8] sm:$0xff]  ;;  %v2077_v59 = vld [vmem:[#allocation2 + $0x40] sm:$0xff] }
 0x32b   :  { %2399 = vmatpush.msra.mxu3 %v2130_v39  ;;  %2338 = vmatpush.msra.mxu0 %v2077_v59  ;;  %v2085_v42 = vld [vmem:[#allocation2 + $0x80] sm:$0xff]  ;;  %v2147_v39 = vld [vmem:[#allocation2 + $0x270] sm:$0xff] }
 0x32c   :  { %v1726_v25 = vmax.f32 %v1718_v7, 0.0  ;;  %2356 = vmatpush.msra.mxu1 %v2095_v24  ;;  %v2093_v7 = vld [vmem:[#allocation2 + $0xc0] sm:$0xff]  ;;  %v2163_v59 = vld [vmem:[#allocation2 + $0x2f0] sm:$0xff] }
 0x32d   :  { %v1693_v26 = vpop.permute.xlu2 %1692 }
 0x32e   :  { %v1775_v38 = vrot.slane %v1726_v25, 4  ;;  %v1778_v0 = vsel %vm981_vm15, %v1726_v25, %v1777_v18  ;;  %v1714_v31 = vadd.f32 %v1693_v26, %v1650_v10  ;;  %v2129_v18 = vld [vmem:[#allocation2 + $0x1e0] sm:$0xff]  ;;  %v2076_v10 = vld [vmem:[#allocation2 + $0x38] sm:$0xff] }
 0x32f   :  { %v1786_v11 = vperm.slane %v1778_v0, %v3598_v16  ;;  %2400 = vmatpush.msra.mxu3 %v2129_v18  ;;  %v2092_v26 = vld [vmem:[#allocation2 + $0xb8] sm:$0xff]  ;;  %2339 = vmatpush.msra.mxu0 %v2076_v10  ;;  %v2146_v18 = vld [vmem:[#allocation2 + $0x268] sm:$0xff] }
 0x330   :  { %v1776_v33 = vsel %vm981_vm15, %v1775_v38, %v1725_v23  ;;  %v1722_v2 = vmax.f32 %v1714_v31, 0.0  ;;  %v2094_v23 = vld [vmem:[#allocation2 + $0xc8] sm:$0xff]  ;;  %v2112_v38 = vld [vmem:[#allocation2 + $0x158] sm:$0xff]  ;;  %v2075_v31 = vld [vmem:[#allocation2 + $0x30] sm:$0xff] }
 0x331   :  { %v1782_v15 = vperm.slane %v1776_v33, %v3598_v16  ;;  %v1787_v61 = vrot.slane %v1786_v11, 4  ;;  %2357 = vmatpush.msra.mxu1 %v2094_v23  ;;  %v2128_v0 = vld [vmem:[#allocation2 + $0x1d8] sm:$0xff]  ;;  %2340 = vmatpush.msra.mxu0 %v2075_v31  ;;  %v2127_v33 = vld [vmem:[#allocation2 + $0x1d0] sm:$0xff]  ;;  %v2162_v10 = vld [vmem:[#allocation2 + $0x2e8] sm:$0xff] }
 0x332   :  { %v1743_v40 = vrot.slane %v1722_v2, 4  ;;  %v1746_v22 = vsel %vm981_vm15, %v1722_v2, %v1745_v53  ;;  %v2111_v53 = vld [vmem:[#allocation2 + $0x150] sm:$0xff]  ;;  %2401 = vmatpush.msra.mxu3 %v2128_v0  ;;  %v2074_v2 = vld [vmem:[#allocation2 + $0x28] sm:$0xff]  ;;  %v2145_v0 = vld [vmem:[#allocation2 + $0x260] sm:$0xff] }
 0x333   :  { %v1788_v1 = vsel %vm981_vm15, %v1787_v61, %v1782_v15  ;;  %v1789_v50 = vrot.slane %v1782_v15, 4  ;;  %v1754_v43 = vperm.slane %v1746_v22, %v3598_v16  ;;  %2358 = vmatpush.msra.mxu1 %v2093_v7  ;;  %v2090_v15 = vld [vmem:[#allocation2 + $0xa8] sm:$0xff]  ;;  %2341 = vmatpush.msra.mxu0 %v2074_v2  ;;  %v2103_v7 = vld [vmem:[#allocation2 + $0x110] sm:$0xff]  ;;  %v2161_v31 = vld [vmem:[#allocation2 + $0x2e0] sm:$0xff] }
 0x334   :  { %1801 = vst [vmem:[#allocation1 + $0x3] ss:$4 sm:$0xff] %v1788_v1  ;;  %v1744_v8 = vsel %vm981_vm15, %v1743_v40, %v1721_v32  ;;  %v2110_v61 = vld [vmem:[#allocation2 + $0x148] sm:$0xff]  ;;  %2402 = vmatpush.msra.mxu3 %v2127_v33  ;;  %v2073_v1 = vld [vmem:[#allocation2 + $0x20] sm:$0xff]  ;;  %v2144_v33 = vld [vmem:[#allocation2 + $0x258] sm:$0xff] }
 0x335   :  { %v1790_v44 = vsel %vm981_vm15, %v1786_v11, %v1789_v50  ;;  %v1750_v12 = vperm.slane %v1744_v8, %v3598_v16  ;;  %v1755_v45 = vrot.slane %v1754_v43, 4  ;;  %2359 = vmatpush.msra.mxu1 %v2092_v26  ;;  %v2091_v11 = vld [vmem:[#allocation2 + $0xb0] sm:$0xff]  ;;  %v2126_v22 = vld [vmem:[#allocation2 + $0x1c8] sm:$0xff]  ;;  %v2089_v50 = vld [vmem:[#allocation2 + $0xa0] sm:$0xff]  ;;  %2342 = vmatpush.msra.mxu0 %v2073_v1 }
 0x336   :  { %2403 = vmatpush.msra.mxu3 %v2126_v22  ;;  %v2125_v8 = vld [vmem:[#allocation2 + $0x1c0] sm:$0xff]  ;;  %v2102_v26 = vld [vmem:[#allocation2 + $0x108] sm:$0xff]  ;;  %v2160_v2 = vld [vmem:[#allocation2 + $0x2d8] sm:$0xff] }
 0x337   :  { %v1756_v47 = vsel %vm981_vm15, %v1755_v45, %v1750_v12  ;;  %v1757_v17 = vrot.slane %v1750_v12, 4  ;;  %2360 = vmatpush.msra.mxu1 %v2091_v11  ;;  %v2088_v12 = vld [vmem:[#allocation2 + $0x98] sm:$0xff]  ;;  %v2101_v11 = vld [vmem:[#allocation2 + $0x100] sm:$0xff] }
 0x338   :  { %1797 = vst [vmem:[#allocation1 + $0x1] ss:$4 sm:$0xff] %v1756_v47  ;;  %2404 = vmatpush.msra.mxu3 %v2125_v8  ;;  %v2196_v1 = vld [vmem:[#allocation2 + $0x3f8] sm:$0xff]  ;;  %v2179_v8 = vld [vmem:[#allocation2 + $0x370] sm:$0xff] }
 0x339   :  { %v1758_v30 = vsel %vm981_vm15, %v1754_v43, %v1757_v17  ;;  %2361 = vmatpush.msra.mxu1 %v2090_v15  ;;  %v2109_v43 = vld [vmem:[#allocation2 + $0x140] sm:$0xff]  ;;  %v2108_v17 = vld [vmem:[#allocation2 + $0x138] sm:$0xff] }
 0x33a   :  { %v2180_v15 = vld [vmem:[#allocation2 + $0x378] sm:$0xff] }
 0x33b   :  { %2362 = vmatpush.msra.mxu1 %v2089_v50  ;;  %v2143_v50 = vld [vmem:[#allocation2 + $0x250] sm:$0xff] }
 0x33d   :  { %2363 = vmatpush.msra.mxu1 %v2088_v12  ;;  %v2195_v12 = vld [vmem:[#allocation2 + $0x3f0] sm:$0xff] }
 0x33f   :  { %v3896_v28 = vld.sshfl [vmem:[#allocation1 + $0x18] sm:$0xff pattern:$0x73625140]  ;;  %v3898_v49 = vld.sshfl [vmem:[#allocation1 + $0x10] sm:$0xff pattern:$0x73625140]  ;;  %2364 = vmatpush.msra.mxu1 %v2087_v4 }
 0x340   :  { %1891 = vrot.lane.b32.xlu0 %v3896_v28, %s2861_s25  ;;  %1867 = vrot.lane.b32.xlu1 %v3896_v28, %s2860_s24  ;;  %v3904_v27 = vld.sshfl [vmem:[#allocation1 + $0x8] sm:$0xff pattern:$0x73625140]  ;;  %v3906_v52 = vld.sshfl [vmem:[#allocation1] sm:$0xff pattern:$0x73625140] }
 0x341   :  { %1835 = vrot.lane.b32.xlu2 %v3896_v28, %s2858_s22  ;;  %1814 = vst [vmem:[#allocation1] ss:$4 sm:$0xff] %v3851_v14  ;;  %2365 = vmatpush.msra.mxu1 %v2086_v63  ;;  %v2194_v4 = vld [vmem:[#allocation2 + $0x3e8] sm:$0xff]  ;;  %v2193_v63 = vld [vmem:[#allocation2 + $0x3e0] sm:$0xff] }
 0x342   :  { %1816 = vst [vmem:[#allocation1 + $0x1] ss:$4 sm:$0xff] %v1758_v30  ;;  %v2124_v30 = vld [vmem:[#allocation2 + $0x1b8] sm:$0xff] }
 0x343   :  { %1818 = vst [vmem:[#allocation1 + $0x2] ss:$4 sm:$0xff] %v1774_v3  ;;  %v2116_v3 = vld [vmem:[#allocation2 + $0x178] sm:$0xff]  ;;  %2405 = vmatpush.msra.mxu3 %v2124_v30  ;;  %2366 = vmatpush.msra.mxu1 %v2085_v42  ;;  %v2158_v30 = vld [vmem:[#allocation2 + $0x2c8] sm:$0xff] }
 0x344   :  { %1820 = vst [vmem:[#allocation1 + $0x3] ss:$4 sm:$0xff] %v1790_v44  ;;  %2377 = vmatpush.msra.mxu2 %v2116_v3  ;;  %v2072_v44 = vld [vmem:[#allocation2 + $0x18] sm:$0xff]  ;;  %v2105_v3 = vld [vmem:[#allocation2 + $0x120] sm:$0xff] }
 0x345   :  { %2343 = vmatpush.msra.mxu0 %v2072_v44  ;;  %2406 = vmatpush.msra.mxu3 %v2123_v46  ;;  %v2157_v46 = vld [vmem:[#allocation2 + $0x2c0] sm:$0xff]  ;;  %v2156_v42 = vld [vmem:[#allocation2 + $0x2b8] sm:$0xff] }
 0x346   :  { %2378 = vmatpush.msra.mxu2 %v2115_v29  ;;  %v2164_v29 = vld [vmem:[#allocation2 + $0x2f8] sm:$0xff] }
 0x347   :  { %2344 = vmatpush.msra.mxu0 %v2071_v35  ;;  %2407 = vmatpush.msra.mxu3 %v2122_v19  ;;  %v2178_v35 = vld [vmem:[#allocation2 + $0x368] sm:$0xff] }
 0x348   :  { %1833 = vrot.lane.b32.xlu1 %v3898_v49, %s2858_s22  ;;  %1831 = vrot.lane.b32.xlu0 %v3904_v27, %s2858_s22 }
 0x349   :  { %1829 = vrot.lane.b32.xlu2 %v3906_v52, %s2858_s22  ;;  %2379 = vmatpush.msra.mxu2 %v2114_v48  ;;  %v2120_v48 = vld [vmem:[#allocation2 + $0x198] sm:$0xff] }
 0x34a   :  { %2345 = vmatpush.msra.mxu0 %v2070_v20  ;;  %2408 = vmatpush.msra.mxu3 %v2121_v36  ;;  %v2177_v20 = vld [vmem:[#allocation2 + $0x360] sm:$0xff] }
 0x34b   :  { %v3929_v14 = vld.sshfl [vmem:[#allocation1] sm:$0xff pattern:$0x73625140]  ;;  %v3937_v55 = vld.sshfl [vmem:[#allocation1 + $0x18] sm:$0xff pattern:$0x73625140]  ;;  %2380 = vmatpush.msra.mxu2 %v2113_v62  ;;  %2443 = vmatpush.msrb.mxu1 %v2164_v29 }
 0x34c   :  { %v3945_v54 = vld.sshfl [vmem:[#allocation1 + $0x8] sm:$0xff pattern:$0x73625140]  ;;  %v3947_v6 = vld.sshfl [vmem:[#allocation1 + $0x10] sm:$0xff pattern:$0x73625140]  ;;  %2346 = vmatpush.msra.mxu0 %v2069_v51  ;;  %2409 = vmatpush.msra.mxu3 %v2120_v48 }
 0x34d   :  { %2381 = vmatpush.msra.mxu2 %v2112_v38  ;;  %v2119_v62 = vld [vmem:[#allocation2 + $0x190] sm:$0xff]  ;;  %2444 = vmatpush.msrb.mxu1 %v2163_v59  ;;  %v2118_v38 = vld [vmem:[#allocation2 + $0x188] sm:$0xff]  ;;  %v2140_v51 = vld [vmem:[#allocation2 + $0x238] sm:$0xff] }
 0x34e   :  { %2423 = vmatpush.msrb.mxu0 %v2148_v58  ;;  %2410 = vmatpush.msra.mxu3 %v2119_v62  ;;  %v2176_v58 = vld [vmem:[#allocation2 + $0x358] sm:$0xff]  ;;  %v2139_v48 = vld [vmem:[#allocation2 + $0x230] sm:$0xff] }
 0x34f   :  { %2382 = vmatpush.msra.mxu2 %v2111_v53  ;;  %2445 = vmatpush.msrb.mxu1 %v2162_v10  ;;  %v2117_v53 = vld [vmem:[#allocation2 + $0x180] sm:$0xff]  ;;  %v2192_v29 = vld [vmem:[#allocation2 + $0x3d8] sm:$0xff]  ;;  %v2175_v62 = vld [vmem:[#allocation2 + $0x350] sm:$0xff] }
 0x350   :  { %1863 = vrot.lane.b32.xlu1 %v3904_v27, %s2860_s24  ;;  %1861 = vrot.lane.b32.xlu0 %v3906_v52, %s2860_s24  ;;  %v2138_v10 = vld [vmem:[#allocation2 + $0x228] sm:$0xff] }
 0x351   :  { %1865 = vrot.lane.b32.xlu2 %v3898_v49, %s2860_s24  ;;  %2383 = vmatpush.msra.mxu2 %v2110_v61 }
 0x352   :  { %2424 = vmatpush.msrb.mxu0 %v2147_v39  ;;  %2411 = vmatpush.msra.mxu3 %v2118_v38  ;;  %v2155_v39 = vld [vmem:[#allocation2 + $0x2b0] sm:$0xff] }
 0x353   :  { %2384 = vmatpush.msra.mxu2 %v2109_v43  ;;  %2446 = vmatpush.msrb.mxu1 %v2161_v31  ;;  %v2159_v43 = vld [vmem:[#allocation2 + $0x2d0] sm:$0xff]  ;;  %v2190_v31 = vld [vmem:[#allocation2 + $0x3c8] sm:$0xff] }
 0x354   :  { %2425 = vmatpush.msrb.mxu0 %v2146_v18  ;;  %2412 = vmatpush.msra.mxu3 %v2117_v53  ;;  %v2191_v18 = vld [vmem:[#allocation2 + $0x3d0] sm:$0xff]  ;;  %v2153_v53 = vld [vmem:[#allocation2 + $0x2a0] sm:$0xff] }
 0x355   :  { %2385 = vmatpush.msra.mxu2 %v2108_v17  ;;  %2447 = vmatpush.msrb.mxu1 %v2160_v2  ;;  %v2142_v17 = vld [vmem:[#allocation2 + $0x248] sm:$0xff] }
 0x356   :  { %2426 = vmatpush.msrb.mxu0 %v2145_v0  ;;  %2489 = vmatpush.msrb.mxu3 %v2196_v1  ;;  %v2174_v0 = vld [vmem:[#allocation2 + $0x348] sm:$0xff]  ;;  %v2173_v1 = vld [vmem:[#allocation2 + $0x340] sm:$0xff] }
 0x357   :  { %2386 = vmatpush.msra.mxu2 %v2107_v34  ;;  %2448 = vmatpush.msrb.mxu1 %v2159_v43  ;;  %v2141_v34 = vld [vmem:[#allocation2 + $0x240] sm:$0xff]  ;;  %v2136_v43 = vld [vmem:[#allocation2 + $0x218] sm:$0xff] }
 0x358   :  { %1885 = vrot.lane.b32.xlu1 %v3906_v52, %s2861_s25  ;;  %1889 = vrot.lane.b32.xlu0 %v3898_v49, %s2861_s25 }
 0x359   :  { %1887 = vrot.lane.b32.xlu2 %v3904_v27, %s2861_s25  ;;  %2387 = vmatpush.msra.mxu2 %v2106_v21 }
 0x35a   :  { %2427 = vmatpush.msrb.mxu0 %v2144_v33  ;;  %2490 = vmatpush.msrb.mxu3 %v2195_v12 }
 0x35b   :  { %2388 = vmatpush.msra.mxu2 %v2105_v3  ;;  %2449 = vmatpush.msrb.mxu1 %v2158_v30  ;;  %v2172_v30 = vld [vmem:[#allocation2 + $0x338] sm:$0xff] }
 0x35c   :  { %2428 = vmatpush.msrb.mxu0 %v2143_v50  ;;  %2491 = vmatpush.msrb.mxu3 %v2194_v4  ;;  %v2189_v50 = vld [vmem:[#allocation2 + $0x3c0] sm:$0xff] }
 0x35d   :  { %2389 = vmatpush.msra.mxu2 %v2104_v13  ;;  %2450 = vmatpush.msrb.mxu1 %v2157_v46  ;;  %v2135_v46 = vld [vmem:[#allocation2 + $0x210] sm:$0xff] }
 0x35e   :  { %2429 = vmatpush.msrb.mxu0 %v2142_v17  ;;  %2492 = vmatpush.msrb.mxu3 %v2193_v63 }
 0x35f   :  { %2390 = vmatpush.msra.mxu2 %v2103_v7  ;;  %2451 = vmatpush.msrb.mxu1 %v2156_v42 }
 0x360   :  { %1893 = vrot.lane.b32.xlu1 %v3929_v14, %s2861_s25  ;;  %1837 = vrot.lane.b32.xlu0 %v3929_v14, %s2858_s22 }
 0x361   :  { %1869 = vrot.lane.b32.xlu2 %v3929_v14, %s2860_s24  ;;  %2391 = vmatpush.msra.mxu2 %v2102_v26  ;;  %v2154_v26 = vld [vmem:[#allocation2 + $0x2a8] sm:$0xff] }
 0x362   :  { %2430 = vmatpush.msrb.mxu0 %v2141_v34  ;;  %2493 = vmatpush.msrb.mxu3 %v2192_v29  ;;  %v2188_v34 = vld [vmem:[#allocation2 + $0x3b8] sm:$0xff]  ;;  %v2134_v29 = vld [vmem:[#allocation2 + $0x208] sm:$0xff] }
 0x363   :  { %2392 = vmatpush.msra.mxu2 %v2101_v11  ;;  %2452 = vmatpush.msrb.mxu1 %v2155_v39  ;;  %v2170_v39 = vld [vmem:[#allocation2 + $0x328] sm:$0xff] }
 0x364   :  { %2431 = vmatpush.msrb.mxu0 %v2140_v51  ;;  %2494 = vmatpush.msrb.mxu3 %v2191_v18  ;;  %v2171_v51 = vld [vmem:[#allocation2 + $0x330] sm:$0xff]  ;;  %v2149_v18 = vld [vmem:[#allocation2 + $0x280] sm:$0xff] }
 0x365   :  { %2469 = vmatpush.msrb.mxu2 %v2180_v15  ;;  %2453 = vmatpush.msrb.mxu1 %v2154_v26 }
 0x366   :  { %2432 = vmatpush.msrb.mxu0 %v2139_v48  ;;  %2495 = vmatpush.msrb.mxu3 %v2190_v31 }
 0x367   :  { %2470 = vmatpush.msrb.mxu2 %v2179_v8  ;;  %2454 = vmatpush.msrb.mxu1 %v2153_v53 }
 0x368   :  { %1899 = vrot.lane.b32.xlu1 %v3937_v55, %s2861_s25  ;;  %1875 = vrot.lane.b32.xlu0 %v3937_v55, %s2860_s24 }
 0x369   :  { %1843 = vrot.lane.b32.xlu2 %v3937_v55, %s2858_s22  ;;  %2471 = vmatpush.msrb.mxu2 %v2178_v35 }
 0x36a   :  { %2433 = vmatpush.msrb.mxu0 %v2138_v10  ;;  %2496 = vmatpush.msrb.mxu3 %v2189_v50  ;;  %v2169_v10 = vld [vmem:[#allocation2 + $0x320] sm:$0xff] }
 0x36b   :  { %2472 = vmatpush.msrb.mxu2 %v2177_v20 }
 0x36c   :  { %2497 = vmatpush.msrb.mxu3 %v2188_v34 }
 0x36d   :  { %2473 = vmatpush.msrb.mxu2 %v2176_v58 }
 0x36f   :  { %2474 = vmatpush.msrb.mxu2 %v2175_v62 }
 0x370   :  { %1871 = vrot.lane.b32.xlu1 %v3945_v54, %s2860_s24  ;;  %1841 = vrot.lane.b32.xlu0 %v3947_v6, %s2858_s22 }
 0x371   :  { %1839 = vrot.lane.b32.xlu2 %v3945_v54, %s2858_s22  ;;  %2475 = vmatpush.msrb.mxu2 %v2174_v0  ;;  %s2866_s22 = smov [#allocation5]  }
 0x373   :  { %2476 = vmatpush.msrb.mxu2 %v2173_v1  ;;  %v2168_v1 = vld [vmem:[#allocation2 + $0x318] sm:$0xff] }
 0x375   :  { %2477 = vmatpush.msrb.mxu2 %v2172_v30  ;;  %v2166_v30 = vld [vmem:[#allocation2 + $0x308] sm:$0xff] }
 0x377   :  { %2478 = vmatpush.msrb.mxu2 %v2171_v51  ;;  %v2181_v51 = vld [vmem:[#allocation2 + $0x380] sm:$0xff] }
 0x378   :  { %1897 = vrot.lane.b32.xlu1 %v3947_v6, %s2861_s25  ;;  %1895 = vrot.lane.b32.xlu0 %v3945_v54, %s2861_s25 }
 0x379   :  { %1873 = vrot.lane.b32.xlu2 %v3947_v6, %s2860_s24  ;;  %2479 = vmatpush.msrb.mxu2 %v2170_v39  ;;  %s2719_s24 = sshll.u32 %s2866_s22, 4  ;;  %s2720_s24 = int_to_ptr.vmem [resolvable:$true] %s2719_s24 }
 0x37b   :  { %2480 = vmatpush.msrb.mxu2 %v2169_v10 }
 0x37d   :  { %2481 = vmatpush.msrb.mxu2 %v2168_v1 }
 0x39b   :  { %v3961_v37 = vpop.permute.xlu2 %1835 }
 0x3a3   :  { %v3963_v5 = vpop.permute.xlu2 %1829 }
 0x3ab   :  { %v3969_v41 = vpop.permute.xlu2 %1865 }
 0x3b2   :  { %v3965_v56 = vpop.permute.xlu0 %1891  ;;  %v3967_v57 = vpop.permute.xlu1 %1867 }
 0x3b3   :  { %v3975_v40 = vpop.permute.xlu2 %1887  ;;  %v1881_v33 = vsel %vm487_vm5, %v3969_v41, %v3967_v57 }
 0x3ba   :  { %v3971_v32 = vpop.permute.xlu1 %1833  ;;  %v3973_v25 = vpop.permute.xlu0 %1831 }
 0x3bb   :  { %v3981_v24 = vpop.permute.xlu2 %1869  ;;  %v4050_v35 = vsel %vm359_vm2, %v3963_v5, %v3973_v25 }
 0x3bc   :  { %v1880_v13 = vsel %vm487_vm5, %v3967_v57, %v3981_v24  ;;  %v1850_v57 = vsel %vm359_vm2, %v3973_v25, %v3971_v32 }
 0x3bd   :  { %v1854_v25 = vmax.f32 %v3904_v27, %v1850_v57  ;;  %v2150_v27 = vld [vmem:[#allocation2 + $0x288] sm:$0xff] }
 0x3c2   :  { %v3977_v45 = vpop.permute.xlu1 %1863  ;;  %v3979_v47 = vpop.permute.xlu0 %1861 }
 0x3c3   :  { %v3991_v44 = vpop.permute.xlu2 %1843 }
 0x3c4   :  { %v1852_v63 = vsel %vm359_vm2, %v3991_v44, %v3963_v5  ;;  %v1853_v5 = vmax.f32 %v3906_v52, %v4050_v35  ;;  %v2186_v52 = vld [vmem:[#allocation2 + $0x3a8] sm:$0xff] }
 0x3ca   :  { %v3983_v60 = vpop.permute.xlu1 %1885  ;;  %v3985_v23 = vpop.permute.xlu0 %1889 }
 0x3cb   :  { %v4010_v38 = vpop.permute.xlu2 %1839  ;;  %v1905_v11 = vsel %vm551_vm0, %v3985_v23, %v3965_v56  ;;  %v1906_v2 = vsel %vm551_vm0, %v3975_v40, %v3985_v23  ;;  %v1882_v23 = vsel %vm487_vm5, %v3977_v45, %v3969_v41  ;;  %v2152_v41 = vld [vmem:[#allocation2 + $0x298] sm:$0xff]  ;;  %v1907_v42 = vsel %vm551_vm0, %v3983_v60, %v3975_v40 }
 0x3cc   :  { %v1911_v8 = vmax.f32 %v1881_v33, %v1905_v11  ;;  %v1910_v4 = vmax.f32 %v1882_v23, %v1906_v2  ;;  %2455 = vmatpush.msrb.mxu1 %v2152_v41  ;;  %v1860_v40 = vmax.f32 %v3937_v55, %v1852_v63  ;;  %v2185_v11 = vld [vmem:[#allocation2 + $0x3a0] sm:$0xff] }
 0x3cd   :  { %v2165_v63 = vld [vmem:[#allocation2 + $0x300] sm:$0xff] }
 0x3d2   :  { %v3987_v61 = vpop.permute.xlu1 %1893  ;;  %v3989_v22 = vpop.permute.xlu0 %1837 }
 0x3d3   :  { %v1904_v21 = vsel %vm551_vm0, %v3965_v56, %v3987_v61  ;;  %v1848_v19 = vsel %vm359_vm2, %v3961_v37, %v3989_v22  ;;  %v1849_v56 = vsel %vm359_vm2, %v3971_v32, %v3961_v37 }
 0x3d4   :  { %v1912_v59 = vmax.f32 %v1880_v13, %v1904_v21  ;;  %v1856_v7 = vmax.f32 %v3896_v28, %v1848_v19  ;;  %v2137_v28 = vld [vmem:[#allocation2 + $0x220] sm:$0xff]  ;;  %v1855_v20 = vmax.f32 %v3898_v49, %v1849_v56  ;;  %v2151_v19 = vld [vmem:[#allocation2 + $0x290] sm:$0xff]  ;;  %v1883_v13 = vsel %vm487_vm5, %v3979_v47, %v3977_v45  ;;  %v1874_v45 = vpop.permute.xlu2 %1873 }
 0x3d5   :  { %2434 = vmatpush.msrb.mxu0 %v2137_v28  ;;  %v2187_v49 = vld [vmem:[#allocation2 + $0x3b0] sm:$0xff]  ;;  %2456 = vmatpush.msrb.mxu1 %v2151_v19  ;;  %v1909_v62 = vmax.f32 %v1883_v13, %v1907_v42 }
 0x3d6   :  { %v4024_v15 = vmax.f32 %v1856_v7, %v1912_v59  ;;  %v4069_v48 = vmax.f32 %v1855_v20, %v1911_v8  ;;  %v2133_v7 = vld [vmem:[#allocation2 + $0x200] sm:$0xff]  ;;  %2498 = vmatpush.msrb.mxu3 %v2187_v49 }
 0x3d7   :  { %2435 = vmatpush.msrb.mxu0 %v2136_v43  ;;  %2457 = vmatpush.msrb.mxu1 %v2150_v27 }
 0x3d8   :  { %v1934_v21 = vrot.slane %v4024_v15, 4  ;;  %2499 = vmatpush.msrb.mxu3 %v2186_v52 }
 0x3d9   :  { %2436 = vmatpush.msrb.mxu0 %v2135_v46  ;;  %2458 = vmatpush.msrb.mxu1 %v2149_v18 }
 0x3da   :  { %v4001_v3 = vpop.permute.xlu1 %1899  ;;  %v4003_v36 = vpop.permute.xlu0 %1875  ;;  %v1940_v55 = vsel %vm695_vm4, %v4069_v48, %v1934_v21  ;;  %2500 = vmatpush.msrb.mxu3 %v2185_v11  ;;  %v1941_v18 = vsel %vm695_vm4, %v1934_v21, %v4069_v48  ;;  %v2212_v48 = vld [vmem:[#allocation2 + $0x478] sm:$0xff] }
 0x3db   :  { %v1908_v37 = vsel %vm551_vm0, %v4001_v3, %v3983_v60  ;;  %v1884_v32 = vsel %vm487_vm5, %v4003_v36, %v3979_v47  ;;  %v4072_v60 = vmax.f32 %v1854_v25, %v1910_v4  ;;  %v1847_v47 = vsel %vm359_vm2, %v3989_v22, %v4010_v38  ;;  %2437 = vmatpush.msrb.mxu0 %v2134_v29 }
 0x3dc   :  { %v1916_v58 = vmax.f32 %v1884_v32, %v1908_v37  ;;  %v1877_v26 = vsel %vm487_vm5, %v1874_v45, %v4003_v36  ;;  %v2865_v22 = vmov 1983009808   ;;  %v2167_v37 = vld [vmem:[#allocation2 + $0x310] sm:$0xff]  ;;  %v1917_v32 = vmax.f32 %v1853_v5, %v1909_v62 }
 0x3dd   :  { %2438 = vmatpush.msrb.mxu0 %v2133_v7  ;;  %v1971_v35 = vrot.slane %v1940_v55, 4  ;;  %2482 = vmatpush.msrb.mxu2 %v2167_v37 }
 0x3de   :  { %v4088_v0 = vmax.f32 %v1860_v40, %v1916_v58 }
 0x3df   :  { %2483 = vmatpush.msrb.mxu2 %v2166_v30 }
 0x3e0   :  { %v1936_v9 = vrot.slane %v4088_v0, 4  ;;  %v1942_v0 = vrot.slane %v1941_v18, 4  ;;  %v2257_v18 = vld [vmem:[#allocation2 + $0x5e0] sm:$0xff] }
 0x3e1   :  { %2484 = vmatpush.msrb.mxu2 %v2165_v63 }
 0x3e2   :  { %v1872_v12 = vpop.permute.xlu1 %1871  ;;  %v1842_v17 = vpop.permute.xlu0 %1841  ;;  %v2027_v15 = vrot.slane %v1942_v0, 4 }
 0x3e3   :  { %v1846_v59 = vsel %vm359_vm2, %v4010_v38, %v1842_v17  ;;  %v1845_v31 = vsel %vm359_vm2, %v1842_v17, %v3991_v44  ;;  %v1962_v38 = vunpack.c.l.s4 %v2865_v22  ;;  %v1878_v28 = vsel %vm487_vm5, %v1872_v12, %v1874_v45 }
 0x3e4   :  { %v1879_v53 = vsel %vm487_vm5, %v3981_v24, %v1872_v12  ;;  %v1858_v36 = vmax.f32 %v3945_v54, %v1846_v59  ;;  %v1933_v44 = vrot.slane %v4072_v60, 4  ;;  %v2184_v54 = vld [vmem:[#allocation2 + $0x398] sm:$0xff]  ;;  %v1859_v23 = vmax.f32 %v3947_v6, %v1845_v31  ;;  %v2182_v6 = vld [vmem:[#allocation2 + $0x388] sm:$0xff] }
 0x3e5   :  { %v4109_v12 = vunpack.c.0.s8 %v1962_v38  ;;  %v1857_v17 = vmax.f32 %v3929_v14, %v1847_v47  ;;  %2501 = vmatpush.msrb.mxu3 %v2184_v54 }
 0x3e6   :  { %v1937_v4 = vsel %vm695_vm4, %v1917_v32, %v1933_v44  ;;  %v1938_v22 = vsel %vm695_vm4, %v1933_v44, %v1917_v32 }
 0x3e7   :  { %v1959_v58 = vrot.slane %v1937_v4, 4 }
 0x3ea   :  { %v1898_v33 = vpop.permute.xlu1 %1897  ;;  %v1896_v2 = vpop.permute.xlu0 %1895 }
 0x3eb   :  { %v1901_v56 = vsel %vm551_vm0, %v1898_v33, %v4001_v3  ;;  %v1902_v57 = vsel %vm551_vm0, %v1896_v2, %v1898_v33  ;;  %v1903_v24 = vsel %vm551_vm0, %v3987_v61, %v1896_v2  ;;  %v2183_v3 = vld [vmem:[#allocation2 + $0x390] sm:$0xff]  ;;  %v2228_v33 = vld [vmem:[#allocation2 + $0x4f8] sm:$0xff] }
 0x3ec   :  { %v1915_v50 = vmax.f32 %v1877_v26, %v1901_v56  ;;  %v1913_v43 = vmax.f32 %v1879_v53, %v1903_v24  ;;  %v1914_v8 = vmax.f32 %v1878_v28, %v1902_v57  ;;  %2502 = vmatpush.msrb.mxu3 %v2183_v3  ;;  %v2211_v57 = vld [vmem:[#allocation2 + $0x470] sm:$0xff] }
 0x3ed   :  { %v2227_v24 = vld [vmem:[#allocation2 + $0x4f0] sm:$0xff] }
 0x3ee   :  { %v1923_v61 = vmax.f32 %v1859_v23, %v1915_v50  ;;  %v1922_v41 = vmax.f32 %v1858_v36, %v1914_v8  ;;  %v1921_v46 = vmax.f32 %v1857_v17, %v1913_v43  ;;  %2503 = vmatpush.msrb.mxu3 %v2182_v6  ;;  %v1939_v36 = vrot.slane %v1938_v22, 4  ;;  %v2210_v43 = vld [vmem:[#allocation2 + $0x468] sm:$0xff]  ;;  %v2208_v6 = vld [vmem:[#allocation2 + $0x458] sm:$0xff] }
 0x3ef   :  { %v2226_v8 = vld [vmem:[#allocation2 + $0x4e8] sm:$0xff] }
 0x3f0   :  { %v1946_v34 = vsel %vm695_vm4, %v1923_v61, %v1936_v9  ;;  %v1935_v20 = vrot.slane %v1922_v41, 4  ;;  %2504 = vmatpush.msrb.mxu3 %v2181_v51  ;;  %v1947_v31 = vsel %vm695_vm4, %v1936_v9, %v1923_v61  ;;  %v2015_v37 = vrot.slane %v1939_v36, 4  ;;  %v2209_v9 = vld [vmem:[#allocation2 + $0x460] sm:$0xff] }
 0x3f1   :  { %v1969_v14 = vrot.slane %v1946_v34, 4  ;;  %v1972_v19 = vsel %vm981_vm15, %v1946_v34, %v1971_v35  ;;  %v1948_v53 = vrot.slane %v1947_v31, 4  ;;  %v2225_v61 = vld [vmem:[#allocation2 + $0x4e0] sm:$0xff]  ;;  %v2244_v34 = vld [vmem:[#allocation2 + $0x578] sm:$0xff] }
 0x3f2   :  { %v1980_v25 = vperm.slane %v1972_v19, %v4109_v12  ;;  %v1943_v42 = vsel %vm695_vm4, %v1921_v46, %v1935_v20  ;;  %v1944_v21 = vsel %vm695_vm4, %v1935_v20, %v1921_v46  ;;  %v2260_v46 = vld [vmem:[#allocation2 + $0x5f8] sm:$0xff] }
 0x3f3   :  { %v1970_v49 = vsel %vm981_vm15, %v1969_v14, %v1940_v55  ;;  %v1957_v5 = vrot.slane %v1943_v42, 4  ;;  %v1960_v27 = vsel %vm981_vm15, %v1943_v42, %v1959_v58  ;;  %v2025_v54 = vrot.slane %v1948_v53, 4  ;;  %v2207_v42 = vld [vmem:[#allocation2 + $0x450] sm:$0xff] }
 0x3f4   :  { %v1976_v29 = vperm.slane %v1970_v49, %v4109_v12  ;;  %v1993_v13 = vrot.slane %v1980_v25, 4  ;;  %v1968_v52 = vperm.slane %v1960_v27, %v4109_v12  ;;  %v2028_v23 = vsel %vm981_vm15, %v1948_v53, %v2027_v15  ;;  %v2223_v58 = vld [vmem:[#allocation2 + $0x4d0] sm:$0xff]  ;;  %v2222_v27 = vld [vmem:[#allocation2 + $0x4c8] sm:$0xff] }
 0x3f5   :  { %v1958_v40 = vsel %vm981_vm15, %v1957_v5, %v1937_v4  ;;  %v1945_v50 = vrot.slane %v1944_v21, 4  ;;  %v4150_v17 = vperm.slane %v2028_v23, %v4109_v12  ;;  %v2026_v41 = vsel %vm981_vm15, %v2025_v54, %v1942_v0  ;;  %v2224_v4 = vld [vmem:[#allocation2 + $0x4d8] sm:$0xff]  ;;  %v2259_v5 = vld [vmem:[#allocation2 + $0x5f0] sm:$0xff]  ;;  %v2253_v54 = vld [vmem:[#allocation2 + $0x5c0] sm:$0xff] }
 0x3f6   :  { %v1981_v39 = vrot.slane %v1976_v29, 4  ;;  %v1964_v59 = vperm.slane %v1958_v40, %v4109_v12  ;;  %v1994_v62 = vsel %vm981_vm15, %v1993_v13, %v1968_v52  ;;  %v1995_v26 = vrot.slane %v1968_v52, 4  ;;  %v2206_v13 = vld [vmem:[#allocation2 + $0x448] sm:$0xff]  ;;  %v2203_v53 = vld [vmem:[#allocation2 + $0x430] sm:$0xff] }
 0x3f7   :  { %v2000_v47 = vperm.slane %v1994_v62, %v3598_v16  ;;  %v2013_v30 = vrot.slane %v1945_v50, 4  ;;  %v2016_v35 = vsel %vm981_vm15, %v1945_v50, %v2015_v37  ;;  %v4156_v19 = vperm.slane %v2026_v41, %v4109_v12  ;;  %v2242_v40 = vld [vmem:[#allocation2 + $0x568] sm:$0xff]  ;;  %v2239_v15 = vld [vmem:[#allocation2 + $0x550] sm:$0xff]  ;;  %v2200_v37 = vld [vmem:[#allocation2 + $0x418] sm:$0xff] }
 0x3f8   :  { %v1982_v7 = vsel %vm981_vm15, %v1981_v39, %v1964_v59  ;;  %v1983_v11 = vrot.slane %v1964_v59, 4  ;;  %v1996_v28 = vsel %vm981_vm15, %v1980_v25, %v1995_v26  ;;  %v2049_v51 = vrot.slane %v4150_v17, 4  ;;  %v2258_v59 = vld [vmem:[#allocation2 + $0x5e8] sm:$0xff]  ;;  %v2220_v26 = vld [vmem:[#allocation2 + $0x4b8] sm:$0xff]  ;;  %v2255_v21 = vld [vmem:[#allocation2 + $0x5d0] sm:$0xff] }
 0x3f9   :  { %v1988_v45 = vperm.slane %v1982_v7, %v3598_v16  ;;  %v2005_v55 = vrot.slane %v2000_v47, 4  ;;  %v4142_v2 = vperm.slane %v1996_v28, %v3598_v16  ;;  %v4160_v25 = vperm.slane %v2016_v35, %v4109_v12  ;;  %v2256_v28 = vld [vmem:[#allocation2 + $0x5d8] sm:$0xff]  ;;  %v2215_v41 = vld [vmem:[#allocation2 + $0x490] sm:$0xff] }
 0x3fa   :  { %v1984_v44 = vsel %vm981_vm15, %v1976_v29, %v1983_v11  ;;  %v2014_v49 = vsel %vm981_vm15, %v2013_v30, %v1939_v36  ;;  %v2243_v29 = vld [vmem:[#allocation2 + $0x570] sm:$0xff]  ;;  %v2037_v52 = vrot.slane %v4156_v19, 4  ;;  %v2240_v11 = vld [vmem:[#allocation2 + $0x558] sm:$0xff] }
 0x3fb   :  { %v2006_v10 = vsel %vm981_vm15, %v2005_v55, %v1988_v45  ;;  %v2007_v38 = vrot.slane %v1988_v45, 4  ;;  %v1992_v32 = vperm.slane %v1984_v44, %v3598_v16  ;;  %v2009_v3 = vrot.slane %v4142_v2, 4  ;;  %v2205_v45 = vld [vmem:[#allocation2 + $0x440] sm:$0xff]  ;;  %v2219_v36 = vld [vmem:[#allocation2 + $0x4b0] sm:$0xff] }
 0x3fc   :  { %2326 = vst [vmem:[#allocation1] ss:$2 sm:$0xff] %v2006_v10  ;;  %v4165_v7 = vperm.slane %v2014_v49, %v4109_v12  ;;  %v2050_v62 = vsel %vm981_vm15, %v2049_v51, %v4160_v25  ;;  %v2241_v55 = vld [vmem:[#allocation2 + $0x560] sm:$0xff]  ;;  %v2204_v10 = vld [vmem:[#allocation2 + $0x438] sm:$0xff]  ;;  %v2235_v35 = vld [vmem:[#allocation2 + $0x530] sm:$0xff] }
 0x3fd   :  { %v2008_v1 = vsel %vm981_vm15, %v2000_v47, %v2007_v38  ;;  %v2010_v20 = vsel %vm981_vm15, %v2009_v3, %v1992_v32  ;;  %v2011_v39 = vrot.slane %v1992_v32, 4  ;;  %v2221_v47 = vld [vmem:[#allocation2 + $0x4c0] sm:$0xff]  ;;  %v4172_v12 = vperm.slane %v2050_v62, %v3598_v16  ;;  %v2216_v32 = vld [vmem:[#allocation2 + $0x498] sm:$0xff]  ;;  %v2275_v62 = vld [vmem:[#allocation2 + $0x670] sm:$0xff] }
 0x3fe   :  { %v2038_v38 = vsel %vm981_vm15, %v2037_v52, %v4165_v7  ;;  %v2201_v44 = vld [vmem:[#allocation2 + $0x420] sm:$0xff]  ;;  %v2236_v3 = vld [vmem:[#allocation2 + $0x538] sm:$0xff] }
 0x3ff   :  { %v2012_v0 = vsel %vm981_vm15, %v4142_v2, %v2011_v39  ;;  %v2202_v2 = vld [vmem:[#allocation2 + $0x428] sm:$0xff]  ;;  %v2197_v51 = vld [vmem:[#allocation2 + $0x400] sm:$0xff]  ;;  %v2292_v39 = vld [vmem:[#allocation2 + $0x6f8] sm:$0xff] }
 0x403   :  { %v2327_v56 = vld.sshfl [vmem:[#allocation1] sm:$0xff pattern:$0x75316420]  ;;  %v2328_v60 = vld.sshfl [vmem:[#allocation1 + $0x8] sm:$0xff pattern:$0x75316420] }
 0x404   :  { %2347 = vmatmul.f32.vlgmr.msra.gmra.mxu0 %v2327_v56  ;;  %2367 = vmatmul.f32.vlgmr.msra.gmra.mxu1 %v2328_v60  ;;  %2372 = vst [vmem:[#allocation1] ss:$2 sm:$0xff] %v2008_v1  ;;  %v2218_v1 = vld [vmem:[#allocation2 + $0x4a8] sm:$0xff] }
 0x405   :  { %2515 = vmatpush.msra.mxu0 %v2212_v48  ;;  %2535 = vmatpush.msra.mxu1 %v2228_v33  ;;  %v2044_v48 = vperm.slane %v2038_v38, %v3598_v16  ;;  %v2061_v33 = vrot.slane %v4172_v12, 4  ;;  %v2238_v56 = vld [vmem:[#allocation2 + $0x548] sm:$0xff]  ;;  %v2229_v38 = vld [vmem:[#allocation2 + $0x500] sm:$0xff] }
 0x406   :  { %v2254_v60 = vld [vmem:[#allocation2 + $0x5c8] sm:$0xff] }
 0x407   :  { %2516 = vmatpush.msra.mxu0 %v2211_v57  ;;  %2536 = vmatpush.msra.mxu1 %v2227_v24  ;;  %v2217_v57 = vld [vmem:[#allocation2 + $0x4a0] sm:$0xff]  ;;  %v2062_v23 = vsel %vm981_vm15, %v2061_v33, %v2044_v48  ;;  %v2063_v30 = vrot.slane %v2044_v48, 4  ;;  %v2271_v48 = vld [vmem:[#allocation2 + $0x650] sm:$0xff] }
 0x408   :  { %v2237_v24 = vld [vmem:[#allocation2 + $0x540] sm:$0xff]  ;;  %v2287_v33 = vld [vmem:[#allocation2 + $0x6d0] sm:$0xff] }
 0x409   :  { %2517 = vmatpush.msra.mxu0 %v2210_v43  ;;  %2537 = vmatpush.msra.mxu1 %v2226_v8  ;;  %v2051_v8 = vrot.slane %v4160_v25, 4  ;;  %v2213_v25 = vld [vmem:[#allocation2 + $0x480] sm:$0xff] }
 0x40b   :  { %2518 = vmatpush.msra.mxu0 %v2209_v9  ;;  %2538 = vmatpush.msra.mxu1 %v2225_v61  ;;  %v2373_v63 = vld.sshfl [vmem:[#allocation1] sm:$0xff pattern:$0x75316420]  ;;  %v2374_v14 = vld.sshfl [vmem:[#allocation1 + $0x8] sm:$0xff pattern:$0x75316420] }
 0x40c   :  { %2393 = vmatmul.f32.vlgmr.msra.gmra.mxu2 %v2373_v63  ;;  %2413 = vmatmul.f32.vlgmr.msra.gmra.mxu3 %v2374_v14  ;;  %2418 = vst [vmem:[#allocation1] ss:$2 sm:$0xff] %v2010_v20  ;;  %v2252_v9 = vld [vmem:[#allocation2 + $0x5b8] sm:$0xff]  ;;  %v2199_v61 = vld [vmem:[#allocation2 + $0x410] sm:$0xff]  ;;  %v2214_v20 = vld [vmem:[#allocation2 + $0x488] sm:$0xff] }
 0x40d   :  { %2519 = vmatpush.msra.mxu0 %v2208_v6  ;;  %2539 = vmatpush.msra.mxu1 %v2224_v4  ;;  %v2251_v6 = vld [vmem:[#allocation2 + $0x5b0] sm:$0xff]  ;;  %v2039_v4 = vrot.slane %v4165_v7, 4  ;;  %v2234_v63 = vld [vmem:[#allocation2 + $0x528] sm:$0xff] }
 0x40e   :  { %2561 = vmatpush.msra.mxu2 %v2244_v34  ;;  %2581 = vmatpush.msra.mxu3 %v2260_v46  ;;  %v2052_v34 = vsel %vm981_vm15, %v4150_v17, %v2051_v8  ;;  %v2198_v46 = vld [vmem:[#allocation2 + $0x408] sm:$0xff]  ;;  %v2064_v17 = vsel %vm981_vm15, %v4172_v12, %v2063_v30  ;;  %v2305_v8 = vld [vmem:[#allocation2 + $0x760] sm:$0xff]  ;;  %v2283_v30 = vld [vmem:[#allocation2 + $0x6b0] sm:$0xff] }
 0x40f   :  { %2520 = vmatpush.msra.mxu0 %v2207_v42  ;;  %2540 = vmatpush.msra.mxu1 %v2223_v58  ;;  %v2250_v14 = vld [vmem:[#allocation2 + $0x5a8] sm:$0xff]  ;;  %v2233_v42 = vld [vmem:[#allocation2 + $0x520] sm:$0xff]  ;;  %v4184_v49 = vperm.slane %v2052_v34, %v3598_v16 }
 0x410   :  { %2562 = vmatpush.msra.mxu2 %v2243_v29  ;;  %2582 = vmatpush.msra.mxu3 %v2259_v5  ;;  %v2249_v58 = vld [vmem:[#allocation2 + $0x5a0] sm:$0xff]  ;;  %v2282_v34 = vld [vmem:[#allocation2 + $0x6a8] sm:$0xff] }
 0x411   :  { %2521 = vmatpush.msra.mxu0 %v2206_v13  ;;  %2541 = vmatpush.msra.mxu1 %v2222_v27  ;;  %v2040_v13 = vsel %vm981_vm15, %v4156_v19, %v2039_v4  ;;  %v2276_v27 = vld [vmem:[#allocation2 + $0x678] sm:$0xff]  ;;  %v2065_v7 = vrot.slane %v4184_v49, 4  ;;  %v2231_v19 = vld [vmem:[#allocation2 + $0x510] sm:$0xff]  ;;  %v2266_v4 = vld [vmem:[#allocation2 + $0x628] sm:$0xff] }
 0x412   :  { %2563 = vmatpush.msra.mxu2 %v2242_v40  ;;  %2583 = vmatpush.msra.mxu3 %v2258_v59  ;;  %v2232_v40 = vld [vmem:[#allocation2 + $0x518] sm:$0xff]  ;;  %v2048_v52 = vperm.slane %v2040_v13, %v3598_v16  ;;  %v2289_v16 = vld [vmem:[#allocation2 + $0x6e0] sm:$0xff]  ;;  %v2299_v13 = vld [vmem:[#allocation2 + $0x730] sm:$0xff] }
 0x413   :  { %2522 = vmatpush.msra.mxu0 %v2205_v45  ;;  %2542 = vmatpush.msra.mxu1 %v2221_v47  ;;  %v2419_v31 = vld.sshfl [vmem:[#allocation1] sm:$0xff pattern:$0x75316420]  ;;  %v2420_v22 = vld.sshfl [vmem:[#allocation1 + $0x8] sm:$0xff pattern:$0x75316420] }
 0x414   :  { %2564 = vmatpush.msra.mxu2 %v2241_v55  ;;  %2584 = vmatpush.msra.mxu3 %v2257_v18  ;;  %2464 = vst [vmem:[#allocation1] ss:$2 sm:$0xff] %v2012_v0  ;;  %v2248_v59 = vld [vmem:[#allocation2 + $0x598] sm:$0xff]  ;;  %v2291_v45 = vld [vmem:[#allocation2 + $0x6f0] sm:$0xff]  ;;  %v2274_v55 = vld [vmem:[#allocation2 + $0x668] sm:$0xff]  ;;  %v2066_v12 = vsel %vm981_vm15, %v2065_v7, %v2048_v52 }
 0x415   :  { %2439 = vmatmul.f32.vlgmr.msrb.gmra.mxu0 %v2419_v31  ;;  %2459 = vmatmul.f32.vlgmr.msrb.gmra.mxu1 %v2420_v22  ;;  %v2247_v47 = vld [vmem:[#allocation2 + $0x590] sm:$0xff]  ;;  %v2290_v18 = vld [vmem:[#allocation2 + $0x6e8] sm:$0xff]  ;;  %v2273_v0 = vld [vmem:[#allocation2 + $0x660] sm:$0xff] }
 0x416   :  { %2523 = vmatpush.msra.mxu0 %v2204_v10  ;;  %2543 = vmatpush.msra.mxu1 %v2220_v26  ;;  %v2230_v10 = vld [vmem:[#allocation2 + $0x508] sm:$0xff]  ;;  %v2261_v7 = vld [vmem:[#allocation2 + $0x600] sm:$0xff] }
 0x417   :  { %2565 = vmatpush.msra.mxu2 %v2240_v11  ;;  %2585 = vmatpush.msra.mxu3 %v2256_v28  ;;  %v2246_v26 = vld [vmem:[#allocation2 + $0x588] sm:$0xff]  ;;  %v2245_v11 = vld [vmem:[#allocation2 + $0x580] sm:$0xff]  ;;  %v2272_v28 = vld [vmem:[#allocation2 + $0x658] sm:$0xff] }
 0x418   :  { %2524 = vmatpush.msra.mxu0 %v2203_v53  ;;  %2544 = vmatpush.msra.mxu1 %v2219_v36  ;;  %v2288_v53 = vld [vmem:[#allocation2 + $0x6d8] sm:$0xff] }
 0x419   :  { %2566 = vmatpush.msra.mxu2 %v2239_v15  ;;  %2586 = vmatpush.msra.mxu3 %v2255_v21  ;;  %v2308_v36 = vld [vmem:[#allocation2 + $0x778] sm:$0xff]  ;;  %v2067_v21 = vrot.slane %v2048_v52, 4  ;;  %v2314_v52 = vld [vmem:[#allocation2 + $0x7a8] sm:$0xff] }
 0x41a   :  { %2525 = vmatpush.msra.mxu0 %v2202_v2  ;;  %2545 = vmatpush.msra.mxu1 %v2218_v1  ;;  %v2324_v15 = vld [vmem:[#allocation2 + $0x7f8] sm:$0xff]  ;;  %v2307_v2 = vld [vmem:[#allocation2 + $0x770] sm:$0xff] }
 0x41b   :  { %2567 = vmatpush.msra.mxu2 %v2238_v56  ;;  %2587 = vmatpush.msra.mxu3 %v2254_v60  ;;  %v2465_v50 = vld.sshfl [vmem:[#allocation1] sm:$0xff pattern:$0x75316420]  ;;  %v2466_v43 = vld.sshfl [vmem:[#allocation1 + $0x8] sm:$0xff pattern:$0x75316420] }
 0x41c   :  { %2526 = vmatpush.msra.mxu0 %v2201_v44  ;;  %2546 = vmatpush.msra.mxu1 %v2217_v57  ;;  %2510 = vst [vmem:[#allocation1] ss:$2 sm:$0xff] %v2062_v23  ;;  %v2323_v1 = vld [vmem:[#allocation2 + $0x7f0] sm:$0xff]  ;;  %v2270_v56 = vld [vmem:[#allocation2 + $0x648] sm:$0xff] }
 0x41d   :  { %2568 = vmatpush.msra.mxu2 %v2237_v24  ;;  %2588 = vmatpush.msra.mxu3 %v2253_v54  ;;  %v2286_v60 = vld [vmem:[#allocation2 + $0x6c8] sm:$0xff]  ;;  %v2068_v24 = vsel %vm981_vm15, %v4184_v49, %v2067_v21  ;;  %v2300_v49 = vld [vmem:[#allocation2 + $0x738] sm:$0xff] }
 0x41e   :  { %2485 = vmatmul.f32.vlgmr.msrb.gmra.mxu2 %v2465_v50  ;;  %2505 = vmatmul.f32.vlgmr.msrb.gmra.mxu3 %v2466_v43  ;;  %v2306_v44 = vld [vmem:[#allocation2 + $0x768] sm:$0xff]  ;;  %v2269_v50 = vld [vmem:[#allocation2 + $0x640] sm:$0xff] }
 0x41f   :  { %2527 = vmatpush.msra.mxu0 %v2200_v37  ;;  %2547 = vmatpush.msra.mxu1 %v2216_v32  ;;  %v2322_v57 = vld [vmem:[#allocation2 + $0x7e8] sm:$0xff]  ;;  %v2285_v43 = vld [vmem:[#allocation2 + $0x6c0] sm:$0xff]  ;;  %v2268_v32 = vld [vmem:[#allocation2 + $0x638] sm:$0xff] }
 0x420   :  { %2569 = vmatpush.msra.mxu2 %v2236_v3  ;;  %2589 = vmatpush.msra.mxu3 %v2252_v9  ;;  %v2321_v37 = vld [vmem:[#allocation2 + $0x7e0] sm:$0xff]  ;;  %v2284_v3 = vld [vmem:[#allocation2 + $0x6b8] sm:$0xff] }
 0x421   :  { %2528 = vmatpush.msra.mxu0 %v2199_v61  ;;  %2548 = vmatpush.msra.mxu1 %v2215_v41  ;;  %v2304_v9 = vld [vmem:[#allocation2 + $0x758] sm:$0xff]  ;;  %v2267_v41 = vld [vmem:[#allocation2 + $0x630] sm:$0xff] }
 0x422   :  { %2570 = vmatpush.msra.mxu2 %v2235_v35  ;;  %2590 = vmatpush.msra.mxu3 %v2251_v6  ;;  %v2320_v61 = vld [vmem:[#allocation2 + $0x7d8] sm:$0xff]  ;;  %v2303_v35 = vld [vmem:[#allocation2 + $0x750] sm:$0xff] }
 0x423   :  { %2529 = vmatpush.msra.mxu0 %v2198_v46  ;;  %2549 = vmatpush.msra.mxu1 %v2214_v20  ;;  %v2511_v29 = vld.sshfl [vmem:[#allocation1] sm:$0xff pattern:$0x75316420]  ;;  %v2512_v5 = vld.sshfl [vmem:[#allocation1 + $0x8] sm:$0xff pattern:$0x75316420] }
 0x424   :  { %2571 = vmatpush.msra.mxu2 %v2234_v63  ;;  %2591 = vmatpush.msra.mxu3 %v2250_v14  ;;  %2556 = vst [vmem:[#allocation1] ss:$2 sm:$0xff] %v2064_v17  ;;  %v2319_v6 = vld [vmem:[#allocation2 + $0x7d0] sm:$0xff]  ;;  %v2302_v46 = vld [vmem:[#allocation2 + $0x748] sm:$0xff]  ;;  %v2265_v63 = vld [vmem:[#allocation2 + $0x620] sm:$0xff] }
 0x425   :  { %2530 = vmatpush.msra.mxu0 %v2197_v51  ;;  %2550 = vmatpush.msra.mxu1 %v2213_v25  ;;  %v2318_v20 = vld [vmem:[#allocation2 + $0x7c8] sm:$0xff]  ;;  %v2281_v14 = vld [vmem:[#allocation2 + $0x6a0] sm:$0xff]  ;;  %v2316_v17 = vld [vmem:[#allocation2 + $0x7b8] sm:$0xff] }
 0x426   :  { %2572 = vmatpush.msra.mxu2 %v2233_v42  ;;  %2592 = vmatpush.msra.mxu3 %v2249_v58  ;;  %v2301_v51 = vld [vmem:[#allocation2 + $0x740] sm:$0xff]  ;;  %v2264_v42 = vld [vmem:[#allocation2 + $0x618] sm:$0xff] }
 0x427   :  { %2607 = vmatpush.msrb.mxu0 %v2276_v27  ;;  %2627 = vmatpush.msrb.mxu1 %v2292_v39  ;;  %v2317_v25 = vld [vmem:[#allocation2 + $0x7c0] sm:$0xff]  ;;  %v2280_v58 = vld [vmem:[#allocation2 + $0x698] sm:$0xff]  ;;  %v2315_v27 = vld [vmem:[#allocation2 + $0x7b0] sm:$0xff] }
 0x428   :  { %2531 = vmatmul.f32.vlgmr.msra.gmra.mxu0 %v2511_v29  ;;  %2551 = vmatmul.f32.vlgmr.msra.gmra.mxu1 %v2512_v5  ;;  %v2263_v29 = vld [vmem:[#allocation2 + $0x610] sm:$0xff]  ;;  %v2262_v39 = vld [vmem:[#allocation2 + $0x608] sm:$0xff] }
 0x429   :  { %2573 = vmatpush.msra.mxu2 %v2232_v40  ;;  %2593 = vmatpush.msra.mxu3 %v2248_v59  ;;  %v2279_v5 = vld [vmem:[#allocation2 + $0x690] sm:$0xff]  ;;  %v2278_v40 = vld [vmem:[#allocation2 + $0x688] sm:$0xff] }
 0x42a   :  { %2608 = vmatpush.msrb.mxu0 %v2275_v62  ;;  %2628 = vmatpush.msrb.mxu1 %v2291_v45  ;;  %v2298_v59 = vld [vmem:[#allocation2 + $0x728] sm:$0xff]  ;;  %v2277_v62 = vld [vmem:[#allocation2 + $0x680] sm:$0xff] }
 0x42b   :  { %2574 = vmatpush.msra.mxu2 %v2231_v19  ;;  %2594 = vmatpush.msra.mxu3 %v2247_v47  ;;  %v2557_v31 = vld.sshfl [vmem:[#allocation1] sm:$0xff pattern:$0x75316420]  ;;  %v2558_v22 = vld.sshfl [vmem:[#allocation1 + $0x8] sm:$0xff pattern:$0x75316420] }
 0x42c   :  { %2609 = vmatpush.msrb.mxu0 %v2274_v55  ;;  %2629 = vmatpush.msrb.mxu1 %v2290_v18  ;;  %2602 = vst [vmem:[#allocation1] ss:$2 sm:$0xff] %v2066_v12  ;;  %v2297_v45 = vld [vmem:[#allocation2 + $0x720] sm:$0xff]  ;;  %v2296_v47 = vld [vmem:[#allocation2 + $0x718] sm:$0xff]  ;;  %v2295_v18 = vld [vmem:[#allocation2 + $0x710] sm:$0xff] }
 0x42d   :  { %2575 = vmatpush.msra.mxu2 %v2230_v10  ;;  %2595 = vmatpush.msra.mxu3 %v2246_v26  ;;  %v2313_v19 = vld [vmem:[#allocation2 + $0x7a0] sm:$0xff]  ;;  %v2312_v55 = vld [vmem:[#allocation2 + $0x798] sm:$0xff]  ;;  %v2311_v10 = vld [vmem:[#allocation2 + $0x790] sm:$0xff] }
 0x42e   :  { %2610 = vmatpush.msrb.mxu0 %v2273_v0  ;;  %2630 = vmatpush.msrb.mxu1 %v2289_v16  ;;  %v2294_v26 = vld [vmem:[#allocation2 + $0x708] sm:$0xff]  ;;  %v2293_v16 = vld [vmem:[#allocation2 + $0x700] sm:$0xff] }
 0x42f   :  { %2576 = vmatpush.msra.mxu2 %v2229_v38  ;;  %2596 = vmatpush.msra.mxu3 %v2245_v11  ;;  %v2310_v0 = vld [vmem:[#allocation2 + $0x788] sm:$0xff]  ;;  %v2309_v12 = vld [vmem:[#allocation2 + $0x780] sm:$0xff] }
 0x430   :  { %2611 = vmatpush.msrb.mxu0 %v2272_v28  ;;  %2631 = vmatpush.msrb.mxu1 %v2288_v53 }
 0x431   :  { %2653 = vmatpush.msrb.mxu2 %v2308_v36  ;;  %2673 = vmatpush.msrb.mxu3 %v2324_v15 }
 0x432   :  { %2577 = vmatmul.f32.vlgmr.msra.gmra.mxu2 %v2557_v31  ;;  %2597 = vmatmul.f32.vlgmr.msra.gmra.mxu3 %v2558_v22 }
 0x433   :  { %2612 = vmatpush.msrb.mxu0 %v2271_v48  ;;  %2632 = vmatpush.msrb.mxu1 %v2287_v33  ;;  %v4195_v54 = vld.sshfl [vmem:[#allocation1] sm:$0xff pattern:$0x75316420]  ;;  %v4197_v23 = vld.sshfl [vmem:[#allocation1 + $0x8] sm:$0xff pattern:$0x75316420] }
 0x434   :  { %2654 = vmatpush.msrb.mxu2 %v2307_v2  ;;  %2674 = vmatpush.msrb.mxu3 %v2323_v1  ;;  %2648 = vst [vmem:[#allocation1] ss:$2 sm:$0xff] %v2068_v24 }
 0x435   :  { %2613 = vmatpush.msrb.mxu0 %v2270_v56  ;;  %2633 = vmatpush.msrb.mxu1 %v2286_v60 }
 0x436   :  { %2655 = vmatpush.msrb.mxu2 %v2306_v44  ;;  %2675 = vmatpush.msrb.mxu3 %v2322_v57 }
 0x437   :  { %2614 = vmatpush.msrb.mxu0 %v2269_v50  ;;  %2634 = vmatpush.msrb.mxu1 %v2285_v43 }
 0x438   :  { %2656 = vmatpush.msrb.mxu2 %v2305_v8  ;;  %2676 = vmatpush.msrb.mxu3 %v2321_v37 }
 0x439   :  { %2615 = vmatpush.msrb.mxu0 %v2268_v32  ;;  %2635 = vmatpush.msrb.mxu1 %v2284_v3 }
 0x43a   :  { %2657 = vmatpush.msrb.mxu2 %v2304_v9  ;;  %2677 = vmatpush.msrb.mxu3 %v2320_v61 }
 0x43b   :  { %2616 = vmatpush.msrb.mxu0 %v2267_v41  ;;  %2636 = vmatpush.msrb.mxu1 %v2283_v30  ;;  %v2649_v31 = vld.sshfl [vmem:[#allocation1] sm:$0xff pattern:$0x75316420]  ;;  %v2650_v22 = vld.sshfl [vmem:[#allocation1 + $0x8] sm:$0xff pattern:$0x75316420] }
 0x43c   :  { %2658 = vmatpush.msrb.mxu2 %v2303_v35  ;;  %2678 = vmatpush.msrb.mxu3 %v2319_v6 }
 0x43d   :  { %2617 = vmatpush.msrb.mxu0 %v2266_v4  ;;  %2637 = vmatpush.msrb.mxu1 %v2282_v34 }
 0x43e   :  { %2659 = vmatpush.msrb.mxu2 %v2302_v46  ;;  %2679 = vmatpush.msrb.mxu3 %v2318_v20 }
 0x43f   :  { %2618 = vmatpush.msrb.mxu0 %v2265_v63  ;;  %2638 = vmatpush.msrb.mxu1 %v2281_v14 }
 0x440   :  { %2660 = vmatpush.msrb.mxu2 %v2301_v51  ;;  %2680 = vmatpush.msrb.mxu3 %v2317_v25  ;;  %v2782_v25 = vld [vmem:[%s4222_s7] ss:$0 sm:$0xff] }
 0x441   :  { %2619 = vmatpush.msrb.mxu0 %v2264_v42  ;;  %2639 = vmatpush.msrb.mxu1 %v2280_v58 }
 0x442   :  { %2661 = vmatpush.msrb.mxu2 %v2300_v49  ;;  %2681 = vmatpush.msrb.mxu3 %v2316_v17 }
 0x443   :  { %2620 = vmatpush.msrb.mxu0 %v2263_v29  ;;  %2640 = vmatpush.msrb.mxu1 %v2279_v5 }
 0x444   :  { %2662 = vmatpush.msrb.mxu2 %v2299_v13  ;;  %2682 = vmatpush.msrb.mxu3 %v2315_v27 }
 0x445   :  { %2621 = vmatpush.msrb.mxu0 %v2262_v39  ;;  %2641 = vmatpush.msrb.mxu1 %v2278_v40 }
 0x446   :  { %2663 = vmatpush.msrb.mxu2 %v2298_v59  ;;  %2683 = vmatpush.msrb.mxu3 %v2314_v52 }
 0x447   :  { %2622 = vmatpush.msrb.mxu0 %v2261_v7  ;;  %2642 = vmatpush.msrb.mxu1 %v2277_v62 }
 0x448   :  { %2664 = vmatpush.msrb.mxu2 %v2297_v45  ;;  %2684 = vmatpush.msrb.mxu3 %v2313_v19 }
 0x449   :  { %2623 = vmatmul.f32.vlgmr.msrb.gmra.mxu0 %v4195_v54  ;;  %2643 = vmatmul.f32.vlgmr.msrb.gmra.mxu1 %v4197_v23 }
 0x44a   :  { %2665 = vmatpush.msrb.mxu2 %v2296_v47  ;;  %2685 = vmatpush.msrb.mxu3 %v2312_v55 }
 0x44c   :  { %2666 = vmatpush.msrb.mxu2 %v2295_v18  ;;  %2686 = vmatpush.msrb.mxu3 %v2311_v10 }
 0x44e   :  { %2667 = vmatpush.msrb.mxu2 %v2294_v26  ;;  %2687 = vmatpush.msrb.mxu3 %v2310_v0 }
 0x450   :  { %2668 = vmatpush.msrb.mxu2 %v2293_v16  ;;  %2688 = vmatpush.msrb.mxu3 %v2309_v12 }
 0x451   :  { %2669 = vmatmul.f32.vlgmr.msrb.gmra.mxu2 %v2649_v31  ;;  %2689 = vmatmul.f32.vlgmr.msrb.gmra.mxu3 %v2650_v22 }
 0x481   :  { %v2348_v38 = vpop.f32.mrf.mxu0  ;;  %v2368_v11 = vpop.f32.mrf.mxu1 }
 0x482   :  { %v2369_v2 = vadd.f32 %v2368_v11, %v2348_v38 }
 0x484   :  { %v2693_v57 = vsel %vm695_vm4, %v2369_v2, 0.0 }
 0x48f   :  { %v2394_v28 = vpop.f32.mrf.mxu2  ;;  %v2414_v53 = vpop.f32.mrf.mxu3 }
 0x490   :  { %v2415_v21 = vadd.f32 %v2414_v53, %v2394_v28 }
 0x492   :  { %v2440_v36 = vpop.f32.mrf.mxu0  ;;  %v2460_v15 = vpop.f32.mrf.mxu1  ;;  %v2694_v60 = vsel %vm695_vm4, %v2415_v21, 0.0 }
 0x493   :  { %v2461_v44 = vadd.f32 %v2460_v15, %v2440_v36  ;;  %v2695_v54 = vadd.f32 %v2694_v60, %v2693_v57 }
 0x495   :  { %v2696_v23 = vsel %vm695_vm4, %v2461_v44, 0.0 }
 0x496   :  { %v2697_v32 = vadd.f32 %v2696_v23, %v2695_v54 }
 0x4a1   :  { %v2486_v48 = vpop.f32.mrf.mxu2  ;;  %v2506_v33 = vpop.f32.mrf.mxu3 }
 0x4a2   :  { %v2507_v24 = vadd.f32 %v2506_v33, %v2486_v48 }
 0x4a4   :  { %v2698_v8 = vsel %vm695_vm4, %v2507_v24, 0.0 }
 0x4a5   :  { %v2532_v1 = vpop.f32.mrf.mxu0  ;;  %v2552_v56 = vpop.f32.mrf.mxu1  ;;  %v2699_v41 = vadd.f32 %v2698_v8, %v2697_v32 }
 0x4a6   :  { %v2553_v37 = vadd.f32 %v2552_v56, %v2532_v1 }
 0x4a8   :  { %v2700_v30 = vsel %vm695_vm4, %v2553_v37, 0.0 }
 0x4a9   :  { %v2701_v4 = vadd.f32 %v2700_v30, %v2699_v41 }
 0x4b5   :  { %v2578_v50 = vpop.f32.mrf.mxu2  ;;  %v2598_v43 = vpop.f32.mrf.mxu3 }
 0x4b6   :  { %v2599_v61 = vadd.f32 %v2598_v43, %v2578_v50 }
 0x4b8   :  { %v2702_v6 = vsel %vm695_vm4, %v2599_v61, 0.0 }
 0x4b9   :  { %v2703_v46 = vadd.f32 %v2702_v6, %v2701_v4 }
 0x4c6   :  { %v2624_v3 = vpop.f32.mrf.mxu0  ;;  %v2644_v9 = vpop.f32.mrf.mxu1 }
 0x4c7   :  { %v2645_v35 = vadd.f32 %v2644_v9, %v2624_v3 }
 0x4c9   :  { %v2704_v34 = vsel %vm695_vm4, %v2645_v35, 0.0 }
 0x4ca   :  { %v2705_v51 = vadd.f32 %v2704_v34, %v2703_v46 }
 0x4d4   :  { %v2670_v20 = vpop.f32.mrf.mxu2  ;;  %v2690_v63 = vpop.f32.mrf.mxu3 }
 0x4d5   :  { %v2691_v14 = vadd.f32 %v2690_v63, %v2670_v20 }
 0x4d7   :  { %v2706_v42 = vsel %vm695_vm4, %v2691_v14, 0.0 }
 0x4d8   :  { %v2707_v58 = vadd.f32 %v2706_v42, %v2705_v51 }
 0x4da   :  { %v2712_v49 = vadd.f32 %v2782_v25, %v2707_v58 }
 0x4dc   :  { %2713 = vst [vmem:[#allocation5] sm:$0xf] %v2712_v49 }
 0x4dd   :  { %2724 = dma.vmem_to_hbm [thread:$0]  %s2720_s24, 64, %s2722_s9, [#allocation4]  }
 0x4de   :  { %2849 = dma.done.wait [#allocation4], 64  }
 0x4df   :  { %2850 = vsyncadd [#allocation4], 4294967232 }
 0x4e0   :  { %2729 = vsyncpa [#allocation3], 1 }
 0x4e1   :  { %2730 = vsyncpa [#allocation4], 1 }

</bundles_post_ra>
